<compile_context>
chip_gen: v5e
topology: v5e:2x2
jax: 0.10.0
libtpu: 0.0.40
codegen_flags: <defaults>
</compile_context>

<pallas_src>
import jax
import jax.numpy as jnp
from jax.experimental import pallas as pl
from jax.experimental.pallas import tpu as pltpu

# ---------------- module hyper-parameters (kwargs of SupervisedTransformer) -----
COND_SIZE    = 10                      # control=True -> cond_size = 10
IN_CH        = 64                      # flow_in_channels   (input latent: (BS, 64))
MID_CH       = 128                     # flow_mid_channels  (coupling MLP hidden dim)
HIDDEN_DEPTH = 2                       # flow_hidden_depth
N_FLOWS      = 4                       # n_flows
EMBED_CH     = 64                      # flow_embedding_channels
IMG_C, IMG_H, IMG_W = 3, 64, 64        # cond[0] : (BS, rgb, 64, 64)
EMB_DIM      = EMBED_CH + 3 * COND_SIZE  # 94 (control=True)
EMB_PAD      = 96                      # embedding zero-padded to an 8-aligned width
HALF         = IN_CH // 2              # 32
C_IN_PAD     = HALF + EMB_PAD          # 128 (first-layer K, lane-aligned)
PACKED_H     = 2 * MID_CH              # 256 (output-stacked s|t first-layer width)

LRELU     = 0.01                       # nn.LeakyReLU default slope (coupling MLPs)
INV_LRELU = 0.9                        # InvLeakyRelu alpha between flow blocks
# conditioning_option = "none" (hcond == embedding for every flow block)


# =============================== Pallas kernels ==================================

def _lrelu(y):
    return jnp.where(y >= 0, y, LRELU * y)


def _coupling(xa_b, emb_b, p, w0_ref, b0_ref, wm_ref, bm_ref, wl_ref, bl_ref):
    """One coupling pass (s-net + t-net) for tower p in {0, 1}.

    xa_b: (B, 32) bf16 conditioning half; emb_b: (B, 96) bf16 padded embedding.
    First layer is output-stacked (one 256-wide matmul per input chunk, no zero
    padding waste); hidden / last layers use the raw per-net weights so no zero
    blocks are streamed from HBM.  Returns (s, t) in f32, each (B, 32).
    """
    ks, kt = 2 * p, 2 * p + 1           # raw net indices: s-net, t-net of this pass

    w0 = w0_ref[0, p]                                           # (128, 256) bf16
    y = (jnp.dot(xa_b, w0[:HALF], preferred_element_type=jnp.float32)
         + jnp.dot(emb_b, w0[HALF:], preferred_element_type=jnp.float32)
         + b0_ref[0, p:p + 1, :])
    y = _lrelu(y)

    ys = y[:, :MID_CH]                  # vreg-aligned lane split (free)
    yt = y[:, MID_CH:]
    for d in range(wm_ref.shape[2]):
        ys = _lrelu(jnp.dot(ys.astype(jnp.bfloat16), wm_ref[0, ks, d],
                            preferred_element_type=jnp.float32)
                    + bm_ref[0, ks, d:d + 1, :])
        yt = _lrelu(jnp.dot(yt.astype(jnp.bfloat16), wm_ref[0, kt, d],
                            preferred_element_type=jnp.float32)
                    + bm_ref[0, kt, d:d + 1, :])

    s = jnp.tanh(jnp.dot(ys.astype(jnp.bfloat16), wl_ref[0, ks],
                         preferred_element_type=jnp.float32)
                 + bl_ref[0, ks:ks + 1, :])
    t = (jnp.dot(yt.astype(jnp.bfloat16), wl_ref[0, kt],
                 preferred_element_type=jnp.float32)
         + bl_ref[0, kt:kt + 1, :])
    return s, t


def flow_kernel(x_ref, emb_ref, loc_ref, scl_ref,
                w0_ref, b0_ref, wm_ref, bm_ref, wl_ref, bl_ref, perm_ref,
                out_ref, ld_ref):
    """One grid step == one ConditionalFlatDoubleCouplingFlowBlock.

    out_ref / ld_ref double as the VMEM-resident carry (constant block index)."""
    i = pl.program_id(0)

    @pl.when(i == 0)
    def _():
        out_ref[...] = x_ref[...]
        ld_ref[...] = jnp.zeros(ld_ref.shape, ld_ref.dtype)

    h = out_ref[...]
    ld = ld_ref[...]
    emb_b = emb_ref[...].astype(jnp.bfloat16)

    # --- ActNorm (logdet = sum(log|scale|), identical per sample) ---
    loc = loc_ref[0]                       # (1, C)
    scl = scl_ref[0]                       # (1, C)
    h = scl * (h + loc)
    ld = ld + jnp.sum(jnp.log(jnp.abs(scl)))

    # --- InvLeakyRelu(alpha=0.9); reference impl contributes 0 to logdet ---
    h = jnp.where(h >= 0, h, INV_LRELU * h)

    # --- ConditionalDoubleVectorCouplingBlock (two coupling passes) ---
    xa = h[:, :HALF]
    xb = h[:, HALF:]

    # pass 0: transform second half conditioned on (first half, embedding)
    s0, t0 = _coupling(xa.astype(jnp.bfloat16), emb_b, 0,
                       w0_ref, b0_ref, wm_ref, bm_ref, wl_ref, bl_ref)
    xb = xb * jnp.exp(s0) + t0
    ld = ld + jnp.sum(s0, axis=1, keepdims=True)

    # pass 1: swap halves, transform the other half
    s1, t1 = _coupling(xb.astype(jnp.bfloat16), emb_b, 1,
                       w0_ref, b0_ref, wm_ref, bm_ref, wl_ref, bl_ref)
    xa = xa * jnp.exp(s1) + t1
    ld = ld + jnp.sum(s1, axis=1, keepdims=True)

    # --- Shuffle: concat([xb, xa]) @ perm, done as split matmuls (no lane concat).
    #     perm entries are exact 0/1 so the f32 matmul is an exact permutation.
    perm = perm_ref[0].astype(jnp.float32)                      # (C, C)
    h = (jnp.dot(xb, perm[:HALF], preferred_element_type=jnp.float32)
         + jnp.dot(xa, perm[HALF:], preferred_element_type=jnp.float32))

    out_ref[...] = h
    ld_ref[...] = ld


def encoder_kernel(x_ref, w_ref, b_ref, o_ref):
    # TODO(synk): pretrained ResnetEncoder (OmegaConf config + torch checkpoint load)
    # is replaced by a deterministic synthetic linear projection of the flattened image.
    k = pl.program_id(0)

    @pl.when(k == 0)
    def _():
        o_ref[...] = jnp.zeros(o_ref.shape, o_ref.dtype) + b_ref[...]

    o_ref[...] += jnp.dot(x_ref[...].astype(jnp.bfloat16), w_ref[...],
                          preferred_element_type=jnp.float32)


# =============================== wrappers ========================================

def encode(cond_img, enc_w, enc_b, *, tk=4096):
    B = cond_img.shape[0]
    xf = cond_img.reshape(B, -1)         # NCHW -> (B, C*H*W); stays f32, cast in-kernel
    F = xf.shape[1]
    E = enc_w.shape[1]
    assert F % tk == 0
    nk = F // tk
    return pl.pallas_call(
        encoder_kernel,
        out_shape=jax.ShapeDtypeStruct((B, E), jnp.float32),
        grid=(nk,),
        in_specs=[pl.BlockSpec((B, tk), lambda k: (0, k)),
                  pl.BlockSpec((tk, E), lambda k: (k, 0)),
                  pl.BlockSpec((1, E), lambda k: (0, 0))],
        out_specs=pl.BlockSpec((B, E), lambda k: (0, 0)),
        compiler_params=pltpu.CompilerParams(dimension_semantics=("arbitrary",)),
    )(xf, enc_w, enc_b)


def flow_forward(x, emb, kp):
    B, C = x.shape
    E = emb.shape[1]
    nf = kp['an_loc'].shape[0]
    D = kp['wm'].shape[2]
    K0 = kp['w0'].shape[2]          # 128
    H2 = kp['w0'].shape[3]          # 256

    out, ld = pl.pallas_call(
        flow_kernel,
        out_shape=(jax.ShapeDtypeStruct((B, C), jnp.float32),
                   jax.ShapeDtypeStruct((B, 1), jnp.float32)),
        grid=(nf,),
        in_specs=[
            pl.BlockSpec((B, C), lambda i: (0, 0)),                     # x
            pl.BlockSpec((B, E), lambda i: (0, 0)),                     # padded embedding
            pl.BlockSpec((1, 1, C), lambda i: (i, 0, 0)),               # actnorm loc
            pl.BlockSpec((1, 1, C), lambda i: (i, 0, 0)),               # actnorm scale
            pl.BlockSpec((1, 2, K0, H2), lambda i: (i, 0, 0, 0)),       # packed first W (bf16)
            pl.BlockSpec((1, 2, H2), lambda i: (i, 0, 0)),              # packed first b
            pl.BlockSpec((1, 4, D, MID_CH, MID_CH), lambda i: (i, 0, 0, 0, 0)),  # raw mid W
            pl.BlockSpec((1, 4, D, MID_CH), lambda i: (i, 0, 0, 0)),    # raw mid b
            pl.BlockSpec((1, 4, MID_CH, HALF), lambda i: (i, 0, 0, 0)), # raw last W (bf16)
            pl.BlockSpec((1, 4, HALF), lambda i: (i, 0, 0)),            # raw last b
            pl.BlockSpec((1, C, C), lambda i: (i, 0, 0)),               # shuffle perm (bf16)
        ],
        out_specs=(pl.BlockSpec((B, C), lambda i: (0, 0)),
                   pl.BlockSpec((B, 1), lambda i: (0, 0))),
        compiler_params=pltpu.CompilerParams(dimension_semantics=("arbitrary",)),
    )(x, emb, kp['an_loc'], kp['an_scale'], kp['w0'], kp['b0'],
      kp['wm'], kp['bm'], kp['wl'], kp['bl'], kp['perm'])
    return out, ld[:, 0]


def embed_pos(pos):
    # pos * cond_size - 0.0001, .long() (truncation), one-hot x3, concat
    idx = (pos * COND_SIZE - 0.0001).astype(jnp.int32)
    return jnp.concatenate(
        [jax.nn.one_hot(idx[:, j], COND_SIZE, dtype=jnp.float32) for j in range(3)],
        axis=1)


def supervised_transformer_forward(v, cond_img, cond_end, kp):
    """v: (B, 64); cond_img: (B, 3, 64, 64); cond_end: (B, 3).  Returns (out, logdet)."""
    embed = encode(cond_img, kp['enc_w'], kp['enc_b'])             # (B, EMBED_CH)
    embed = jnp.concatenate([embed, embed_pos(cond_end)], axis=1)  # control=True, (B, 94)
    embed = jnp.pad(embed, ((0, 0), (0, EMB_PAD - embed.shape[1])))  # lane-align to 96
    return flow_forward(v, embed, kp)


# =============================== parameter packing ===============================

def init_raw_params(key):
    """Master f32 parameters in the original (unpacked) layout."""
    c_in = HALF + EMB_DIM
    img_feat = IMG_C * IMG_H * IMG_W
    ks = jax.random.split(key, 11)
    p = {
        'an_loc':   0.05 * jax.random.normal(ks[0], (N_FLOWS, 1, IN_CH), jnp.float32),
        'an_scale': 1.0 + 0.05 * jax.random.normal(ks[1], (N_FLOWS, 1, IN_CH), jnp.float32),
        'w0': 0.02 * jax.random.normal(ks[2], (N_FLOWS, 4, c_in, MID_CH), jnp.float32),
        'b0': 0.01 * jax.random.normal(ks[3], (N_FLOWS, 4, MID_CH), jnp.float32),
        'wm': 0.02 * jax.random.normal(ks[4], (N_FLOWS, 4, HIDDEN_DEPTH, MID_CH, MID_CH), jnp.float32),
        'bm': 0.01 * jax.random.normal(ks[5], (N_FLOWS, 4, HIDDEN_DEPTH, MID_CH), jnp.float32),
        'wl': 0.02 * jax.random.normal(ks[6], (N_FLOWS, 4, MID_CH, HALF), jnp.float32),
        'bl': 0.01 * jax.random.normal(ks[7], (N_FLOWS, 4, HALF), jnp.float32),
        'enc_w': 0.01 * jax.random.normal(ks[8], (img_feat, EMBED_CH), jnp.float32),
        'enc_b': 0.01 * jax.random.normal(ks[9], (1, EMBED_CH), jnp.float32),
    }
    perm_keys = jax.random.split(ks[10], N_FLOWS)
    perms = []
    for i in range(N_FLOWS):
        idx = jax.random.permutation(perm_keys[i], IN_CH)
        perms.append(jax.nn.one_hot(idx, IN_CH, dtype=jnp.float32).T)  # out[:,k]=h[:,idx[k]]
    p['perm'] = jnp.stack(perms)
    return p


def quantize_weights(p):
    """Weights that get streamed every call are held in bf16 (halves HBM traffic)."""
    q = dict(p)
    for k in ('w0', 'wm', 'wl', 'enc_w', 'perm'):
        q[k] = p[k].astype(jnp.bfloat16)
    return q


def pack_kernel_params(q):
    """Only the first coupling layer is packed (output-stacked, 256 wide).

    Hidden / last layers keep the raw per-net layout so no zero blocks are
    streamed from HBM (the flow kernel is weight-DMA bound at small batch)."""
    nf, c_in = N_FLOWS, HALF + EMB_DIM
    w0, b0 = q['w0'], q['b0']

    w0p = jnp.zeros((nf, 2, C_IN_PAD, PACKED_H), jnp.bfloat16)
    b0p = jnp.zeros((nf, 2, PACKED_H), jnp.float32)
    for p_ in range(2):                   # tower p_ fuses nets (s=2p, t=2p+1)
        ks, kt = 2 * p_, 2 * p_ + 1
        # rows [0:32]=xa, [32:126]=emb, [126:128]=0 pad; cols [0:128]=s, [128:256]=t
        w0p = w0p.at[:, p_, :c_in, :MID_CH].set(w0[:, ks])
        w0p = w0p.at[:, p_, :c_in, MID_CH:].set(w0[:, kt])
        b0p = b0p.at[:, p_, :MID_CH].set(b0[:, ks])
        b0p = b0p.at[:, p_, MID_CH:].set(b0[:, kt])

    return {'an_loc': q['an_loc'], 'an_scale': q['an_scale'],
            'w0': w0p, 'b0': b0p,
            'wm': q['wm'], 'bm': q['bm'], 'wl': q['wl'], 'bl': q['bl'],
            'perm': q['perm'], 'enc_w': q['enc_w'], 'enc_b': q['enc_b']}


# =============================== pure-JAX reference ==============================
# Uses the same bf16-rounded weights and mimics bf16 matmul inputs (f32 accumulate),
# but in the original unpacked layout -> validates both the packing and the kernels.

def _bdot(a, w):
    return jnp.dot(a.astype(jnp.bfloat16).astype(jnp.float32), w.astype(jnp.float32))


def _mlp_ref(x, w0, b0, wm, bm, wl, bl, use_tanh):
    y = _bdot(x, w0) + b0
    y = jnp.where(y >= 0, y, LRELU * y)
    for d in range(wm.shape[0]):
        y = _bdot(y, wm[d]) + bm[d]
        y = jnp.where(y >= 0, y, LRELU * y)
    y = _bdot(y, wl) + bl
    return jnp.tanh(y) if use_tanh else y


def flow_reference(x, emb, q):
    B, C = x.shape
    h = x
    ld = jnp.zeros((B,), jnp.float32)
    for i in range(q['an_loc'].shape[0]):
        loc, scl = q['an_loc'][i, 0], q['an_scale'][i, 0]
        h = scl * (h + loc)
        ld = ld + jnp.sum(jnp.log(jnp.abs(scl)))
        h = jnp.where(h >= 0, h, INV_LRELU * h)
        xa, xb = h[:, :HALF], h[:, HALF:]
        ci = jnp.concatenate([xa, emb], axis=1)
        s = _mlp_ref(ci, q['w0'][i, 0], q['b0'][i, 0], q['wm'][i, 0], q['bm'][i, 0],
                     q['wl'][i, 0], q['bl'][i, 0], True)
        t = _mlp_ref(ci, q['w0'][i, 1], q['b0'][i, 1], q['wm'][i, 1], q['bm'][i, 1],
                     q['wl'][i, 1], q['bl'][i, 1], False)
        xb = xb * jnp.exp(s) + t
        ld = ld + jnp.sum(s, axis=1)
        xa2, xb2 = xb, xa
        ci2 = jnp.concatenate([xa2, emb], axis=1)
        s2 = _mlp_ref(ci2, q['w0'][i, 2], q['b0'][i, 2], q['wm'][i, 2], q['bm'][i, 2],
                      q['wl'][i, 2], q['bl'][i, 2], True)
        t2 = _mlp_ref(ci2, q['w0'][i, 3], q['b0'][i, 3], q['wm'][i, 3], q['bm'][i, 3],
                      q['wl'][i, 3], q['bl'][i, 3], False)
        xb2 = xb2 * jnp.exp(s2) + t2
        ld = ld + jnp.sum(s2, axis=1)
        h = jnp.concatenate([xa2, xb2], axis=1)
        h = h @ q['perm'][i].astype(jnp.float32)
    return h, ld


def reference_forward(v, cond_img, cond_end, q):
    xf = cond_img.reshape(v.shape[0], -1)
    emb = _bdot(xf, q['enc_w']) + q['enc_b']
    emb = jnp.concatenate([emb, embed_pos(cond_end)], axis=1)
    return flow_reference(v, emb, q)


# =============================== main ============================================

if __name__ == "__main__":
    B = 8
    key = jax.random.PRNGKey(0)
    k1, k2, k3, kp = jax.random.split(key, 4)

    v        = jax.random.normal(k1, (B, IN_CH), jnp.float32)                 # input latent
    cond_img = jax.random.uniform(k2, (B, IMG_C, IMG_H, IMG_W), jnp.float32)  # cond[0]
    cond_end = jax.random.uniform(k3, (B, 3), jnp.float32)                    # cond[1] (xyz)

    raw = init_raw_params(kp)
    q = quantize_weights(raw)           # bf16 weights shared by kernel & reference
    kparams = pack_kernel_params(q)

    fwd = jax.jit(supervised_transformer_forward)
    out, logdet = fwd(v, cond_img, cond_end, kparams)
    out, logdet = jax.block_until_ready((out, logdet))

    out_ref, ld_ref = reference_forward(v, cond_img, cond_end, q)
    assert out.shape == (B, IN_CH) and logdet.shape == (B,)
    assert bool(jnp.allclose(out, out_ref, atol=1e-2, rtol=1e-2)), "flow output mismatch"
    assert bool(jnp.allclose(logdet, ld_ref, atol=1e-2, rtol=1e-2)), "logdet mismatch"

    print("KERNEL_OK")
</pallas_src>

<mosaic_0001>
module attributes {stable_mosaic.version = 11 : i64} {
  func.func @encoder_kernel(%arg0: i32, %arg1: memref<8x4096xf32, #tpu.memory_space<vmem>>, %arg2: memref<4096x64xbf16, #tpu.memory_space<vmem>>, %arg3: memref<1x64xf32, #tpu.memory_space<vmem>>, %arg4: memref<8x64xf32, #tpu.memory_space<vmem>>) attributes {dimension_semantics = [#tpu.dimension_semantics<arbitrary>], iteration_bounds = array<i64: 3>, scalar_prefetch = 0 : i64, scratch_operands = 0 : i64, tpu.core_type = #tpu.core_type<tc>, window_params = [{transform_indices = @transform_0, window_bounds = array<i64: 8, 4096>}, {transform_indices = @transform_1, window_bounds = array<i64: 4096, 64>}, {pipeline_mode = #tpu.pipeline_mode<synchronous>, transform_indices = @transform_2, window_bounds = array<i64: 1, 64>}, {pipeline_mode = #tpu.pipeline_mode<synchronous>, transform_indices = @transform_3, window_bounds = array<i64: 8, 64>}]} {
    %c0_i32 = arith.constant 0 : i32
    %0 = arith.cmpi eq, %arg0, %c0_i32 : i32
    %1 = arith.extui %0 : i1 to i32
    %c0_i32_0 = arith.constant 0 : i32
    %2 = arith.cmpi ne, %1, %c0_i32_0 : i32
    scf.if %2 {
      %cst_8 = arith.constant 0.000000e+00 : f32
      %10 = vector.broadcast %cst_8 : f32 to vector<8x64xf32>
      %c0_9 = arith.constant 0 : index
      %c0_10 = arith.constant 0 : index
      %11 = vector.load %arg3[%c0_9, %c0_10] : memref<1x64xf32, #tpu.memory_space<vmem>>, vector<1x64xf32>
      %12 = vector.broadcast %11 : vector<1x64xf32> to vector<8x64xf32>
      %13 = arith.addf %10, %12 : vector<8x64xf32>
      %c0_11 = arith.constant 0 : index
      %c0_12 = arith.constant 0 : index
      %14 = vector.load %arg4[%c0_11, %c0_12] : memref<8x64xf32, #tpu.memory_space<vmem>>, vector<8x64xf32>
      tpu.vector_store %arg4[%c0_11, %c0_12], %13 {strides = array<i32>} : memref<8x64xf32, #tpu.memory_space<vmem>>, vector<8x64xf32>,
    } else {
    }
    %c0 = arith.constant 0 : index
    %c0_1 = arith.constant 0 : index
    %3 = vector.load %arg4[%c0, %c0_1] : memref<8x64xf32, #tpu.memory_space<vmem>>, vector<8x64xf32>
    %c0_2 = arith.constant 0 : index
    %c0_3 = arith.constant 0 : index
    %4 = vector.load %arg1[%c0_2, %c0_3] : memref<8x4096xf32, #tpu.memory_space<vmem>>, vector<8x4096xf32>
    %5 = arith.truncf %4 : vector<8x4096xf32> to vector<8x4096xbf16>
    %c0_4 = arith.constant 0 : index
    %c0_5 = arith.constant 0 : index
    %6 = vector.load %arg2[%c0_4, %c0_5] : memref<4096x64xbf16, #tpu.memory_space<vmem>>, vector<4096x64xbf16>
    %cst = arith.constant dense<0.000000e+00> : vector<8x64xf32>
    %7 = tpu.matmul %5, %6, %cst {dimension_numbers = #tpu.dot_dimension_numbers<[1], [0], [0], [1], [0, 0, 1, 1], [], []>} : vector<8x4096xbf16>, vector<4096x64xbf16>, vector<8x64xf32> -> vector<8x64xf32>
    %8 = arith.addf %3, %7 : vector<8x64xf32>
    %c0_6 = arith.constant 0 : index
    %c0_7 = arith.constant 0 : index
    %9 = vector.load %arg4[%c0_6, %c0_7] : memref<8x64xf32, #tpu.memory_space<vmem>>, vector<8x64xf32>
    tpu.vector_store %arg4[%c0_6, %c0_7], %8 {strides = array<i32>} : memref<8x64xf32, #tpu.memory_space<vmem>>, vector<8x64xf32>,
    return
  }
  func.func @transform_0(%arg0: i32) -> (i32, i32) {
    %c0_i32 = arith.constant 0 : i32
    %c0_i32_0 = arith.constant 0 : i32
    return %c0_i32, %arg0 : i32, i32
  }
  func.func @transform_1(%arg0: i32) -> (i32, i32) {
    %c0_i32 = arith.constant 0 : i32
    %c0_i32_0 = arith.constant 0 : i32
    return %arg0, %c0_i32 : i32, i32
  }
  func.func @transform_2(%arg0: i32) -> (i32, i32) {
    %c0_i32 = arith.constant 0 : i32
    %c0_i32_0 = arith.constant 0 : i32
    %c0_i32_1 = arith.constant 0 : i32
    return %c0_i32, %c0_i32_0 : i32, i32
  }
  func.func @transform_3(%arg0: i32) -> (i32, i32) {
    %c0_i32 = arith.constant 0 : i32
    %c0_i32_0 = arith.constant 0 : i32
    %c0_i32_1 = arith.constant 0 : i32
    return %c0_i32, %c0_i32_0 : i32, i32
  }
}

module attributes {stable_mosaic.version = 11 : i64} {
  func.func @flow_kernel(%arg0: i32, %arg1: memref<8x64xf32, #tpu.memory_space<vmem>>, %arg2: memref<8x96xf32, #tpu.memory_space<vmem>>, %arg3: memref<1x1x64xf32, #tpu.memory_space<vmem>>, %arg4: memref<1x1x64xf32, #tpu.memory_space<vmem>>, %arg5: memref<1x2x128x256xbf16, #tpu.memory_space<vmem>>, %arg6: memref<1x2x256xf32, #tpu.memory_space<vmem>>, %arg7: memref<1x4x2x128x128xbf16, #tpu.memory_space<vmem>>, %arg8: memref<1x4x2x128xf32, #tpu.memory_space<vmem>>, %arg9: memref<1x4x128x32xbf16, #tpu.memory_space<vmem>>, %arg10: memref<1x4x32xf32, #tpu.memory_space<vmem>>, %arg11: memref<1x64x64xbf16, #tpu.memory_space<vmem>>, %arg12: memref<8x64xf32, #tpu.memory_space<vmem>>, %arg13: memref<8x1xf32, #tpu.memory_space<vmem>>) attributes {dimension_semantics = [#tpu.dimension_semantics<arbitrary>], iteration_bounds = array<i64: 4>, scalar_prefetch = 0 : i64, scratch_operands = 0 : i64, tpu.core_type = #tpu.core_type<tc>, window_params = [{pipeline_mode = #tpu.pipeline_mode<synchronous>, transform_indices = @transform_0, window_bounds = array<i64: 8, 64>}, {pipeline_mode = #tpu.pipeline_mode<synchronous>, transform_indices = @transform_1, window_bounds = array<i64: 8, 96>}, {transform_indices = @transform_2, window_bounds = array<i64: 1, 1, 64>}, {transform_indices = @transform_3, window_bounds = array<i64: 1, 1, 64>}, {transform_indices = @transform_4, window_bounds = array<i64: 1, 2, 128, 256>}, {transform_indices = @transform_5, window_bounds = array<i64: 1, 2, 256>}, {transform_indices = @transform_6, window_bounds = array<i64: 1, 4, 2, 128, 128>}, {transform_indices = @transform_7, window_bounds = array<i64: 1, 4, 2, 128>}, {transform_indices = @transform_8, window_bounds = array<i64: 1, 4, 128, 32>}, {transform_indices = @transform_9, window_bounds = array<i64: 1, 4, 32>}, {transform_indices = @transform_10, window_bounds = array<i64: 1, 64, 64>}, {pipeline_mode = #tpu.pipeline_mode<synchronous>, transform_indices = @transform_11, window_bounds = array<i64: 8, 64>}, {pipeline_mode = #tpu.pipeline_mode<synchronous>, transform_indices = @transform_12, window_bounds = array<i64: 8, 1>}]} {
    %c0_i32 = arith.constant 0 : i32
    %0 = arith.cmpi eq, %arg0, %c0_i32 : i32
    %1 = arith.extui %0 : i1 to i32
    %c0_i32_0 = arith.constant 0 : i32
    %2 = arith.cmpi ne, %1, %c0_i32_0 : i32
    scf.if %2 {
      %c0_172 = arith.constant 0 : index
      %c0_173 = arith.constant 0 : index
      %228 = vector.load %arg1[%c0_172, %c0_173] : memref<8x64xf32, #tpu.memory_space<vmem>>, vector<8x64xf32>
      %c0_174 = arith.constant 0 : index
      %c0_175 = arith.constant 0 : index
      %229 = vector.load %arg12[%c0_174, %c0_175] : memref<8x64xf32, #tpu.memory_space<vmem>>, vector<8x64xf32>
      tpu.vector_store %arg12[%c0_174, %c0_175], %228 {strides = array<i32>} : memref<8x64xf32, #tpu.memory_space<vmem>>, vector<8x64xf32>,
      %cst_176 = arith.constant 0.000000e+00 : f32
      %230 = vector.broadcast %cst_176 : f32 to vector<8x1xf32>
      %c0_177 = arith.constant 0 : index
      %c0_178 = arith.constant 0 : index
      %231 = vector.load %arg13[%c0_177, %c0_178] : memref<8x1xf32, #tpu.memory_space<vmem>>, vector<8x1xf32>
      tpu.vector_store %arg13[%c0_177, %c0_178], %230 {strides = array<i32>} : memref<8x1xf32, #tpu.memory_space<vmem>>, vector<8x1xf32>,
    } else {
    }
    %c0 = arith.constant 0 : index
    %c0_1 = arith.constant 0 : index
    %3 = vector.load %arg12[%c0, %c0_1] : memref<8x64xf32, #tpu.memory_space<vmem>>, vector<8x64xf32>
    %c0_2 = arith.constant 0 : index
    %c0_3 = arith.constant 0 : index
    %4 = vector.load %arg13[%c0_2, %c0_3] : memref<8x1xf32, #tpu.memory_space<vmem>>, vector<8x1xf32>
    %c0_4 = arith.constant 0 : index
    %c0_5 = arith.constant 0 : index
    %5 = vector.load %arg2[%c0_4, %c0_5] : memref<8x96xf32, #tpu.memory_space<vmem>>, vector<8x96xf32>
    %6 = arith.truncf %5 : vector<8x96xf32> to vector<8x96xbf16>
    %c0_6 = arith.constant 0 : index
    %c0_7 = arith.constant 0 : index
    %c0_8 = arith.constant 0 : index
    %7 = vector.load %arg3[%c0_6, %c0_7, %c0_8] : memref<1x1x64xf32, #tpu.memory_space<vmem>>, vector<1x1x64xf32>
    %8 = vector.shape_cast %7 : vector<1x1x64xf32> to vector<1x64xf32>
    %c0_9 = arith.constant 0 : index
    %c0_10 = arith.constant 0 : index
    %c0_11 = arith.constant 0 : index
    %9 = vector.load %arg4[%c0_9, %c0_10, %c0_11] : memref<1x1x64xf32, #tpu.memory_space<vmem>>, vector<1x1x64xf32>
    %10 = vector.shape_cast %9 : vector<1x1x64xf32> to vector<1x64xf32>
    %11 = vector.broadcast %8 : vector<1x64xf32> to vector<8x64xf32>
    %12 = arith.addf %3, %11 : vector<8x64xf32>
    %13 = vector.broadcast %10 : vector<1x64xf32> to vector<8x64xf32>
    %14 = arith.mulf %13, %12 : vector<8x64xf32>
    %15 = math.absf %10 : vector<1x64xf32>
    %16 = math.log %15 : vector<1x64xf32>
    %17 = vector.shape_cast %16 : vector<1x64xf32> to vector<1x1x64xf32>
    %cst = arith.constant dense<0.000000e+00> : vector<1xf32>
    %18 = vector.multi_reduction <add>, %17, %cst [1, 2] : vector<1x1x64xf32> to vector<1xf32>
    %19 = vector.shape_cast %18 : vector<1xf32> to vector<1x1x1xf32>
    %20 = vector.extract %19[0, 0, 0] : f32 from vector<1x1x1xf32>
    %21 = vector.broadcast %20 : f32 to vector<8x1xf32>
    %22 = arith.addf %4, %21 : vector<8x1xf32>
    %cst_12 = arith.constant 0.000000e+00 : f32
    %23 = vector.broadcast %cst_12 : f32 to vector<8x64xf32>
    %24 = arith.cmpf oge, %14, %23 : vector<8x64xf32>
    %cst_13 = arith.constant 0.899999976 : f32
    %25 = vector.broadcast %cst_13 : f32 to vector<8x64xf32>
    %26 = arith.mulf %25, %14 : vector<8x64xf32>
    %27 = arith.select %24, %14, %26 : vector<8x64xi1>, vector<8x64xf32>
    %28 = vector.extract_strided_slice %27 {offsets = [0, 0], sizes = [8, 32], strides = [1, 1]} : vector<8x64xf32> to vector<8x32xf32>
    %29 = vector.extract_strided_slice %27 {offsets = [0, 32], sizes = [8, 32], strides = [1, 1]} : vector<8x64xf32> to vector<8x32xf32>
    %30 = arith.truncf %28 : vector<8x32xf32> to vector<8x32xbf16>
    %c0_14 = arith.constant 0 : index
    %c0_15 = arith.constant 0 : index
    %c0_16 = arith.constant 0 : index
    %c0_17 = arith.constant 0 : index
    %31 = vector.load %arg5[%c0_14, %c0_15, %c0_16, %c0_17] : memref<1x2x128x256xbf16, #tpu.memory_space<vmem>>, vector<1x1x128x256xbf16>
    %32 = vector.shape_cast %31 : vector<1x1x128x256xbf16> to vector<128x256xbf16>
    %33 = vector.extract_strided_slice %32 {offsets = [0, 0], sizes = [32, 256], strides = [1, 1]} : vector<128x256xbf16> to vector<32x256xbf16>
    %cst_18 = arith.constant dense<0.000000e+00> : vector<8x256xf32>
    %34 = tpu.matmul %30, %33, %cst_18 {dimension_numbers = #tpu.dot_dimension_numbers<[1], [0], [0], [1], [0, 0, 1, 1], [], []>} : vector<8x32xbf16>, vector<32x256xbf16>, vector<8x256xf32> -> vector<8x256xf32>
    %35 = vector.extract_strided_slice %32 {offsets = [32, 0], sizes = [96, 256], strides = [1, 1]} : vector<128x256xbf16> to vector<96x256xbf16>
    %cst_19 = arith.constant dense<0.000000e+00> : vector<8x256xf32>
    %36 = tpu.matmul %6, %35, %cst_19 {dimension_numbers = #tpu.dot_dimension_numbers<[1], [0], [0], [1], [0, 0, 1, 1], [], []>} : vector<8x96xbf16>, vector<96x256xbf16>, vector<8x256xf32> -> vector<8x256xf32>
    %37 = arith.addf %34, %36 : vector<8x256xf32>
    %c0_20 = arith.constant 0 : index
    %c0_21 = arith.constant 0 : index
    %c0_22 = arith.constant 0 : index
    %38 = vector.load %arg6[%c0_20, %c0_21, %c0_22] : memref<1x2x256xf32, #tpu.memory_space<vmem>>, vector<1x1x256xf32>
    %39 = vector.shape_cast %38 : vector<1x1x256xf32> to vector<1x256xf32>
    %40 = vector.broadcast %39 : vector<1x256xf32> to vector<8x256xf32>
    %41 = arith.addf %37, %40 : vector<8x256xf32>
    %cst_23 = arith.constant 0.000000e+00 : f32
    %42 = vector.broadcast %cst_23 : f32 to vector<8x256xf32>
    %43 = arith.cmpf oge, %41, %42 : vector<8x256xf32>
    %cst_24 = arith.constant 0.00999999977 : f32
    %44 = vector.broadcast %cst_24 : f32 to vector<8x256xf32>
    %45 = arith.mulf %44, %41 : vector<8x256xf32>
    %46 = arith.select %43, %41, %45 : vector<8x256xi1>, vector<8x256xf32>
    %47 = vector.extract_strided_slice %46 {offsets = [0, 0], sizes = [8, 128], strides = [1, 1]} : vector<8x256xf32> to vector<8x128xf32>
    %48 = vector.extract_strided_slice %46 {offsets = [0, 128], sizes = [8, 128], strides = [1, 1]} : vector<8x256xf32> to vector<8x128xf32>
    %49 = arith.truncf %47 : vector<8x128xf32> to vector<8x128xbf16>
    %c0_25 = arith.constant 0 : index
    %c0_26 = arith.constant 0 : index
    %c0_27 = arith.constant 0 : index
    %c0_28 = arith.constant 0 : index
    %c0_29 = arith.constant 0 : index
    %50 = vector.load %arg7[%c0_25, %c0_26, %c0_27, %c0_28, %c0_29] : memref<1x4x2x128x128xbf16, #tpu.memory_space<vmem>>, vector<1x1x1x128x128xbf16>
    %51 = vector.shape_cast %50 : vector<1x1x1x128x128xbf16> to vector<128x128xbf16>
    %cst_30 = arith.constant dense<0.000000e+00> : vector<8x128xf32>
    %52 = tpu.matmul %49, %51, %cst_30 {dimension_numbers = #tpu.dot_dimension_numbers<[1], [0], [0], [1], [0, 0, 1, 1], [], []>} : vector<8x128xbf16>, vector<128x128xbf16>, vector<8x128xf32> -> vector<8x128xf32>
    %c0_31 = arith.constant 0 : index
    %c0_32 = arith.constant 0 : index
    %c0_33 = arith.constant 0 : index
    %c0_34 = arith.constant 0 : index
    %53 = vector.load %arg8[%c0_31, %c0_32, %c0_33, %c0_34] : memref<1x4x2x128xf32, #tpu.memory_space<vmem>>, vector<1x1x1x128xf32>
    %54 = vector.shape_cast %53 : vector<1x1x1x128xf32> to vector<1x128xf32>
    %55 = vector.broadcast %54 : vector<1x128xf32> to vector<8x128xf32>
    %56 = arith.addf %52, %55 : vector<8x128xf32>
    %cst_35 = arith.constant 0.000000e+00 : f32
    %57 = vector.broadcast %cst_35 : f32 to vector<8x128xf32>
    %58 = arith.cmpf oge, %56, %57 : vector<8x128xf32>
    %cst_36 = arith.constant 0.00999999977 : f32
    %59 = vector.broadcast %cst_36 : f32 to vector<8x128xf32>
    %60 = arith.mulf %59, %56 : vector<8x128xf32>
    %61 = arith.select %58, %56, %60 : vector<8x128xi1>, vector<8x128xf32>
    %62 = arith.truncf %48 : vector<8x128xf32> to vector<8x128xbf16>
    %c0_37 = arith.constant 0 : index
    %c1 = arith.constant 1 : index
    %c0_38 = arith.constant 0 : index
    %c0_39 = arith.constant 0 : index
    %c0_40 = arith.constant 0 : index
    %63 = vector.load %arg7[%c0_37, %c1, %c0_38, %c0_39, %c0_40] : memref<1x4x2x128x128xbf16, #tpu.memory_space<vmem>>, vector<1x1x1x128x128xbf16>
    %64 = vector.shape_cast %63 : vector<1x1x1x128x128xbf16> to vector<128x128xbf16>
    %cst_41 = arith.constant dense<0.000000e+00> : vector<8x128xf32>
    %65 = tpu.matmul %62, %64, %cst_41 {dimension_numbers = #tpu.dot_dimension_numbers<[1], [0], [0], [1], [0, 0, 1, 1], [], []>} : vector<8x128xbf16>, vector<128x128xbf16>, vector<8x128xf32> -> vector<8x128xf32>
    %c0_42 = arith.constant 0 : index
    %c1_43 = arith.constant 1 : index
    %c0_44 = arith.constant 0 : index
    %c0_45 = arith.constant 0 : index
    %66 = vector.load %arg8[%c0_42, %c1_43, %c0_44, %c0_45] : memref<1x4x2x128xf32, #tpu.memory_space<vmem>>, vector<1x1x1x128xf32>
    %67 = vector.shape_cast %66 : vector<1x1x1x128xf32> to vector<1x128xf32>
    %68 = vector.broadcast %67 : vector<1x128xf32> to vector<8x128xf32>
    %69 = arith.addf %65, %68 : vector<8x128xf32>
    %cst_46 = arith.constant 0.000000e+00 : f32
    %70 = vector.broadcast %cst_46 : f32 to vector<8x128xf32>
    %71 = arith.cmpf oge, %69, %70 : vector<8x128xf32>
    %cst_47 = arith.constant 0.00999999977 : f32
    %72 = vector.broadcast %cst_47 : f32 to vector<8x128xf32>
    %73 = arith.mulf %72, %69 : vector<8x128xf32>
    %74 = arith.select %71, %69, %73 : vector<8x128xi1>, vector<8x128xf32>
    %75 = arith.truncf %61 : vector<8x128xf32> to vector<8x128xbf16>
    %c0_48 = arith.constant 0 : index
    %c0_49 = arith.constant 0 : index
    %c1_50 = arith.constant 1 : index
    %c0_51 = arith.constant 0 : index
    %c0_52 = arith.constant 0 : index
    %76 = vector.load %arg7[%c0_48, %c0_49, %c1_50, %c0_51, %c0_52] : memref<1x4x2x128x128xbf16, #tpu.memory_space<vmem>>, vector<1x1x1x128x128xbf16>
    %77 = vector.shape_cast %76 : vector<1x1x1x128x128xbf16> to vector<128x128xbf16>
    %cst_53 = arith.constant dense<0.000000e+00> : vector<8x128xf32>
    %78 = tpu.matmul %75, %77, %cst_53 {dimension_numbers = #tpu.dot_dimension_numbers<[1], [0], [0], [1], [0, 0, 1, 1], [], []>} : vector<8x128xbf16>, vector<128x128xbf16>, vector<8x128xf32> -> vector<8x128xf32>
    %c0_54 = arith.constant 0 : index
    %c0_55 = arith.constant 0 : index
    %c1_56 = arith.constant 1 : index
    %c0_57 = arith.constant 0 : index
    %79 = vector.load %arg8[%c0_54, %c0_55, %c1_56, %c0_57] : memref<1x4x2x128xf32, #tpu.memory_space<vmem>>, vector<1x1x1x128xf32>
    %80 = vector.shape_cast %79 : vector<1x1x1x128xf32> to vector<1x128xf32>
    %81 = vector.broadcast %80 : vector<1x128xf32> to vector<8x128xf32>
    %82 = arith.addf %78, %81 : vector<8x128xf32>
    %cst_58 = arith.constant 0.000000e+00 : f32
    %83 = vector.broadcast %cst_58 : f32 to vector<8x128xf32>
    %84 = arith.cmpf oge, %82, %83 : vector<8x128xf32>
    %cst_59 = arith.constant 0.00999999977 : f32
    %85 = vector.broadcast %cst_59 : f32 to vector<8x128xf32>
    %86 = arith.mulf %85, %82 : vector<8x128xf32>
    %87 = arith.select %84, %82, %86 : vector<8x128xi1>, vector<8x128xf32>
    %88 = arith.truncf %74 : vector<8x128xf32> to vector<8x128xbf16>
    %c0_60 = arith.constant 0 : index
    %c1_61 = arith.constant 1 : index
    %c1_62 = arith.constant 1 : index
    %c0_63 = arith.constant 0 : index
    %c0_64 = arith.constant 0 : index
    %89 = vector.load %arg7[%c0_60, %c1_61, %c1_62, %c0_63, %c0_64] : memref<1x4x2x128x128xbf16, #tpu.memory_space<vmem>>, vector<1x1x1x128x128xbf16>
    %90 = vector.shape_cast %89 : vector<1x1x1x128x128xbf16> to vector<128x128xbf16>
    %cst_65 = arith.constant dense<0.000000e+00> : vector<8x128xf32>
    %91 = tpu.matmul %88, %90, %cst_65 {dimension_numbers = #tpu.dot_dimension_numbers<[1], [0], [0], [1], [0, 0, 1, 1], [], []>} : vector<8x128xbf16>, vector<128x128xbf16>, vector<8x128xf32> -> vector<8x128xf32>
    %c0_66 = arith.constant 0 : index
    %c1_67 = arith.constant 1 : index
    %c1_68 = arith.constant 1 : index
    %c0_69 = arith.constant 0 : index
    %92 = vector.load %arg8[%c0_66, %c1_67, %c1_68, %c0_69] : memref<1x4x2x128xf32, #tpu.memory_space<vmem>>, vector<1x1x1x128xf32>
    %93 = vector.shape_cast %92 : vector<1x1x1x128xf32> to vector<1x128xf32>
    %94 = vector.broadcast %93 : vector<1x128xf32> to vector<8x128xf32>
    %95 = arith.addf %91, %94 : vector<8x128xf32>
    %cst_70 = arith.constant 0.000000e+00 : f32
    %96 = vector.broadcast %cst_70 : f32 to vector<8x128xf32>
    %97 = arith.cmpf oge, %95, %96 : vector<8x128xf32>
    %cst_71 = arith.constant 0.00999999977 : f32
    %98 = vector.broadcast %cst_71 : f32 to vector<8x128xf32>
    %99 = arith.mulf %98, %95 : vector<8x128xf32>
    %100 = arith.select %97, %95, %99 : vector<8x128xi1>, vector<8x128xf32>
    %101 = arith.truncf %87 : vector<8x128xf32> to vector<8x128xbf16>
    %c0_72 = arith.constant 0 : index
    %c0_73 = arith.constant 0 : index
    %c0_74 = arith.constant 0 : index
    %c0_75 = arith.constant 0 : index
    %102 = vector.load %arg9[%c0_72, %c0_73, %c0_74, %c0_75] : memref<1x4x128x32xbf16, #tpu.memory_space<vmem>>, vector<1x1x128x32xbf16>
    %103 = vector.shape_cast %102 : vector<1x1x128x32xbf16> to vector<128x32xbf16>
    %cst_76 = arith.constant dense<0.000000e+00> : vector<8x32xf32>
    %104 = tpu.matmul %101, %103, %cst_76 {dimension_numbers = #tpu.dot_dimension_numbers<[1], [0], [0], [1], [0, 0, 1, 1], [], []>} : vector<8x128xbf16>, vector<128x32xbf16>, vector<8x32xf32> -> vector<8x32xf32>
    %c0_77 = arith.constant 0 : index
    %c0_78 = arith.constant 0 : index
    %c0_79 = arith.constant 0 : index
    %105 = vector.load %arg10[%c0_77, %c0_78, %c0_79] : memref<1x4x32xf32, #tpu.memory_space<vmem>>, vector<1x1x32xf32>
    %106 = vector.shape_cast %105 : vector<1x1x32xf32> to vector<1x32xf32>
    %107 = vector.broadcast %106 : vector<1x32xf32> to vector<8x32xf32>
    %108 = arith.addf %104, %107 : vector<8x32xf32>
    %109 = math.tanh %108 : vector<8x32xf32>
    %110 = arith.truncf %100 : vector<8x128xf32> to vector<8x128xbf16>
    %c0_80 = arith.constant 0 : index
    %c1_81 = arith.constant 1 : index
    %c0_82 = arith.constant 0 : index
    %c0_83 = arith.constant 0 : index
    %111 = vector.load %arg9[%c0_80, %c1_81, %c0_82, %c0_83] : memref<1x4x128x32xbf16, #tpu.memory_space<vmem>>, vector<1x1x128x32xbf16>
    %112 = vector.shape_cast %111 : vector<1x1x128x32xbf16> to vector<128x32xbf16>
    %cst_84 = arith.constant dense<0.000000e+00> : vector<8x32xf32>
    %113 = tpu.matmul %110, %112, %cst_84 {dimension_numbers = #tpu.dot_dimension_numbers<[1], [0], [0], [1], [0, 0, 1, 1], [], []>} : vector<8x128xbf16>, vector<128x32xbf16>, vector<8x32xf32> -> vector<8x32xf32>
    %c0_85 = arith.constant 0 : index
    %c1_86 = arith.constant 1 : index
    %c0_87 = arith.constant 0 : index
    %114 = vector.load %arg10[%c0_85, %c1_86, %c0_87] : memref<1x4x32xf32, #tpu.memory_space<vmem>>, vector<1x1x32xf32>
    %115 = vector.shape_cast %114 : vector<1x1x32xf32> to vector<1x32xf32>
    %116 = vector.broadcast %115 : vector<1x32xf32> to vector<8x32xf32>
    %117 = arith.addf %113, %116 : vector<8x32xf32>
    %118 = math.exp %109 : vector<8x32xf32>
    %119 = arith.mulf %29, %118 : vector<8x32xf32>
    %120 = arith.addf %119, %117 : vector<8x32xf32>
    %cst_88 = arith.constant dense<0.000000e+00> : vector<8xf32>
    %121 = vector.multi_reduction <add>, %109, %cst_88 [1] : vector<8x32xf32> to vector<8xf32>
    %122 = vector.shape_cast %121 : vector<8xf32> to vector<8x1xf32>
    %123 = arith.addf %22, %122 : vector<8x1xf32>
    %124 = arith.truncf %120 : vector<8x32xf32> to vector<8x32xbf16>
    %c0_89 = arith.constant 0 : index
    %c1_90 = arith.constant 1 : index
    %c0_91 = arith.constant 0 : index
    %c0_92 = arith.constant 0 : index
    %125 = vector.load %arg5[%c0_89, %c1_90, %c0_91, %c0_92] : memref<1x2x128x256xbf16, #tpu.memory_space<vmem>>, vector<1x1x128x256xbf16>
    %126 = vector.shape_cast %125 : vector<1x1x128x256xbf16> to vector<128x256xbf16>
    %127 = vector.extract_strided_slice %126 {offsets = [0, 0], sizes = [32, 256], strides = [1, 1]} : vector<128x256xbf16> to vector<32x256xbf16>
    %cst_93 = arith.constant dense<0.000000e+00> : vector<8x256xf32>
    %128 = tpu.matmul %124, %127, %cst_93 {dimension_numbers = #tpu.dot_dimension_numbers<[1], [0], [0], [1], [0, 0, 1, 1], [], []>} : vector<8x32xbf16>, vector<32x256xbf16>, vector<8x256xf32> -> vector<8x256xf32>
    %129 = vector.extract_strided_slice %126 {offsets = [32, 0], sizes = [96, 256], strides = [1, 1]} : vector<128x256xbf16> to vector<96x256xbf16>
    %cst_94 = arith.constant dense<0.000000e+00> : vector<8x256xf32>
    %130 = tpu.matmul %6, %129, %cst_94 {dimension_numbers = #tpu.dot_dimension_numbers<[1], [0], [0], [1], [0, 0, 1, 1], [], []>} : vector<8x96xbf16>, vector<96x256xbf16>, vector<8x256xf32> -> vector<8x256xf32>
    %131 = arith.addf %128, %130 : vector<8x256xf32>
    %c0_95 = arith.constant 0 : index
    %c1_96 = arith.constant 1 : index
    %c0_97 = arith.constant 0 : index
    %132 = vector.load %arg6[%c0_95, %c1_96, %c0_97] : memref<1x2x256xf32, #tpu.memory_space<vmem>>, vector<1x1x256xf32>
    %133 = vector.shape_cast %132 : vector<1x1x256xf32> to vector<1x256xf32>
    %134 = vector.broadcast %133 : vector<1x256xf32> to vector<8x256xf32>
    %135 = arith.addf %131, %134 : vector<8x256xf32>
    %cst_98 = arith.constant 0.000000e+00 : f32
    %136 = vector.broadcast %cst_98 : f32 to vector<8x256xf32>
    %137 = arith.cmpf oge, %135, %136 : vector<8x256xf32>
    %cst_99 = arith.constant 0.00999999977 : f32
    %138 = vector.broadcast %cst_99 : f32 to vector<8x256xf32>
    %139 = arith.mulf %138, %135 : vector<8x256xf32>
    %140 = arith.select %137, %135, %139 : vector<8x256xi1>, vector<8x256xf32>
    %141 = vector.extract_strided_slice %140 {offsets = [0, 0], sizes = [8, 128], strides = [1, 1]} : vector<8x256xf32> to vector<8x128xf32>
    %142 = vector.extract_strided_slice %140 {offsets = [0, 128], sizes = [8, 128], strides = [1, 1]} : vector<8x256xf32> to vector<8x128xf32>
    %143 = arith.truncf %141 : vector<8x128xf32> to vector<8x128xbf16>
    %c0_100 = arith.constant 0 : index
    %c2 = arith.constant 2 : index
    %c0_101 = arith.constant 0 : index
    %c0_102 = arith.constant 0 : index
    %c0_103 = arith.constant 0 : index
    %144 = vector.load %arg7[%c0_100, %c2, %c0_101, %c0_102, %c0_103] : memref<1x4x2x128x128xbf16, #tpu.memory_space<vmem>>, vector<1x1x1x128x128xbf16>
    %145 = vector.shape_cast %144 : vector<1x1x1x128x128xbf16> to vector<128x128xbf16>
    %cst_104 = arith.constant dense<0.000000e+00> : vector<8x128xf32>
    %146 = tpu.matmul %143, %145, %cst_104 {dimension_numbers = #tpu.dot_dimension_numbers<[1], [0], [0], [1], [0, 0, 1, 1], [], []>} : vector<8x128xbf16>, vector<128x128xbf16>, vector<8x128xf32> -> vector<8x128xf32>
    %c0_105 = arith.constant 0 : index
    %c2_106 = arith.constant 2 : index
    %c0_107 = arith.constant 0 : index
    %c0_108 = arith.constant 0 : index
    %147 = vector.load %arg8[%c0_105, %c2_106, %c0_107, %c0_108] : memref<1x4x2x128xf32, #tpu.memory_space<vmem>>, vector<1x1x1x128xf32>
    %148 = vector.shape_cast %147 : vector<1x1x1x128xf32> to vector<1x128xf32>
    %149 = vector.broadcast %148 : vector<1x128xf32> to vector<8x128xf32>
    %150 = arith.addf %146, %149 : vector<8x128xf32>
    %cst_109 = arith.constant 0.000000e+00 : f32
    %151 = vector.broadcast %cst_109 : f32 to vector<8x128xf32>
    %152 = arith.cmpf oge, %150, %151 : vector<8x128xf32>
    %cst_110 = arith.constant 0.00999999977 : f32
    %153 = vector.broadcast %cst_110 : f32 to vector<8x128xf32>
    %154 = arith.mulf %153, %150 : vector<8x128xf32>
    %155 = arith.select %152, %150, %154 : vector<8x128xi1>, vector<8x128xf32>
    %156 = arith.truncf %142 : vector<8x128xf32> to vector<8x128xbf16>
    %c0_111 = arith.constant 0 : index
    %c3 = arith.constant 3 : index
    %c0_112 = arith.constant 0 : index
    %c0_113 = arith.constant 0 : index
    %c0_114 = arith.constant 0 : index
    %157 = vector.load %arg7[%c0_111, %c3, %c0_112, %c0_113, %c0_114] : memref<1x4x2x128x128xbf16, #tpu.memory_space<vmem>>, vector<1x1x1x128x128xbf16>
    %158 = vector.shape_cast %157 : vector<1x1x1x128x128xbf16> to vector<128x128xbf16>
    %cst_115 = arith.constant dense<0.000000e+00> : vector<8x128xf32>
    %159 = tpu.matmul %156, %158, %cst_115 {dimension_numbers = #tpu.dot_dimension_numbers<[1], [0], [0], [1], [0, 0, 1, 1], [], []>} : vector<8x128xbf16>, vector<128x128xbf16>, vector<8x128xf32> -> vector<8x128xf32>
    %c0_116 = arith.constant 0 : index
    %c3_117 = arith.constant 3 : index
    %c0_118 = arith.constant 0 : index
    %c0_119 = arith.constant 0 : index
    %160 = vector.load %arg8[%c0_116, %c3_117, %c0_118, %c0_119] : memref<1x4x2x128xf32, #tpu.memory_space<vmem>>, vector<1x1x1x128xf32>
    %161 = vector.shape_cast %160 : vector<1x1x1x128xf32> to vector<1x128xf32>
    %162 = vector.broadcast %161 : vector<1x128xf32> to vector<8x128xf32>
    %163 = arith.addf %159, %162 : vector<8x128xf32>
    %cst_120 = arith.constant 0.000000e+00 : f32
    %164 = vector.broadcast %cst_120 : f32 to vector<8x128xf32>
    %165 = arith.cmpf oge, %163, %164 : vector<8x128xf32>
    %cst_121 = arith.constant 0.00999999977 : f32
    %166 = vector.broadcast %cst_121 : f32 to vector<8x128xf32>
    %167 = arith.mulf %166, %163 : vector<8x128xf32>
    %168 = arith.select %165, %163, %167 : vector<8x128xi1>, vector<8x128xf32>
    %169 = arith.truncf %155 : vector<8x128xf32> to vector<8x128xbf16>
    %c0_122 = arith.constant 0 : index
    %c2_123 = arith.constant 2 : index
    %c1_124 = arith.constant 1 : index
    %c0_125 = arith.constant 0 : index
    %c0_126 = arith.constant 0 : index
    %170 = vector.load %arg7[%c0_122, %c2_123, %c1_124, %c0_125, %c0_126] : memref<1x4x2x128x128xbf16, #tpu.memory_space<vmem>>, vector<1x1x1x128x128xbf16>
    %171 = vector.shape_cast %170 : vector<1x1x1x128x128xbf16> to vector<128x128xbf16>
    %cst_127 = arith.constant dense<0.000000e+00> : vector<8x128xf32>
    %172 = tpu.matmul %169, %171, %cst_127 {dimension_numbers = #tpu.dot_dimension_numbers<[1], [0], [0], [1], [0, 0, 1, 1], [], []>} : vector<8x128xbf16>, vector<128x128xbf16>, vector<8x128xf32> -> vector<8x128xf32>
    %c0_128 = arith.constant 0 : index
    %c2_129 = arith.constant 2 : index
    %c1_130 = arith.constant 1 : index
    %c0_131 = arith.constant 0 : index
    %173 = vector.load %arg8[%c0_128, %c2_129, %c1_130, %c0_131] : memref<1x4x2x128xf32, #tpu.memory_space<vmem>>, vector<1x1x1x128xf32>
    %174 = vector.shape_cast %173 : vector<1x1x1x128xf32> to vector<1x128xf32>
    %175 = vector.broadcast %174 : vector<1x128xf32> to vector<8x128xf32>
    %176 = arith.addf %172, %175 : vector<8x128xf32>
    %cst_132 = arith.constant 0.000000e+00 : f32
    %177 = vector.broadcast %cst_132 : f32 to vector<8x128xf32>
    %178 = arith.cmpf oge, %176, %177 : vector<8x128xf32>
    %cst_133 = arith.constant 0.00999999977 : f32
    %179 = vector.broadcast %cst_133 : f32 to vector<8x128xf32>
    %180 = arith.mulf %179, %176 : vector<8x128xf32>
    %181 = arith.select %178, %176, %180 : vector<8x128xi1>, vector<8x128xf32>
    %182 = arith.truncf %168 : vector<8x128xf32> to vector<8x128xbf16>
    %c0_134 = arith.constant 0 : index
    %c3_135 = arith.constant 3 : index
    %c1_136 = arith.constant 1 : index
    %c0_137 = arith.constant 0 : index
    %c0_138 = arith.constant 0 : index
    %183 = vector.load %arg7[%c0_134, %c3_135, %c1_136, %c0_137, %c0_138] : memref<1x4x2x128x128xbf16, #tpu.memory_space<vmem>>, vector<1x1x1x128x128xbf16>
    %184 = vector.shape_cast %183 : vector<1x1x1x128x128xbf16> to vector<128x128xbf16>
    %cst_139 = arith.constant dense<0.000000e+00> : vector<8x128xf32>
    %185 = tpu.matmul %182, %184, %cst_139 {dimension_numbers = #tpu.dot_dimension_numbers<[1], [0], [0], [1], [0, 0, 1, 1], [], []>} : vector<8x128xbf16>, vector<128x128xbf16>, vector<8x128xf32> -> vector<8x128xf32>
    %c0_140 = arith.constant 0 : index
    %c3_141 = arith.constant 3 : index
    %c1_142 = arith.constant 1 : index
    %c0_143 = arith.constant 0 : index
    %186 = vector.load %arg8[%c0_140, %c3_141, %c1_142, %c0_143] : memref<1x4x2x128xf32, #tpu.memory_space<vmem>>, vector<1x1x1x128xf32>
    %187 = vector.shape_cast %186 : vector<1x1x1x128xf32> to vector<1x128xf32>
    %188 = vector.broadcast %187 : vector<1x128xf32> to vector<8x128xf32>
    %189 = arith.addf %185, %188 : vector<8x128xf32>
    %cst_144 = arith.constant 0.000000e+00 : f32
    %190 = vector.broadcast %cst_144 : f32 to vector<8x128xf32>
    %191 = arith.cmpf oge, %189, %190 : vector<8x128xf32>
    %cst_145 = arith.constant 0.00999999977 : f32
    %192 = vector.broadcast %cst_145 : f32 to vector<8x128xf32>
    %193 = arith.mulf %192, %189 : vector<8x128xf32>
    %194 = arith.select %191, %189, %193 : vector<8x128xi1>, vector<8x128xf32>
    %195 = arith.truncf %181 : vector<8x128xf32> to vector<8x128xbf16>
    %c0_146 = arith.constant 0 : index
    %c2_147 = arith.constant 2 : index
    %c0_148 = arith.constant 0 : index
    %c0_149 = arith.constant 0 : index
    %196 = vector.load %arg9[%c0_146, %c2_147, %c0_148, %c0_149] : memref<1x4x128x32xbf16, #tpu.memory_space<vmem>>, vector<1x1x128x32xbf16>
    %197 = vector.shape_cast %196 : vector<1x1x128x32xbf16> to vector<128x32xbf16>
    %cst_150 = arith.constant dense<0.000000e+00> : vector<8x32xf32>
    %198 = tpu.matmul %195, %197, %cst_150 {dimension_numbers = #tpu.dot_dimension_numbers<[1], [0], [0], [1], [0, 0, 1, 1], [], []>} : vector<8x128xbf16>, vector<128x32xbf16>, vector<8x32xf32> -> vector<8x32xf32>
    %c0_151 = arith.constant 0 : index
    %c2_152 = arith.constant 2 : index
    %c0_153 = arith.constant 0 : index
    %199 = vector.load %arg10[%c0_151, %c2_152, %c0_153] : memref<1x4x32xf32, #tpu.memory_space<vmem>>, vector<1x1x32xf32>
    %200 = vector.shape_cast %199 : vector<1x1x32xf32> to vector<1x32xf32>
    %201 = vector.broadcast %200 : vector<1x32xf32> to vector<8x32xf32>
    %202 = arith.addf %198, %201 : vector<8x32xf32>
    %203 = math.tanh %202 : vector<8x32xf32>
    %204 = arith.truncf %194 : vector<8x128xf32> to vector<8x128xbf16>
    %c0_154 = arith.constant 0 : index
    %c3_155 = arith.constant 3 : index
    %c0_156 = arith.constant 0 : index
    %c0_157 = arith.constant 0 : index
    %205 = vector.load %arg9[%c0_154, %c3_155, %c0_156, %c0_157] : memref<1x4x128x32xbf16, #tpu.memory_space<vmem>>, vector<1x1x128x32xbf16>
    %206 = vector.shape_cast %205 : vector<1x1x128x32xbf16> to vector<128x32xbf16>
    %cst_158 = arith.constant dense<0.000000e+00> : vector<8x32xf32>
    %207 = tpu.matmul %204, %206, %cst_158 {dimension_numbers = #tpu.dot_dimension_numbers<[1], [0], [0], [1], [0, 0, 1, 1], [], []>} : vector<8x128xbf16>, vector<128x32xbf16>, vector<8x32xf32> -> vector<8x32xf32>
    %c0_159 = arith.constant 0 : index
    %c3_160 = arith.constant 3 : index
    %c0_161 = arith.constant 0 : index
    %208 = vector.load %arg10[%c0_159, %c3_160, %c0_161] : memref<1x4x32xf32, #tpu.memory_space<vmem>>, vector<1x1x32xf32>
    %209 = vector.shape_cast %208 : vector<1x1x32xf32> to vector<1x32xf32>
    %210 = vector.broadcast %209 : vector<1x32xf32> to vector<8x32xf32>
    %211 = arith.addf %207, %210 : vector<8x32xf32>
    %212 = math.exp %203 : vector<8x32xf32>
    %213 = arith.mulf %28, %212 : vector<8x32xf32>
    %214 = arith.addf %213, %211 : vector<8x32xf32>
    %cst_162 = arith.constant dense<0.000000e+00> : vector<8xf32>
    %215 = vector.multi_reduction <add>, %203, %cst_162 [1] : vector<8x32xf32> to vector<8xf32>
    %216 = vector.shape_cast %215 : vector<8xf32> to vector<8x1xf32>
    %217 = arith.addf %123, %216 : vector<8x1xf32>
    %c0_163 = arith.constant 0 : index
    %c0_164 = arith.constant 0 : index
    %c0_165 = arith.constant 0 : index
    %218 = vector.load %arg11[%c0_163, %c0_164, %c0_165] : memref<1x64x64xbf16, #tpu.memory_space<vmem>>, vector<1x64x64xbf16>
    %219 = vector.shape_cast %218 : vector<1x64x64xbf16> to vector<64x64xbf16>
    %220 = arith.extf %219 : vector<64x64xbf16> to vector<64x64xf32>
    %221 = vector.extract_strided_slice %220 {offsets = [0, 0], sizes = [32, 64], strides = [1, 1]} : vector<64x64xf32> to vector<32x64xf32>
    %cst_166 = arith.constant dense<0.000000e+00> : vector<8x64xf32>
    %222 = tpu.matmul %120, %221, %cst_166 {dimension_numbers = #tpu.dot_dimension_numbers<[1], [0], [0], [1], [0, 0, 1, 1], [], []>} : vector<8x32xf32>, vector<32x64xf32>, vector<8x64xf32> -> vector<8x64xf32>
    %223 = vector.extract_strided_slice %220 {offsets = [32, 0], sizes = [32, 64], strides = [1, 1]} : vector<64x64xf32> to vector<32x64xf32>
    %cst_167 = arith.constant dense<0.000000e+00> : vector<8x64xf32>
    %224 = tpu.matmul %214, %223, %cst_167 {dimension_numbers = #tpu.dot_dimension_numbers<[1], [0], [0], [1], [0, 0, 1, 1], [], []>} : vector<8x32xf32>, vector<32x64xf32>, vector<8x64xf32> -> vector<8x64xf32>
    %225 = arith.addf %222, %224 : vector<8x64xf32>
    %c0_168 = arith.constant 0 : index
    %c0_169 = arith.constant 0 : index
    %226 = vector.load %arg12[%c0_168, %c0_169] : memref<8x64xf32, #tpu.memory_space<vmem>>, vector<8x64xf32>
    tpu.vector_store %arg12[%c0_168, %c0_169], %225 {strides = array<i32>} : memref<8x64xf32, #tpu.memory_space<vmem>>, vector<8x64xf32>,
    %c0_170 = arith.constant 0 : index
    %c0_171 = arith.constant 0 : index
    %227 = vector.load %arg13[%c0_170, %c0_171] : memref<8x1xf32, #tpu.memory_space<vmem>>, vector<8x1xf32>
    tpu.vector_store %arg13[%c0_170, %c0_171], %217 {strides = array<i32>} : memref<8x1xf32, #tpu.memory_space<vmem>>, vector<8x1xf32>,
    return
  }
  func.func @transform_0(%arg0: i32) -> (i32, i32) {
    %c0_i32 = arith.constant 0 : i32
    %c0_i32_0 = arith.constant 0 : i32
    %c0_i32_1 = arith.constant 0 : i32
    return %c0_i32, %c0_i32_0 : i32, i32
  }
  func.func @transform_1(%arg0: i32) -> (i32, i32) {
    %c0_i32 = arith.constant 0 : i32
    %c0_i32_0 = arith.constant 0 : i32
    %c0_i32_1 = arith.constant 0 : i32
    return %c0_i32, %c0_i32_0 : i32, i32
  }
  func.func @transform_2(%arg0: i32) -> (i32, i32, i32) {
    %c0_i32 = arith.constant 0 : i32
    %c0_i32_0 = arith.constant 0 : i32
    %c0_i32_1 = arith.constant 0 : i32
    return %arg0, %c0_i32, %c0_i32_0 : i32, i32, i32
  }
  func.func @transform_3(%arg0: i32) -> (i32, i32, i32) {
    %c0_i32 = arith.constant 0 : i32
    %c0_i32_0 = arith.constant 0 : i32
    %c0_i32_1 = arith.constant 0 : i32
    return %arg0, %c0_i32, %c0_i32_0 : i32, i32, i32
  }
  func.func @transform_4(%arg0: i32) -> (i32, i32, i32, i32) {
    %c0_i32 = arith.constant 0 : i32
    %c0_i32_0 = arith.constant 0 : i32
    %c0_i32_1 = arith.constant 0 : i32
    %c0_i32_2 = arith.constant 0 : i32
    return %arg0, %c0_i32, %c0_i32_0, %c0_i32_1 : i32, i32, i32, i32
  }
  func.func @transform_5(%arg0: i32) -> (i32, i32, i32) {
    %c0_i32 = arith.constant 0 : i32
    %c0_i32_0 = arith.constant 0 : i32
    %c0_i32_1 = arith.constant 0 : i32
    return %arg0, %c0_i32, %c0_i32_0 : i32, i32, i32
  }
  func.func @transform_6(%arg0: i32) -> (i32, i32, i32, i32, i32) {
    %c0_i32 = arith.constant 0 : i32
    %c0_i32_0 = arith.constant 0 : i32
    %c0_i32_1 = arith.constant 0 : i32
    %c0_i32_2 = arith.constant 0 : i32
    %c0_i32_3 = arith.constant 0 : i32
    return %arg0, %c0_i32, %c0_i32_0, %c0_i32_1, %c0_i32_2 : i32, i32, i32, i32, i32
  }
  func.func @transform_7(%arg0: i32) -> (i32, i32, i32, i32) {
    %c0_i32 = arith.constant 0 : i32
    %c0_i32_0 = arith.constant 0 : i32
    %c0_i32_1 = arith.constant 0 : i32
    %c0_i32_2 = arith.constant 0 : i32
    return %arg0, %c0_i32, %c0_i32_0, %c0_i32_1 : i32, i32, i32, i32
  }
  func.func @transform_8(%arg0: i32) -> (i32, i32, i32, i32) {
    %c0_i32 = arith.constant 0 : i32
    %c0_i32_0 = arith.constant 0 : i32
    %c0_i32_1 = arith.constant 0 : i32
    %c0_i32_2 = arith.constant 0 : i32
    return %arg0, %c0_i32, %c0_i32_0, %c0_i32_1 : i32, i32, i32, i32
  }
  func.func @transform_9(%arg0: i32) -> (i32, i32, i32) {
    %c0_i32 = arith.constant 0 : i32
    %c0_i32_0 = arith.constant 0 : i32
    %c0_i32_1 = arith.constant 0 : i32
    return %arg0, %c0_i32, %c0_i32_0 : i32, i32, i32
  }
  func.func @transform_10(%arg0: i32) -> (i32, i32, i32) {
    %c0_i32 = arith.constant 0 : i32
    %c0_i32_0 = arith.constant 0 : i32
    %c0_i32_1 = arith.constant 0 : i32
    return %arg0, %c0_i32, %c0_i32_0 : i32, i32, i32
  }
  func.func @transform_11(%arg0: i32) -> (i32, i32) {
    %c0_i32 = arith.constant 0 : i32
    %c0_i32_0 = arith.constant 0 : i32
    %c0_i32_1 = arith.constant 0 : i32
    return %c0_i32, %c0_i32_0 : i32, i32
  }
  func.func @transform_12(%arg0: i32) -> (i32, i32) {
    %c0_i32 = arith.constant 0 : i32
    %c0_i32_0 = arith.constant 0 : i32
    %c0_i32_1 = arith.constant 0 : i32
    return %c0_i32, %c0_i32_0 : i32, i32
  }
}

</mosaic_0001>

<bundles_post_ra>
// kernel: supervised_transformer_forward.3
= control target key start
LH: loop header
LB: loop body
LE: loop exit
PB: predicated region body
PF: predicated region fallthrough
CT: control target
= control target key end

     0   :  { %s3492_s0 = inlined_call_operand.vmem [shape: f32[8,64], index: 0, kind: input, shape index: {}]   ;;  %s3493_s1 = inlined_call_operand.vmem [shape: f32[8,96], index: 1, kind: input, shape index: {}]   ;;  %s3494_s2 = inlined_call_operand.vmem [shape: f32[4,1,64], index: 2, kind: input, shape index: {}]   ;;  %s3495_s3 = inlined_call_operand.vmem [shape: f32[4,1,64], index: 3, kind: input, shape index: {}]   ;;  %s3496_s4 = inlined_call_operand.vmem [shape: bf16[4,2,128,256], index: 4, kind: input, shape index: {}]   ;;  %s3497_s5 = inlined_call_operand.vmem [shape: f32[4,2,256], index: 5, kind: input, shape index: {}]   ;;  %s3498_s6 = inlined_call_operand.vmem [shape: bf16[4,4,2,128,128], index: 6, kind: input, shape index: {}]   ;;  %s3499_s7 = inlined_call_operand.vmem [shape: f32[4,4,2,128], index: 7, kind: input, shape index: {}]   ;;  %s3500_s8 = inlined_call_operand.vmem [shape: bf16[4,4,128,32], index: 8, kind: input, shape index: {}]   ;;  %s3501_s9 = inlined_call_operand.vmem [shape: f32[4,4,32], index: 9, kind: input, shape index: {}]   ;;  %s3502_s10 = inlined_call_operand.vmem [shape: bf16[4,64,64], index: 10, kind: input, shape index: {}]   ;;  %s3503_s11 = inlined_call_operand.hbm [shape: f32[8,64], index: 11, kind: output, shape index: {0}]   ;;  %s3504_s12 = inlined_call_operand.vmem [shape: f32[8,1], index: 12, kind: output, shape index: {1}]  }
   0x1   :  { %3507 = sst [smem:[#allocation7_spill]] %s3495_s3 }
   0x2   :  { %3508 = sst [smem:[#allocation8_spill]] %s3496_s4 }
   0x3   :  { %3509 = sst [smem:[#allocation9_spill]] %s3497_s5 }
   0x4   :  { %3510 = sst [smem:[#allocation10_spill]] %s3503_s11 }
   0x5   :  { %18 = vsyncpa [#allocation3], 0  ;;  %s3196_s21 = smov 0  }
   0x6 LB: > { %3511 = sst [smem:[#allocation5_spill]] %s3125_s21  ;;  %s3202_s22 = sadd.s32 4294967295, %s3125_s21   ;;  %s3125_s21 = sphi %s3196_s21, %s24_s21  }
   0x7   : > { %p2166_p0 = scmp.ge.s32.totalorder %s3125_s21, 1  ;;  %p431_p1 = scmp.lt.s32.totalorder %s3125_s21, 5 }
   0x9   : > { %p432_p2 = pnand %p2166_p0, %p431_p1 }
   0xb   : > { %435 = sbr.rel (%p432_p2) target bundleno = 1559 (0x617), region = 64 }
  0x10   : > { %p503_p3 = scmp.lt.s32.totalorder %s3202_s22, 3  ;;  %s3512_s3 = sld [smem:[#allocation7_spill]] }
  0x11   : > { %s3513_s4 = sld [smem:[#allocation8_spill]]  ;;  %p2180_p4 = scmp.ne.s32.totalorder %s3202_s22, 0 }
  0x12   : > { %s3208_s23 = scalar_select %p503_p3, %s3202_s22, 3 }
  0x13   : > { %s3514_s5 = sld [smem:[#allocation9_spill]] }
  0x14   : > { %s2890_s30 = sshll.u32 %s3208_s23, 8  ;;  %s2891_s13 = sshll.u32 %s3208_s23, 2 }
  0x15   : > { %s2892_s20 = sshll.u32 %s3208_s23, 9  ;;  %s2893_s24 = sshll.u32 %s3208_s23, 3 }
  0x16   : > { %s3218_s29 = scalar_lea.vmem %s3512_s3, %s3208_s23  ;;  %s3237_s27 = scalar_lea.vmem %s3498_s6, %s2892_s20 }
  0x17   : > { %s3225_s16 = scalar_lea.vmem %s3513_s4, %s2890_s30  ;;  %s3242_s21 = scalar_lea.vmem %s3499_s7, %s2893_s24 }
  0x18   : > { %s3247_s4 = scalar_lea.vmem %s3500_s8, %s2890_s30  ;;  %s2895_s11 = sshll.u32 %s3208_s23, 5 }
  0x19   : > { %s3230_s19 = scalar_lea.vmem %s3514_s5, %s2891_s13  ;;  %s3252_s5 = scalar_lea.vmem %s3501_s9, %s2891_s13 }
  0x1a   : > { %3515 = sst [smem:[#allocation6_spill]] %s3230_s19  ;;  %s3258_s20 = scalar_lea.vmem %s3502_s10, %s2895_s11 }
  0x1b   : > { %547 = sbr.rel (%p2180_p4) target bundleno = 35 (0x23), region = 68 }
  0x20   : > { %v548_v0 = vld [vmem:[%s3492_s0] sm:$0xff]  ;;  %vm549_vm0 = vcmask 523264   ;;  %vm551_vm1 = vcmask 7168   ;;  %v3127_v1 = vmov 0.0  }
  0x21   : > { %550 = vst.msk [vmem:[#allocation2] sm:$0xff] %vm549_vm0, %v548_v0 }
  0x22   : > { %552 = vst.msk [vmem:[%s3504_s12] sm:$0xff] %vm551_vm1, %v3127_v1 }
  0x23 PF: > { %v2223_v2 = vld [vmem:[%s3225_s16 + $0x70] sm:$0xf]  ;;  %v2911_v3 = vld [vmem:[%s3225_s16 + $0x74] sm:$0xf0]  ;;  %v2215_v7 = vld [vmem:[%s3225_s16 + $0x60] sm:$0xf]  ;;  %s3516_s25 = scalar_lea.vmem %s3494_s2, %s3208_s23 }
  0x24   : > { %v2241_v4 = vld [vmem:[%s3225_s16 + $0x10] sm:$0xf]  ;;  %v2224_v5 = vor.u32 %v2911_v3, %v2223_v2  ;;  %v2899_v6 = vld [vmem:[%s3225_s16 + $0x14] sm:$0xf0]  ;;  %v2909_v8 = vld [vmem:[%s3225_s16 + $0x64] sm:$0xf0] }
  0x25   : > { %v2242_v9 = vor.u32 %v2899_v6, %v2241_v4  ;;  %v2233_v10 = vld [vmem:[%s3225_s16] sm:$0xf]  ;;  %v2897_v11 = vld [vmem:[%s3225_s16 + $0x4] sm:$0xf0]  ;;  %v2216_v12 = vor.u32 %v2909_v8, %v2215_v7  ;;  %v2207_v13 = vld [vmem:[%s3225_s16 + $0x50] sm:$0xf] }
  0x26   : > { %669 = vmatpush.bf16.msra.mxu0 %v2224_v5  ;;  %v2234_v15 = vor.u32 %v2897_v11, %v2233_v10  ;;  %v2907_v16 = vld [vmem:[%s3225_s16 + $0x54] sm:$0xf0]  ;;  %v3063_v17 = vld [vmem:[%s3516_s25] ss:$0 sm:$0xff]  ;;  %v2910_v19 = vld [vmem:[%s3225_s16 + $0x74] sm:$0xf] }
  0x27   : > { %723 = vmatpush.bf16.msra.mxu2 %v2242_v9  ;;  %v3064_v18 = vld [vmem:[%s3218_s29] ss:$0 sm:$0xff]  ;;  %v2225_v20 = vld [vmem:[%s3225_s16 + $0x78] sm:$0xf0]  ;;  %v2908_v23 = vld [vmem:[%s3225_s16 + $0x64] sm:$0xf]  ;;  %v2208_v25 = vor.u32 %v2907_v16, %v2207_v13 }
  0x28   : > { %v553_v14 = vld [vmem:[#allocation2] sm:$0xff]  ;;  %v2228_v22 = vor.u32 %v2910_v19, %v2225_v20  ;;  %v2217_v24 = vld [vmem:[%s3225_s16 + $0x68] sm:$0xf0]  ;;  %v2905_v28 = vld [vmem:[%s3225_s16 + $0x44] sm:$0xf0]  ;;  %vm713_vm3 = vcmask 261120  }
  0x29   : > { %v562_v21 = vadd.f32 %v3063_v17, %v553_v14  ;;  %v2199_v27 = vld [vmem:[%s3225_s16 + $0x40] sm:$0xf]  ;;  %v2220_v29 = vor.u32 %v2908_v23, %v2217_v24  ;;  %v2906_v30 = vld [vmem:[%s3225_s16 + $0x54] sm:$0xf]  ;;  %v2209_v31 = vld [vmem:[%s3225_s16 + $0x58] sm:$0xf0] }
  0x2a   : > { %670 = vmatpush.bf16.msra.mxu0 %v2216_v12  ;;  %682 = vmatpush.bf16.msra.mxu1 %v2228_v22  ;;  %v2898_v32 = vld [vmem:[%s3225_s16 + $0x14] sm:$0xf]  ;;  %v2243_v33 = vld [vmem:[%s3225_s16 + $0x18] sm:$0xf0]  ;;  %v2200_v36 = vor.u32 %v2905_v28, %v2199_v27  ;;  %v2896_v37 = vld [vmem:[%s3225_s16 + $0x4] sm:$0xf]  ;;  %v2212_v43 = vor.u32 %v2906_v30, %v2209_v31 }
  0x2b   : > { %724 = vmatpush.bf16.msra.mxu2 %v2234_v15  ;;  %v566_v26 = vmul.f32 %v3064_v18, %v562_v21  ;;  %v2246_v35 = vor.u32 %v2898_v32, %v2243_v33  ;;  %v2235_v38 = vld [vmem:[%s3225_s16 + $0x8] sm:$0xf0]  ;;  %v2919_v39 = vld [vmem:[%s3237_s27 + $0x38] sm:$0xff]  ;;  %v2191_v41 = vld [vmem:[%s3225_s16 + $0x30] sm:$0xf]  ;;  %vm663_vm4 = vcmask 785408  }
  0x2c   : > { %v2903_v42 = vld [vmem:[%s3225_s16 + $0x34] sm:$0xf0]  ;;  %v2238_v44 = vor.u32 %v2896_v37, %v2235_v38  ;;  %v2904_v46 = vld [vmem:[%s3225_s16 + $0x44] sm:$0xf]  ;;  %v2201_v47 = vld [vmem:[%s3225_s16 + $0x48] sm:$0xf0] }
  0x2d   : > { %vm583_vm2 = vcmp.ge.f32.partialorder %v566_v26, 0.0  ;;  %v584_v34 = vmul.f32 0.9, %v566_v26  ;;  %736 = vmatpush.bf16.msra.mxu3 %v2246_v35  ;;  %v2918_v48 = vld [vmem:[%s3237_s27 + $0x30] sm:$0xff]  ;;  %v2183_v49 = vld [vmem:[%s3225_s16 + $0x20] sm:$0xf]  ;;  %v2192_v52 = vor.u32 %v2903_v42, %v2191_v41  ;;  %v2204_v56 = vor.u32 %v2904_v46, %v2201_v47 }
  0x2e   : > { %671 = vmatpush.bf16.msra.mxu0 %v2208_v25  ;;  %683 = vmatpush.bf16.msra.mxu1 %v2220_v29  ;;  %v2901_v50 = vld [vmem:[%s3225_s16 + $0x24] sm:$0xf0]  ;;  %v2927_v51 = vld [vmem:[%s3237_s27 + $0xb8] sm:$0xff]  ;;  %v2902_v53 = vld [vmem:[%s3225_s16 + $0x34] sm:$0xf]  ;;  %s3517_s14 = sld [smem:[#allocation6_spill]] }
  0x2f   : > { %v3296_v40 = vsel %vm583_vm2, %v566_v26, %v584_v34  ;;  %824 = vmatpush.bf16.msrb.mxu2 %v2919_v39  ;;  %v2193_v54 = vld [vmem:[%s3225_s16 + $0x38] sm:$0xf0]  ;;  %v2917_v55 = vld [vmem:[%s3237_s27 + $0x28] sm:$0xff]  ;;  %v2184_v57 = vor.u32 %v2901_v50, %v2183_v49  ;;  %v555_v58 = vld [vmem:[%s3493_s1] sm:$0xff]  ;;  %vm570_vm9 = vcmask 516096   ;;  %s3129_s15 = smov 96  }
  0x30   : > { %v586_v45 = vpack.c.bf16 %v3296_v40, %v3296_v40  ;;  %v2196_v59 = vor.u32 %v2902_v53, %v2193_v54  ;;  %v2900_v60 = vld [vmem:[%s3225_s16 + $0x24] sm:$0xf]  ;;  %v2185_v61 = vld [vmem:[%s3225_s16 + $0x28] sm:$0xf0]  ;;  %v3319_v63 = vpack.c.bf16 %v555_v58, %v555_v58  ;;  %v2926_v1 = vld [vmem:[%s3237_s27 + $0xb0] sm:$0xff]  ;;  %vm2017_vm2 = vcmask 7168  }
  0x31   : > { %737 = vmatpush.bf16.msra.mxu3 %v2238_v44  ;;  %v2916_v62 = vld [vmem:[%s3237_s27 + $0x20] sm:$0xff]  ;;  %v2188_v0 = vor.u32 %v2900_v60, %v2185_v61  ;;  %v2915_v2 = vld [vmem:[%s3237_s27 + $0x18] sm:$0xff]  ;;  %v2925_v3 = vld [vmem:[%s3237_s27 + $0xa8] sm:$0xff]  ;;  %s3130_s17 = smov [#allocation2]   ;;  %s3518_s3 = sld [smem:[#allocation10_spill]] }
  0x32   : > { %2247 = vmatmul.msk.bf16.vlgmr.msra.gmra.mxu2 %vm713_vm3, %v586_v45  ;;  %672 = vmatpush.bf16.msra.mxu0 %v2200_v36  ;;  %v2914_v4 = vld [vmem:[%s3237_s27 + $0x10] sm:$0xff]  ;;  %v2924_v5 = vld [vmem:[%s3237_s27 + $0xa0] sm:$0xff]  ;;  %v2913_v6 = vld [vmem:[%s3237_s27 + $0x8] sm:$0xff]  ;;  %s2025_s18 = sshll.u32 %s3130_s17, 4  ;;  %p3049_p5 = scmp.eq.s32.totalorder %s3202_s22, 3  ;;  %s2026_s18 = int_to_ptr.vmem [resolvable:$true] %s2025_s18 }
  0x33   : > { %684 = vmatpush.bf16.msra.mxu1 %v2212_v43  ;;  %825 = vmatpush.bf16.msrb.mxu2 %v2918_v48  ;;  %v2923_v7 = vld [vmem:[%s3237_s27 + $0x98] sm:$0xff]  ;;  %v2912_v8 = vld [vmem:[%s3237_s27] sm:$0xff]  ;;  %v2922_v9 = vld [vmem:[%s3237_s27 + $0x90] sm:$0xff] }
  0x34   : > { %2248 = vmatmul.msk.bf16.vlgmr.msra.gmra.mxu3 %vm713_vm3, %v586_v45  ;;  %v2921_v10 = vld [vmem:[%s3237_s27 + $0x88] sm:$0xff]  ;;  %v2935_v11 = vld [vmem:[%s3237_s27 + $0x78] sm:$0xff]  ;;  %v2920_v12 = vld [vmem:[%s3237_s27 + $0x80] sm:$0xff] }
  0x35   : > { %909 = vmatpush.bf16.msrb.mxu3 %v2927_v51  ;;  %v2943_v13 = vld [vmem:[%s3237_s27 + $0xf8] sm:$0xff]  ;;  %v2934_v14 = vld [vmem:[%s3237_s27 + $0x70] sm:$0xff]  ;;  %v2933_v16 = vld [vmem:[%s3237_s27 + $0x68] sm:$0xff] }
  0x36   : > { %673 = vmatpush.bf16.msra.mxu0 %v2192_v52  ;;  %v2942_v15 = vld [vmem:[%s3237_s27 + $0xf0] sm:$0xff]  ;;  %v2941_v17 = vld [vmem:[%s3237_s27 + $0xe8] sm:$0xff]  ;;  %v2932_v18 = vld [vmem:[%s3237_s27 + $0x60] sm:$0xff] }
  0x37   : > { %685 = vmatpush.bf16.msra.mxu1 %v2204_v56  ;;  %826 = vmatpush.bf16.msrb.mxu2 %v2917_v55  ;;  %v2940_v19 = vld [vmem:[%s3237_s27 + $0xe0] sm:$0xff]  ;;  %v2931_v22 = vld [vmem:[%s3237_s27 + $0x58] sm:$0xff]  ;;  %v2930_v27 = vld [vmem:[%s3237_s27 + $0x50] sm:$0xff]  ;;  %s2027_s24 = sshll.u32 %s3518_s3, 4  ;;  %s2028_s24 = int_to_ptr.hbm [resolvable:$true] %s2027_s24 }
  0x38   : > { %v743_v21 = vld [vmem:[%s3517_s14] ss:$2 sm:$0x3]  ;;  %v2929_v44 = vld [vmem:[%s3237_s27 + $0x48] sm:$0xff]  ;;  %v2939_v45 = vld [vmem:[%s3237_s27 + $0xd8] sm:$0xff] }
  0x39   : > { %910 = vmatpush.bf16.msrb.mxu3 %v2926_v1  ;;  %v745_v23 = vperm.slane %v743_v21, 0  ;;  %v746_v30 = vperm.slane %v743_v21, 1  ;;  %v2928_v46 = vld [vmem:[%s3237_s27 + $0x40] sm:$0xff]  ;;  %v2938_v47 = vld [vmem:[%s3237_s27 + $0xd0] sm:$0xff]  ;;  %v2937_v48 = vld [vmem:[%s3237_s27 + $0xc8] sm:$0xff] }
  0x3a   : > { %674 = vmatpush.bf16.msra.mxu0 %v2184_v57  ;;  %v2936_v49 = vld [vmem:[%s3237_s27 + $0xc0] sm:$0xff]  ;;  %v2951_v50 = vld [vmem:[%s3247_s4 + $0x38] sm:$0xff]  ;;  %v2950_v52 = vld [vmem:[%s3247_s4 + $0x30] sm:$0xff] }
  0x3b   : > { %686 = vmatpush.bf16.msra.mxu1 %v2196_v59  ;;  %827 = vmatpush.bf16.msrb.mxu2 %v2916_v62  ;;  %v2959_v51 = vld [vmem:[%s3247_s4 + $0x78] sm:$0xff]  ;;  %v2958_v53 = vld [vmem:[%s3247_s4 + $0x70] sm:$0xff]  ;;  %v2949_v54 = vld [vmem:[%s3247_s4 + $0x28] sm:$0xff] }
  0x3c   : > { %v2957_v55 = vld [vmem:[%s3247_s4 + $0x68] sm:$0xff]  ;;  %v2948_v56 = vld [vmem:[%s3247_s4 + $0x20] sm:$0xff]  ;;  %v2947_v58 = vld [vmem:[%s3247_s4 + $0x18] sm:$0xff] }
  0x3d   : > { %2229 = vmatmul.msk.bf16.vlgmr.msra.gmra.mxu0 %vm663_vm4, %v3319_v63  ;;  %911 = vmatpush.bf16.msrb.mxu3 %v2925_v3  ;;  %v2956_v57 = vld [vmem:[%s3247_s4 + $0x60] sm:$0xff]  ;;  %v2946_v60 = vld [vmem:[%s3247_s4 + $0x10] sm:$0xff] }
  0x3e   : > { %993 = vmatpush.bf16.msrb.mxu0 %v2935_v11  ;;  %v3065_v59 = vld [vmem:[%s3242_s21] ss:$0 sm:$0xff]  ;;  %v2945_v11 = vld [vmem:[%s3247_s4 + $0x8] sm:$0xff] }
  0x3f   : > { %687 = vmatpush.bf16.msra.mxu1 %v2188_v0  ;;  %828 = vmatpush.bf16.msrb.mxu2 %v2915_v2  ;;  %v3066_v0 = vld [vmem:[%s3242_s21 + $0x2] ss:$0 sm:$0xff] }
  0x41   : > { %912 = vmatpush.bf16.msrb.mxu3 %v2924_v5 }
  0x42   : > { %2230 = vmatmul.msk.bf16.vlgmr.msra.gmra.mxu1 %vm663_vm4, %v3319_v63  ;;  %994 = vmatpush.bf16.msrb.mxu0 %v2934_v14  ;;  %v2954_v14 = vld [vmem:[%s3247_s4 + $0x50] sm:$0xff] }
  0x43   : > { %829 = vmatpush.bf16.msrb.mxu2 %v2914_v4  ;;  %1077 = vmatpush.bf16.msrb.mxu1 %v2943_v13  ;;  %v2944_v13 = vld [vmem:[%s3247_s4] sm:$0xff] }
  0x45   : > { %913 = vmatpush.bf16.msrb.mxu3 %v2923_v7 }
  0x46   : > { %995 = vmatpush.bf16.msrb.mxu0 %v2933_v16  ;;  %v2953_v16 = vld [vmem:[%s3247_s4 + $0x48] sm:$0xff] }
  0x47   : > { %830 = vmatpush.bf16.msrb.mxu2 %v2913_v6  ;;  %1078 = vmatpush.bf16.msrb.mxu1 %v2942_v15  ;;  %v558_v15 = vld [vmem:[%s3218_s29] sm:$0x1]  ;;  %s3128_s29 = smov 32  }
  0x49   : > { %914 = vmatpush.bf16.msrb.mxu3 %v2922_v9 }
  0x4a   : > { %996 = vmatpush.bf16.msrb.mxu0 %v2932_v18  ;;  %v2952_v18 = vld [vmem:[%s3247_s4 + $0x40] sm:$0xff] }
  0x4b   : > { %831 = vmatpush.bf16.msrb.mxu2 %v2912_v8  ;;  %1079 = vmatpush.bf16.msrb.mxu1 %v2941_v17  ;;  %v567_v17 = vand.u32 2147483647, %v558_v15 }
  0x4d   : > { %915 = vmatpush.bf16.msrb.mxu3 %v2921_v10  ;;  %3077 = vlog2.f32 %v567_v17  ;;  %v2585_v17 = vld [vmem:[%s3225_s16 + $0x98] sm:$0xf0] }
  0x4e   : > { %997 = vmatpush.bf16.msrb.mxu0 %v2931_v22  ;;  %v3067_v22 = vld [vmem:[%s3242_s21 + $0x1] ss:$0 sm:$0xff] }
  0x4f   : > { %1080 = vmatpush.bf16.msrb.mxu1 %v2940_v19  ;;  %1160 = vmatpush.bf16.msra.mxu2 %v2951_v50 }
  0x51   : > { %916 = vmatpush.bf16.msrb.mxu3 %v2920_v12  ;;  %v2955_v12 = vld [vmem:[%s3247_s4 + $0x58] sm:$0xff] }
  0x52   : > { %998 = vmatpush.bf16.msrb.mxu0 %v2930_v27 }
  0x53   : > { %1081 = vmatpush.bf16.msrb.mxu1 %v2939_v45  ;;  %1161 = vmatpush.bf16.msra.mxu2 %v2950_v52  ;;  %v3078_v19 = vpop.eup %3077 }
  0x55   : > { %1242 = vmatpush.bf16.msra.mxu3 %v2959_v51 }
  0x56   : > { %999 = vmatpush.bf16.msrb.mxu0 %v2929_v44 }
  0x57   : > { %1082 = vmatpush.bf16.msrb.mxu1 %v2938_v47  ;;  %1162 = vmatpush.bf16.msra.mxu2 %v2949_v54  ;;  %v3070_v54 = vld [vmem:[%s3252_s5 + $0x1] ss:$0 sm:$0xff] }
  0x59   : > { %1243 = vmatpush.bf16.msra.mxu3 %v2958_v53 }
  0x5a   : > { %1000 = vmatpush.bf16.msrb.mxu0 %v2928_v46 }
  0x5b   : > { %1083 = vmatpush.bf16.msrb.mxu1 %v2937_v48  ;;  %1163 = vmatpush.bf16.msra.mxu2 %v2948_v56  ;;  %v2565_v56 = vld [vmem:[%s3225_s16 + $0xf0] sm:$0xf] }
  0x5d   : > { %1244 = vmatpush.bf16.msra.mxu3 %v2957_v55 }
  0x5f   : > { %1084 = vmatpush.bf16.msrb.mxu1 %v2936_v49  ;;  %1164 = vmatpush.bf16.msra.mxu2 %v2947_v58  ;;  %v2557_v58 = vld [vmem:[%s3225_s16 + $0xe0] sm:$0xf] }
  0x61   : > { %1245 = vmatpush.bf16.msra.mxu3 %v2956_v57  ;;  %v2975_v57 = vld [vmem:[%s3225_s16 + $0xf4] sm:$0xf0] }
  0x63   : > { %1165 = vmatpush.bf16.msra.mxu2 %v2946_v60  ;;  %v2973_v60 = vld [vmem:[%s3225_s16 + $0xe4] sm:$0xf0] }
  0x65   : > { %1246 = vmatpush.bf16.msra.mxu3 %v2955_v12  ;;  %v2575_v12 = vld [vmem:[%s3225_s16 + $0x80] sm:$0xf] }
  0x67   : > { %1166 = vmatpush.bf16.msra.mxu2 %v2945_v11  ;;  %v2551_v11 = vld [vmem:[%s3225_s16 + $0xd8] sm:$0xf0] }
  0x69   : > { %1247 = vmatpush.bf16.msra.mxu3 %v2954_v14  ;;  %v2962_v14 = vld [vmem:[%s3225_s16 + $0x94] sm:$0xf] }
  0x6b   : > { %1167 = vmatpush.bf16.msra.mxu2 %v2944_v13  ;;  %v2961_v13 = vld [vmem:[%s3225_s16 + $0x84] sm:$0xf0] }
  0x6d   : > { %1248 = vmatpush.bf16.msra.mxu3 %v2953_v16  ;;  %v2576_v16 = vor.u32 %v2961_v13, %v2575_v12  ;;  %v2995_v12 = vld [vmem:[%s3237_s27 + $0x158] sm:$0xff] }
  0x6e   : > { %v3003_v13 = vld [vmem:[%s3237_s27 + $0x1d8] sm:$0xff] }
  0x71   : > { %1249 = vmatpush.bf16.msra.mxu3 %v2952_v18  ;;  %v2541_v18 = vld [vmem:[%s3225_s16 + $0xc0] sm:$0xf] }
  0xb5   : > { %v726_v20 = vpop.f32.mrf.mxu2 }
  0xb7   : > { %v739_v24 = vpop.f32.mrf.mxu3 }
  0xba   : > { %v676_v25 = vpop.f32.mrf.mxu0 }
  0xbb   : > { %v727_v26 = vadd.f32 %v726_v20, %v676_v25  ;;  %v569_v20 = vmul.f32 0.6931472, %v3078_v19  ;;  %v3068_v25 = vld [vmem:[%s3242_s21 + $0x3] ss:$0 sm:$0xff]  ;;  %v2969_v19 = vld [vmem:[%s3225_s16 + $0xc4] sm:$0xf0] }
  0xbd   : > { %v749_v28 = vadd.f32 %v745_v23, %v727_v26  ;;  %v728_v29 = vpop.f32.mrf.mxu2  ;;  %v571_v21 = vsel %vm570_vm9, %v569_v20, 0.0  ;;  %v2588_v20 = vor.u32 %v2962_v14, %v2585_v17  ;;  %v2591_v14 = vld [vmem:[%s3517_s14 + $0x1] ss:$2 sm:$0x3] }
  0xbe   : > { %572 = vadd.xlane.f32.xlu2 %v571_v21  ;;  %v2960_v21 = vld [vmem:[%s3225_s16 + $0x84] sm:$0xf]  ;;  %v1430_v17 = vperm.slane %v2591_v14, 0 }
  0xbf   : > { %v753_v31 = vmul.f32 0.01, %v749_v28  ;;  %v689_v32 = vpop.f32.mrf.mxu1  ;;  %vm751_vm5 = vcmp.ge.f32.partialorder %v749_v28, 0.0  ;;  %v741_v35 = vpop.f32.mrf.mxu3 }
  0xc0   : > { %v740_v33 = vadd.f32 %v739_v24, %v689_v32 }
  0xc1   : > { %v755_v34 = vsel %vm751_vm5, %v749_v28, %v753_v31 }
  0xc2   : > { %v678_v36 = vpop.f32.mrf.mxu0  ;;  %v750_v37 = vadd.f32 %v746_v30, %v740_v33  ;;  %v757_v38 = vpack.c.bf16 %v755_v34, %v755_v34 }
  0xc4   : > { %v754_v39 = vmul.f32 0.01, %v750_v37  ;;  %832 = vmatmul.bf16.vlgmr.msrb.gmra.mxu2 %v757_v38  ;;  %vm752_vm6 = vcmp.ge.f32.partialorder %v750_v37, 0.0  ;;  %v3069_v38 = vld [vmem:[%s3252_s5] ss:$0 sm:$0xff] }
  0xc6   : > { %v756_v41 = vsel %vm752_vm6, %v750_v37, %v754_v39 }
  0xc7   : > { %v840_v42 = vpack.c.bf16 %v756_v41, %v756_v41  ;;  %v691_v43 = vpop.f32.mrf.mxu1 }
  0xc9   : > { %917 = vmatmul.bf16.vlgmr.msrb.gmra.mxu3 %v840_v42 }
  0xca   : > { %1420 = vmatpush.bf16.msrb.mxu3 %v2588_v20 }
 0x131   : > { %v573_v36 = vpop.xlane.xlu2 %572 }
 0x132   : > { %v574_v37 = vrot.slane %v573_v36, 4 }
 0x134   : > { %v575_v39 = vadd.f32 %v574_v37, %v573_v36  ;;  %v2965_v36 = vld [vmem:[%s3225_s16 + $0xa4] sm:$0xf0] }
 0x136   : > { %v576_v42 = vrot.slane %v575_v39, 2 }
 0x138   : > { %v577_v44 = vadd.f32 %v576_v42, %v575_v39 }
 0x13a   : > { %v578_v45 = vrot.slane %v577_v44, 1 }
 0x13c   : > { %v579_v47 = vadd.f32 %v578_v45, %v577_v44  ;;  %v2964_v44 = vld [vmem:[%s3225_s16 + $0xa4] sm:$0xf]  ;;  %v2527_v45 = vld [vmem:[%s3225_s16 + $0xa8] sm:$0xf0] }
 0x13e   : > { %3043 = vpush %v579_v47  ;;  %v2983_v47 = vld [vmem:[%s3237_s27 + $0x138] sm:$0xff] }
 0x147   : > { %v833_v61 = vpop.f32.mrf.mxu2 }
 0x148   : > { %v834_v62 = vadd.f32 %v3065_v59, %v833_v61  ;;  %v2566_v59 = vor.u32 %v2975_v57, %v2565_v56  ;;  %v2974_v61 = vld [vmem:[%s3225_s16 + $0xf4] sm:$0xf] }
 0x149   : > { %v2978_v56 = vld [vmem:[%s3237_s27 + $0x110] sm:$0xff] }
 0x14a   : > { %vm837_vm7 = vcmp.ge.f32.partialorder %v834_v62, 0.0  ;;  %v838_v1 = vmul.f32 0.01, %v834_v62  ;;  %1351 = vmatpush.bf16.msra.mxu0 %v2566_v59  ;;  %v2986_v57 = vld [vmem:[%s3237_s27 + $0x190] sm:$0xff] }
 0x14c   : > { %v839_v2 = vsel %vm837_vm7, %v834_v62, %v838_v1  ;;  %v918_v3 = vpop.f32.mrf.mxu3  ;;  %v2567_v62 = vld [vmem:[%s3225_s16 + $0xf8] sm:$0xf0]  ;;  %v2558_v1 = vor.u32 %v2973_v60, %v2557_v58 }
 0x14d   : > { %v925_v4 = vpack.c.bf16 %v839_v2, %v839_v2  ;;  %v919_v5 = vadd.f32 %v3066_v0, %v918_v3  ;;  %v2583_v0 = vld [vmem:[%s3225_s16 + $0x90] sm:$0xf]  ;;  %v2570_v3 = vor.u32 %v2974_v61, %v2567_v62  ;;  %v2977_v62 = vld [vmem:[%s3237_s27 + $0x108] sm:$0xff] }
 0x14e   : > { %v2549_v2 = vld [vmem:[%s3225_s16 + $0xd0] sm:$0xf]  ;;  %1352 = vmatpush.bf16.msra.mxu0 %v2558_v1  ;;  %v2976_v1 = vld [vmem:[%s3237_s27 + $0x100] sm:$0xff] }
 0x14f   : > { %v835_v6 = vpop.f32.mrf.mxu2  ;;  %1001 = vmatmul.bf16.vlgmr.msrb.gmra.mxu0 %v925_v4  ;;  %vm922_vm8 = vcmp.ge.f32.partialorder %v919_v5, 0.0  ;;  %v923_v7 = vmul.f32 0.01, %v919_v5  ;;  %v2963_v4 = vld [vmem:[%s3225_s16 + $0x94] sm:$0xf0]  ;;  %1364 = vmatpush.bf16.msra.mxu1 %v2570_v3 }
 0x150   : > { %v2584_v6 = vor.u32 %v2963_v4, %v2583_v0  ;;  %v2985_v0 = vld [vmem:[%s3237_s27 + $0x188] sm:$0xff]  ;;  %v2999_v4 = vld [vmem:[%s3237_s27 + $0x178] sm:$0xff] }
 0x151   : > { %v924_v8 = vsel %vm922_vm8, %v919_v5, %v923_v7  ;;  %v2971_v5 = vld [vmem:[%s3225_s16 + $0xd4] sm:$0xf0]  ;;  %v2972_v7 = vld [vmem:[%s3225_s16 + $0xe4] sm:$0xf] }
 0x152   : > { %v1009_v9 = vpack.c.bf16 %v924_v8, %v924_v8  ;;  %v2559_v8 = vld [vmem:[%s3225_s16 + $0xe8] sm:$0xf0]  ;;  %1407 = vmatpush.bf16.msrb.mxu2 %v2584_v6  ;;  %v2550_v15 = vor.u32 %v2971_v5, %v2549_v2  ;;  %v2984_v2 = vld [vmem:[%s3237_s27 + $0x180] sm:$0xff]  ;;  %v3007_v5 = vld [vmem:[%s3237_s27 + $0x1f8] sm:$0xff] }
 0x153   : > { %v2998_v6 = vld [vmem:[%s3237_s27 + $0x170] sm:$0xff] }
 0x154   : > { %1085 = vmatmul.bf16.vlgmr.msrb.gmra.mxu1 %v1009_v9  ;;  %v920_v10 = vpop.f32.mrf.mxu3  ;;  %v2562_v9 = vor.u32 %v2972_v7, %v2559_v8  ;;  %1353 = vmatpush.bf16.msra.mxu0 %v2550_v15  ;;  %v3006_v7 = vld [vmem:[%s3237_s27 + $0x1f0] sm:$0xff]  ;;  %v2997_v8 = vld [vmem:[%s3237_s27 + $0x168] sm:$0xff] }
 0x155   : > { %v2970_v10 = vld [vmem:[%s3225_s16 + $0xd4] sm:$0xf] }
 0x156   : > { %1365 = vmatpush.bf16.msra.mxu1 %v2562_v9  ;;  %1408 = vmatpush.bf16.msrb.mxu2 %v2576_v16  ;;  %v3005_v9 = vld [vmem:[%s3237_s27 + $0x1e8] sm:$0xff]  ;;  %v2994_v15 = vld [vmem:[%s3237_s27 + $0x150] sm:$0xff] }
 0x157   : > { %v3002_v16 = vld [vmem:[%s3237_s27 + $0x1d0] sm:$0xff] }
 0x1cc   : > { %v1002_v23 = vpop.f32.mrf.mxu0 }
 0x1cd   : > { %v1003_v24 = vadd.f32 %v3067_v22, %v1002_v23  ;;  %v2554_v22 = vor.u32 %v2970_v10, %v2551_v11  ;;  %v2577_v23 = vld [vmem:[%s3225_s16 + $0x88] sm:$0xf0]  ;;  %v2996_v10 = vld [vmem:[%s3237_s27 + $0x160] sm:$0xff] }
 0x1ce   : > { %v3004_v11 = vld [vmem:[%s3237_s27 + $0x1e0] sm:$0xff] }
 0x1cf   : > { %vm1006_vm10 = vcmp.ge.f32.partialorder %v1003_v24, 0.0  ;;  %v1007_v26 = vmul.f32 0.01, %v1003_v24  ;;  %1366 = vmatpush.bf16.msra.mxu1 %v2554_v22 }
 0x1d1   : > { %v1008_v27 = vsel %vm1006_vm10, %v1003_v24, %v1007_v26  ;;  %v1086_v28 = vpop.f32.mrf.mxu1  ;;  %v2968_v24 = vld [vmem:[%s3225_s16 + $0xc4] sm:$0xf]  ;;  %v2580_v26 = vor.u32 %v2960_v21, %v2577_v23 }
 0x1d2   : > { %v1093_v29 = vpack.c.bf16 %v1008_v27, %v1008_v27  ;;  %v1087_v30 = vadd.f32 %v3068_v25, %v1086_v28  ;;  %v2543_v25 = vld [vmem:[%s3225_s16 + $0xc8] sm:$0xf0]  ;;  %v2542_v28 = vor.u32 %v2969_v19, %v2541_v18  ;;  %v1431_v18 = vperm.slane %v2591_v14, 1 }
 0x1d3   : > { %1421 = vmatpush.bf16.msrb.mxu3 %v2580_v26 }
 0x1d4   : > { %v1004_v31 = vpop.f32.mrf.mxu0  ;;  %1168 = vmatmul.bf16.vlgmr.msra.gmra.mxu2 %v1093_v29  ;;  %vm1090_vm11 = vcmp.ge.f32.partialorder %v1087_v30, 0.0  ;;  %v1091_v32 = vmul.f32 0.01, %v1087_v30  ;;  %v2533_v29 = vld [vmem:[%s3225_s16 + $0xb0] sm:$0xf]  ;;  %1354 = vmatpush.bf16.msra.mxu0 %v2542_v28 }
 0x1d5   : > { %v2546_v31 = vor.u32 %v2968_v24, %v2543_v25  ;;  %1680 = vmatpush.bf16.msra.mxu2 %v2999_v4  ;;  %v3010_v4 = vld [vmem:[%s3247_s4 + $0x90] sm:$0xff] }
 0x1d6   : > { %v1092_v33 = vsel %vm1090_vm11, %v1087_v30, %v1091_v32  ;;  %v2967_v30 = vld [vmem:[%s3225_s16 + $0xb4] sm:$0xf0]  ;;  %v2966_v32 = vld [vmem:[%s3225_s16 + $0xb4] sm:$0xf] }
 0x1d7   : > { %v1174_v34 = vpack.c.bf16 %v1092_v33, %v1092_v33  ;;  %v2535_v33 = vld [vmem:[%s3225_s16 + $0xb8] sm:$0xf0]  ;;  %1367 = vmatpush.bf16.msra.mxu1 %v2546_v31 }
 0x1d8   : > { %v2538_v37 = vor.u32 %v2966_v32, %v2535_v33  ;;  %v2993_v33 = vld [vmem:[%s3237_s27 + $0x148] sm:$0xff] }
 0x1d9   : > { %1250 = vmatmul.bf16.vlgmr.msra.gmra.mxu3 %v1174_v34  ;;  %v1088_v35 = vpop.f32.mrf.mxu1  ;;  %v2534_v34 = vor.u32 %v2967_v30, %v2533_v29  ;;  %1681 = vmatpush.bf16.msra.mxu2 %v2998_v6 }
 0x1da   : > { %v2525_v35 = vld [vmem:[%s3225_s16 + $0xa0] sm:$0xf]  ;;  %1764 = vmatpush.bf16.msra.mxu3 %v3007_v5  ;;  %v3018_v5 = vld [vmem:[%s3247_s4 + $0xd0] sm:$0xff] }
 0x1db   : > { %1355 = vmatpush.bf16.msra.mxu0 %v2534_v34  ;;  %1368 = vmatpush.bf16.msra.mxu1 %v2538_v37  ;;  %v3001_v34 = vld [vmem:[%s3237_s27 + $0x1c8] sm:$0xff] }
 0x1dc   : > { %v3040_v37 = vld [vmem:[%s3258_s20 + $0x8] sm:$0xff]  }
 0x1dd   : > { %1682 = vmatpush.bf16.msra.mxu2 %v2997_v8  ;;  %v3017_v8 = vld [vmem:[%s3247_s4 + $0xc8] sm:$0xff] }
 0x1de   : > { %1765 = vmatpush.bf16.msra.mxu3 %v3006_v7  ;;  %v3009_v7 = vld [vmem:[%s3247_s4 + $0x88] sm:$0xff] }
 0x1e1   : > { %1683 = vmatpush.bf16.msra.mxu2 %v2996_v10  ;;  %v3016_v10 = vld [vmem:[%s3247_s4 + $0xc0] sm:$0xff] }
 0x1e2   : > { %1766 = vmatpush.bf16.msra.mxu3 %v3005_v9  ;;  %v3008_v9 = vld [vmem:[%s3247_s4 + $0x80] sm:$0xff] }
 0x1e5   : > { %1684 = vmatpush.bf16.msra.mxu2 %v2995_v12  ;;  %v3074_v12 = vld [vmem:[%s3242_s21 + $0x7] ss:$0 sm:$0xff] }
 0x1e6   : > { %1767 = vmatpush.bf16.msra.mxu3 %v3004_v11  ;;  %v3073_v11 = vld [vmem:[%s3242_s21 + $0x5] ss:$0 sm:$0xff] }
 0x1e9   : > { %1685 = vmatpush.bf16.msra.mxu2 %v2994_v15 }
 0x1ea   : > { %1768 = vmatpush.bf16.msra.mxu3 %v3003_v13 }
 0x1ed   : > { %1686 = vmatpush.bf16.msra.mxu2 %v2993_v33 }
 0x1ee   : > { %1769 = vmatpush.bf16.msra.mxu3 %v3002_v16 }
 0x1f2   : > { %1770 = vmatpush.bf16.msra.mxu3 %v3001_v34 }
 0x257   : > { %v1169_v41 = vpop.f32.mrf.mxu2 }
 0x258   : > { %v1170_v43 = vadd.f32 %v3069_v38, %v1169_v41  ;;  %v2526_v41 = vor.u32 %v2965_v36, %v2525_v35  ;;  %v2992_v35 = vld [vmem:[%s3237_s27 + $0x140] sm:$0xff] }
 0x259   : > { %v3000_v36 = vld [vmem:[%s3237_s27 + $0x1c0] sm:$0xff]  ;;  %1687 = vmatpush.bf16.msra.mxu2 %v2992_v35 }
 0x25a   : > { %3079 = vtanh.f32 %v1170_v43  ;;  %1356 = vmatpush.bf16.msra.mxu0 %v2526_v41  ;;  %1771 = vmatpush.bf16.msra.mxu3 %v3000_v36  ;;  %v3030_v41 = vunpack.c.l.bf16 %v3040_v37 }
 0x25c   : > { %v1251_v46 = vpop.f32.mrf.mxu3 }
 0x25d   : > { %v1252_v55 = vadd.f32 %v3070_v54, %v1251_v46  ;;  %2571 = vmatmul.msk.bf16.vlgmr.msra.gmra.mxu0 %vm663_vm4, %v3319_v63  ;;  %v2530_v46 = vor.u32 %v2964_v44, %v2527_v45  ;;  %v2988_v54 = vld [vmem:[%s3237_s27 + $0x1a0] sm:$0xff]  ;;  %v3015_v44 = vld [vmem:[%s3247_s4 + $0xb8] sm:$0xff] }
 0x25e   : > { %1511 = vmatpush.bf16.msrb.mxu0 %v2983_v47  ;;  %v3023_v45 = vld [vmem:[%s3247_s4 + $0xf8] sm:$0xff]  ;;  %v3022_v47 = vld [vmem:[%s3247_s4 + $0xf0] sm:$0xff] }
 0x25f   : > { %v1171_v48 = vpop.f32.mrf.mxu2  ;;  %1369 = vmatpush.bf16.msra.mxu1 %v2530_v46  ;;  %v3014_v46 = vld [vmem:[%s3247_s4 + $0xb0] sm:$0xff] }
 0x260   : > { %v3080_v49 = vpop.eup %3079  ;;  %v2991_v48 = vld [vmem:[%s3237_s27 + $0x1b8] sm:$0xff] }
 0x261   : > { %v1267_v50 = vsel %vm713_vm3, %v3080_v49, 0.0  ;;  %v1255_v51 = vmul.f32 1.442695, %v3080_v49  ;;  %v2982_v49 = vld [vmem:[%s3237_s27 + $0x130] sm:$0xff] }
 0x262   : > { %1268 = vadd.xlane.f32.xlu2 %v1267_v50  ;;  %2572 = vmatmul.msk.bf16.vlgmr.msra.gmra.mxu1 %vm663_vm4, %v3319_v63  ;;  %v2990_v50 = vld [vmem:[%s3237_s27 + $0x1b0] sm:$0xff]  ;;  %v2979_v63 = vld [vmem:[%s3237_s27 + $0x118] sm:$0xff] }
 0x263   : > { %3081 = vpow2.f32 %v1255_v51  ;;  %1596 = vmatpush.bf16.msrb.mxu1 %v2991_v48  ;;  %1512 = vmatpush.bf16.msrb.mxu0 %v2982_v49  ;;  %v2981_v51 = vld [vmem:[%s3237_s27 + $0x128] sm:$0xff]  ;;  %v3071_v48 = vld [vmem:[%s3242_s21 + $0x4] ss:$0 sm:$0xff]  ;;  %v3072_v49 = vld [vmem:[%s3242_s21 + $0x6] ss:$0 sm:$0xff] }
 0x264   : > { %v1253_v52 = vpop.f32.mrf.mxu3 }
 0x265   : > { %v2989_v52 = vld [vmem:[%s3237_s27 + $0x1a8] sm:$0xff] }
 0x267   : > { %1597 = vmatpush.bf16.msrb.mxu1 %v2990_v50  ;;  %1513 = vmatpush.bf16.msrb.mxu0 %v2981_v51  ;;  %v3013_v50 = vld [vmem:[%s3247_s4 + $0xa8] sm:$0xff] }
 0x268   : > { %v3021_v51 = vld [vmem:[%s3247_s4 + $0xe8] sm:$0xff] }
 0x269   : > { %v3082_v53 = vpop.eup %3081 }
 0x26a   : > { %1258 = vrot.lane.b32.xlu0 %v3082_v53, %s3128_s29  ;;  %v2980_v53 = vld [vmem:[%s3237_s27 + $0x120] sm:$0xff] }
 0x26b   : > { %1598 = vmatpush.bf16.msrb.mxu1 %v2989_v52  ;;  %1514 = vmatpush.bf16.msrb.mxu0 %v2980_v53 }
 0x26f   : > { %1599 = vmatpush.bf16.msrb.mxu1 %v2988_v54  ;;  %1515 = vmatpush.bf16.msrb.mxu0 %v2979_v63 }
 0x272   : > { %1263 = vrot.lane.b32.xlu0 %v1252_v55, %s3128_s29  ;;  %v2987_v55 = vld [vmem:[%s3237_s27 + $0x198] sm:$0xff] }
 0x273   : > { %1600 = vmatpush.bf16.msrb.mxu1 %v2987_v55  ;;  %1516 = vmatpush.bf16.msrb.mxu0 %v2978_v56  ;;  %v3012_v55 = vld [vmem:[%s3247_s4 + $0xa0] sm:$0xff] }
 0x274   : > { %v3020_v56 = vld [vmem:[%s3247_s4 + $0xe0] sm:$0xff] }
 0x277   : > { %1601 = vmatpush.bf16.msrb.mxu1 %v2986_v57  ;;  %1517 = vmatpush.bf16.msrb.mxu0 %v2977_v62 }
 0x27b   : > { %1602 = vmatpush.bf16.msrb.mxu1 %v2985_v0  ;;  %1518 = vmatpush.bf16.msrb.mxu0 %v2976_v1  ;;  %v3011_v0 = vld [vmem:[%s3247_s4 + $0x98] sm:$0xff] }
 0x27c   : > { %v3019_v1 = vld [vmem:[%s3247_s4 + $0xd8] sm:$0xff]  ;;  %s3044_s4 = spop %3043 }
 0x27f   : > { %1603 = vmatpush.bf16.msrb.mxu1 %v2984_v2  ;;  %1848 = vmatpush.bf16.msra.mxu0 %v3015_v44 }
 0x283   : > { %1930 = vmatpush.bf16.msra.mxu1 %v3023_v45  ;;  %1849 = vmatpush.bf16.msra.mxu0 %v3014_v46  ;;  %v554_v46 = vld [vmem:[%s3504_s12] sm:$0xff] }
 0x287   : > { %1931 = vmatpush.bf16.msra.mxu1 %v3022_v47  ;;  %1850 = vmatpush.bf16.msra.mxu0 %v3013_v50  ;;  %v581_v47 = vstv %s3044_s4 }
 0x28b   : > { %1932 = vmatpush.bf16.msra.mxu1 %v3021_v51  ;;  %1851 = vmatpush.bf16.msra.mxu0 %v3012_v55 }
 0x28f   : > { %1933 = vmatpush.bf16.msra.mxu1 %v3020_v56  ;;  %1852 = vmatpush.bf16.msra.mxu0 %v3011_v0 }
 0x293   : > { %1934 = vmatpush.bf16.msra.mxu1 %v3019_v1  ;;  %1853 = vmatpush.bf16.msra.mxu0 %v3010_v4 }
 0x297   : > { %1935 = vmatpush.bf16.msra.mxu1 %v3018_v5  ;;  %1854 = vmatpush.bf16.msra.mxu0 %v3009_v7 }
 0x29b   : > { %1936 = vmatpush.bf16.msra.mxu1 %v3017_v8  ;;  %1855 = vmatpush.bf16.msra.mxu0 %v3008_v9 }
 0x29f   : > { %1937 = vmatpush.bf16.msra.mxu1 %v3016_v10 }
 0x2da   : > { %v1358_v59 = vpop.f32.mrf.mxu0 }
 0x2dc   : > { %v1259_v27 = vpop.permute.xlu0 %1258 }
 0x2dd   : > { %v1261_v38 = vmul.f32 %v1259_v27, %v3296_v40 }
 0x2df   : > { %v1371_v61 = vpop.f32.mrf.mxu1 }
 0x2e2   : > { %v1360_v60 = vpop.f32.mrf.mxu0 }
 0x2e4   : > { %v1264_v39 = vpop.permute.xlu0 %1263 }
 0x2e5   : > { %v1266_v42 = vadd.f32 %v1264_v39, %v1261_v38  ;;  %v3025_v38 = vld [vmem:[%s3258_s20] sm:$0xff]   ;;  %v3031_v39 = vunpack.c.h.bf16 %v3040_v37 }
 0x2e7   : > { %v1271_v43 = vpack.c.bf16 %v1266_v42, %v1266_v42  ;;  %v1373_v3 = vpop.f32.mrf.mxu1 }
 0x2e9   : > { %1376 = vrot.lane.b32.xlu1 %v1271_v43, %s3129_s15  ;;  %v3026_v43 = vunpack.c.l.bf16 %v3025_v38 }
 0x2f1   : > { %1991 = vrot.lane.b32.xlu1 %v1266_v42, %s3129_s15  ;;  %v3027_v42 = vunpack.c.h.bf16 %v3025_v38 }
 0x35b   : > { %v1377_v58 = vpop.permute.xlu1 %1376 }
 0x35c   : > { %2589 = vmatmul.msk.bf16.vlgmr.msrb.gmra.mxu2 %vm713_vm3, %v1377_v58  ;;  %2590 = vmatmul.msk.bf16.vlgmr.msrb.gmra.mxu3 %vm713_vm3, %v1377_v58 }
 0x35d   : > { %2007 = vmatpush.msrb.mxu3 %v3031_v39 }
 0x35f   : > { %2008 = vmatpush.msrb.mxu3 %v3030_v41  ;;  %v3076_v41 = vld [vmem:[%s3252_s5 + $0x3] ss:$0 sm:$0xff] }
 0x361   : > { %2009 = vmatpush.msrb.mxu3 %v3027_v42 }
 0x363   : > { %2010 = vmatpush.msrb.mxu3 %v3026_v43  ;;  %v1992_v6 = vpop.permute.xlu1 %1991 }
 0x3df   : > { %v1410_v19 = vpop.f32.mrf.mxu2  ;;  %v1423_v20 = vpop.f32.mrf.mxu3 }
 0x3e0   : > { %v1411_v21 = vadd.f32 %v1410_v19, %v1358_v59  ;;  %v1424_v22 = vadd.f32 %v1423_v20, %v1371_v61 }
 0x3e2   : > { %v1434_v23 = vadd.f32 %v1430_v17, %v1411_v21  ;;  %v1435_v24 = vadd.f32 %v1431_v18, %v1424_v22 }
 0x3e4   : > { %vm1436_vm12 = vcmp.ge.f32.partialorder %v1434_v23, 0.0  ;;  %v1438_v25 = vmul.f32 0.01, %v1434_v23  ;;  %vm1437_vm13 = vcmp.ge.f32.partialorder %v1435_v24, 0.0  ;;  %v1439_v26 = vmul.f32 0.01, %v1435_v24 }
 0x3e6   : > { %v1440_v27 = vsel %vm1436_vm12, %v1434_v23, %v1438_v25  ;;  %v1441_v28 = vsel %vm1437_vm13, %v1435_v24, %v1439_v26  ;;  %v3042_v25 = vld [vmem:[%s3258_s20 + $0x18] sm:$0xff]  }
 0x3e7   : > { %v1442_v29 = vpack.c.bf16 %v1440_v27, %v1440_v27  ;;  %v1527_v30 = vpack.c.bf16 %v1441_v28, %v1441_v28  ;;  %v1412_v31 = vpop.f32.mrf.mxu2  ;;  %v1425_v32 = vpop.f32.mrf.mxu3  ;;  %v3039_v26 = vunpack.c.h.bf16 %v3042_v25  ;;  %v3038_v27 = vunpack.c.l.bf16 %v3042_v25  ;;  %v3041_v28 = vld [vmem:[%s3258_s20 + $0x10] sm:$0xff]  }
 0x3e8   : > { %v3075_v31 = vld [vmem:[%s3252_s5 + $0x2] ss:$0 sm:$0xff] }
 0x3e9   : > { %1519 = vmatmul.bf16.vlgmr.msrb.gmra.mxu0 %v1442_v29  ;;  %1604 = vmatmul.bf16.vlgmr.msrb.gmra.mxu1 %v1527_v30  ;;  %v3035_v29 = vunpack.c.h.bf16 %v3041_v28  ;;  %v3034_v30 = vunpack.c.l.bf16 %v3041_v28 }
 0x3ea   : > { %1982 = vmatpush.msrb.mxu2 %v3039_v26 }
 0x3ec   : > { %1983 = vmatpush.msrb.mxu2 %v3038_v27 }
 0x3ee   : > { %1984 = vmatpush.msrb.mxu2 %v3035_v29 }
 0x3f0   : > { %1985 = vmatpush.msrb.mxu2 %v3034_v30 }
 0x466   : > { %v1520_v52 = vpop.f32.mrf.mxu0  ;;  %v1605_v53 = vpop.f32.mrf.mxu1 }
 0x467   : > { %v1521_v54 = vadd.f32 %v3071_v48, %v1520_v52  ;;  %v1606_v63 = vadd.f32 %v3072_v49, %v1605_v53  ;;  %v582_v48 = vadd.f32 %v581_v47, %v554_v46  ;;  %v1269_v49 = vpop.xlane.xlu2 %1268 }
 0x469   : > { %vm1524_vm14 = vcmp.ge.f32.partialorder %v1521_v54, 0.0  ;;  %v1525_v57 = vmul.f32 0.01, %v1521_v54  ;;  %vm1609_vm15 = vcmp.ge.f32.partialorder %v1606_v63, 0.0  ;;  %v1610_v58 = vmul.f32 0.01, %v1606_v63 }
 0x46a   : > { %v1270_v50 = vadd.f32 %v1269_v49, %v582_v48 }
 0x46b   : > { %v1526_v59 = vsel %vm1524_vm14, %v1521_v54, %v1525_v57  ;;  %v1611_v60 = vsel %vm1609_vm15, %v1606_v63, %v1610_v58 }
 0x46c   : > { %v1612_v61 = vpack.c.bf16 %v1526_v59, %v1526_v59  ;;  %v1696_v62 = vpack.c.bf16 %v1611_v60, %v1611_v60 }
 0x46e   : > { %v1522_v2 = vpop.f32.mrf.mxu0  ;;  %v1607_v3 = vpop.f32.mrf.mxu1  ;;  %1688 = vmatmul.bf16.vlgmr.msra.gmra.mxu2 %v1612_v61  ;;  %1772 = vmatmul.bf16.vlgmr.msra.gmra.mxu3 %v1696_v62 }
 0x47e   : > { %2885 = vmatmul.msk.f32.vlgmr.msrb.gmra.mxu3 %vm713_vm3, %v1992_v6 }
 0x4f1   : > { %v1689_v13 = vpop.f32.mrf.mxu2  ;;  %v1773_v14 = vpop.f32.mrf.mxu3 }
 0x4f2   : > { %v1690_v15 = vadd.f32 %v3073_v11, %v1689_v13  ;;  %v1774_v16 = vadd.f32 %v3074_v12, %v1773_v14 }
 0x4f4   : > { %vm1693_vm0 = vcmp.ge.f32.partialorder %v1690_v15, 0.0  ;;  %v1694_v17 = vmul.f32 0.01, %v1690_v15  ;;  %vm1777_vm1 = vcmp.ge.f32.partialorder %v1774_v16, 0.0  ;;  %v1778_v18 = vmul.f32 0.01, %v1774_v16 }
 0x4f6   : > { %v1695_v19 = vsel %vm1693_vm0, %v1690_v15, %v1694_v17  ;;  %v1779_v20 = vsel %vm1777_vm1, %v1774_v16, %v1778_v18 }
 0x4f7   : > { %v1780_v21 = vpack.c.bf16 %v1695_v19, %v1695_v19  ;;  %v1862_v22 = vpack.c.bf16 %v1779_v20, %v1779_v20 }
 0x4f9   : > { %v1691_v23 = vpop.f32.mrf.mxu2  ;;  %v1775_v24 = vpop.f32.mrf.mxu3  ;;  %1856 = vmatmul.bf16.vlgmr.msra.gmra.mxu0 %v1780_v21  ;;  %1938 = vmatmul.bf16.vlgmr.msra.gmra.mxu1 %v1862_v22 }
 0x576   : > { %v1857_v32 = vpop.f32.mrf.mxu0  ;;  %v1939_v33 = vpop.f32.mrf.mxu1 }
 0x577   : > { %v1858_v34 = vadd.f32 %v3075_v31, %v1857_v32  ;;  %v1940_v43 = vadd.f32 %v3076_v41, %v1939_v33 }
 0x579   : > { %3083 = vtanh.f32 %v1858_v34 }
 0x57e   : > { %v1859_v35 = vpop.f32.mrf.mxu0  ;;  %v1941_v36 = vpop.f32.mrf.mxu1 }
 0x57f   : > { %v3084_v37 = vpop.eup %3083 }
 0x580   : > { %v1943_v38 = vmul.f32 1.442695, %v3084_v37  ;;  %v1947_v39 = vsel %vm713_vm3, %v3084_v37, 0.0 }
 0x581   : > { %1948 = vadd.xlane.f32.xlu0 %v1947_v39 }
 0x582   : > { %3085 = vpow2.f32 %v1943_v38 }
 0x588   : > { %v3086_v42 = vpop.eup %3085 }
 0x589   : > { %v1945_v44 = vmul.f32 %v3086_v42, %v3296_v40  ;;  %v2012_v40 = vpop.f32.mrf.mxu3 }
 0x58b   : > { %v1946_v45 = vadd.f32 %v1945_v44, %v1940_v43 }
 0x58d   : > { %2884 = vmatmul.msk.f32.vlgmr.msrb.gmra.mxu2 %vm713_vm3, %v1946_v45  ;;  %vm2015_vm3 = vcmask 523264  }
 0x5f4   : > { %v1949_v51 = vpop.xlane.xlu0 %1948 }
 0x5f5   : > { %v1950_v52 = vadd.f32 %v1949_v51, %v1270_v50 }
 0x5f7   : > { %2018 = vst.msk [vmem:[%s3504_s12] sm:$0xff] %vm2017_vm2, %v1950_v52 }
 0x610   : > { %v1987_v53 = vpop.f32.mrf.mxu2 }
 0x611   : > { %v2013_v54 = vadd.f32 %v2012_v40, %v1987_v53 }
 0x613   : > { %2016 = vst.msk [vmem:[#allocation2] sm:$0xff] %vm2015_vm3, %v2013_v54 }
 0x614   : > { %3046 = dma.vmem_to_hbm [thread:$0]  (%p3049_p5), %s2026_s18, 128, %s2028_s24, [#allocation3]  }
 0x615   : > { %3120 = dma.done.wait (%p3049_p5), [#allocation3], 128  }
 0x616   : > { %3122 = vsyncadd (%p3049_p5), [#allocation3], 4294967168 }
 0x617 PF: > { %s3519_s30 = sld [smem:[#allocation5_spill]] }
 0x61d   : > { %s24_s21 = sadd.s32 1, %s3519_s30  }
 0x61e   : > { %p21_p6 = scmp.ge.s32.totalorder %s24_s21, 6  }
 0x620   :  { %23 = sbr.rel (!%p21_p6) target bundleno = 6 (0x6), region = 142 }
 0x625   :  { %2047 = vsyncpa [#allocation3], 1 }
 0x626   :  { %2049 = vsyncpa [#allocation3 + $0x1], 1 }

// kernel: supervised_transformer_forward.2
= control target key start
LH: loop header
LB: loop body
LE: loop exit
PB: predicated region body
PF: predicated region fallthrough
CT: control target
= control target key end

     0   :  { %s4091_s12 = smov 0   ;;  %s4418_s0 = inlined_call_operand.vmem [shape: f32[8,12288], index: 0, kind: input, shape index: {}]   ;;  %s4419_s1 = inlined_call_operand.vmem [shape: bf16[12288,64], index: 1, kind: input, shape index: {}]   ;;  %s4420_s2 = inlined_call_operand.vmem [shape: f32[1,64], index: 2, kind: input, shape index: {}]   ;;  %s4421_s3 = inlined_call_operand.vmem [shape: f32[8,64], index: 3, kind: output, shape index: {}]  }
   0x1 LB: > { %s2763_s13 = sadd.s32 4294967295, %s4069_s12   ;;  %p2766_p0 = scmp.ge.s32.totalorder %s4069_s12, 1  ;;  %s4069_s12 = sphi %s4091_s12, %s13_s12  }
   0x2   : > { %p144_p1 = scmp.lt.s32.totalorder %s4069_s12, 4 }
   0x4   : > { %p145_p2 = pnand %p2766_p0, %p144_p1 }
   0x5   : > { %s2767_s14 = sshll.u32 (!%p145_p2), %s2763_s13, 5  ;;  %s2769_s15 = sshll.u32 (!%p145_p2), %s2763_s13, 9 }
   0x6   : > { %148 = sbr.rel (%p145_p2) target bundleno = 420 (0x1a4), region = 32  ;;  %p169_p3 = scmp.lt.s32.totalorder (!%p145_p2), %s2767_s14, 95 }
   0x7   : > { %p175_p4 = scmp.lt.s32.totalorder (!%p145_p2), %s2769_s15, 1535  ;;  %p2771_p5 = scmp.ne.s32.totalorder (!%p145_p2), %s2763_s13, 0 }
   0xb   : > { %s4423_s14 = smov (!%p169_p3, %s2767_s14), 95  ;;  %s4425_s15 = smov (!%p175_p4, %s2769_s15), 1535 }
   0xc   : > { %s2768_s16 = sshll.u32 %s4423_s14, 3  ;;  %s2770_s20 = sshll.u32 %s4425_s15, 2 }
   0xd   : > { %s4102_s19 = scalar_lea.vmem %s4418_s0, %s2768_s16  ;;  %s4107_s23 = scalar_lea.vmem %s4419_s1, %s2770_s20 }
   0xe   : > { %183 = sbr.rel (%p2771_p5) target bundleno = 21 (0x15), region = 36 }
  0x13   : > { %v4062_v0 = vld [vmem:[%s4420_s2] ss:$0 sm:$0xff]  ;;  %vm189_vm0 = vcmask 523264  }
  0x14   : > { %190 = vst.msk [vmem:[%s4421_s3] sm:$0xff] %vm189_vm0, %v4062_v0 }
  0x15 PF: > { %v3805_v1 = vld [vmem:[%s4107_s23 + $0x38] sm:$0xff]  ;;  %v3804_v5 = vld [vmem:[%s4107_s23 + $0x30] sm:$0xff]  ;;  %v3803_v9 = vld [vmem:[%s4107_s23 + $0x28] sm:$0xff]  ;;  %vm2721_vm1 = vcmask 523264  }
  0x16   : > { %v3813_v2 = vld [vmem:[%s4107_s23 + $0x78] sm:$0xff]  ;;  %2304 = vmatpush.bf16.msra.mxu0 %v3805_v1  ;;  %v3812_v6 = vld [vmem:[%s4107_s23 + $0x70] sm:$0xff]  ;;  %v3811_v10 = vld [vmem:[%s4107_s23 + $0x68] sm:$0xff] }
  0x17   : > { %v3821_v3 = vld [vmem:[%s4107_s23 + $0xb8] sm:$0xff]  ;;  %2317 = vmatpush.bf16.msra.mxu1 %v3813_v2  ;;  %v3820_v7 = vld [vmem:[%s4107_s23 + $0xb0] sm:$0xff]  ;;  %v3819_v11 = vld [vmem:[%s4107_s23 + $0xa8] sm:$0xff] }
  0x18   : > { %v3829_v4 = vld [vmem:[%s4107_s23 + $0xf8] sm:$0xff]  ;;  %2330 = vmatpush.bf16.msra.mxu2 %v3821_v3  ;;  %v3828_v8 = vld [vmem:[%s4107_s23 + $0xf0] sm:$0xff]  ;;  %v3827_v12 = vld [vmem:[%s4107_s23 + $0xe8] sm:$0xff] }
  0x19   : > { %2343 = vmatpush.bf16.msra.mxu3 %v3829_v4  ;;  %v3802_v13 = vld [vmem:[%s4107_s23 + $0x20] sm:$0xff]  ;;  %v3801_v17 = vld [vmem:[%s4107_s23 + $0x18] sm:$0xff]  ;;  %v3800_v21 = vld [vmem:[%s4107_s23 + $0x10] sm:$0xff] }
  0x1a   : > { %2305 = vmatpush.bf16.msra.mxu0 %v3804_v5  ;;  %v3810_v14 = vld [vmem:[%s4107_s23 + $0x60] sm:$0xff]  ;;  %v3809_v18 = vld [vmem:[%s4107_s23 + $0x58] sm:$0xff]  ;;  %v3808_v22 = vld [vmem:[%s4107_s23 + $0x50] sm:$0xff] }
  0x1b   : > { %2318 = vmatpush.bf16.msra.mxu1 %v3812_v6  ;;  %v3818_v15 = vld [vmem:[%s4107_s23 + $0xa0] sm:$0xff]  ;;  %v3817_v19 = vld [vmem:[%s4107_s23 + $0x98] sm:$0xff]  ;;  %v3816_v23 = vld [vmem:[%s4107_s23 + $0x90] sm:$0xff] }
  0x1c   : > { %2331 = vmatpush.bf16.msra.mxu2 %v3820_v7  ;;  %v3826_v16 = vld [vmem:[%s4107_s23 + $0xe0] sm:$0xff]  ;;  %v3825_v20 = vld [vmem:[%s4107_s23 + $0xd8] sm:$0xff]  ;;  %v3824_v24 = vld [vmem:[%s4107_s23 + $0xd0] sm:$0xff] }
  0x1d   : > { %2344 = vmatpush.bf16.msra.mxu3 %v3828_v8  ;;  %v3799_v25 = vld [vmem:[%s4107_s23 + $0x8] sm:$0xff]  ;;  %v3798_v29 = vld [vmem:[%s4107_s23] sm:$0xff]  ;;  %v3837_v33 = vld [vmem:[%s4107_s23 + $0x138] sm:$0xff] }
  0x1e   : > { %2306 = vmatpush.bf16.msra.mxu0 %v3803_v9  ;;  %v3807_v26 = vld [vmem:[%s4107_s23 + $0x48] sm:$0xff]  ;;  %v3806_v30 = vld [vmem:[%s4107_s23 + $0x40] sm:$0xff]  ;;  %v194_v34 = vld [vmem:[%s4102_s19 + $0x10] sm:$0xff] }
  0x1f   : > { %2319 = vmatpush.bf16.msra.mxu1 %v3811_v10  ;;  %v3815_v27 = vld [vmem:[%s4107_s23 + $0x88] sm:$0xff]  ;;  %v3814_v31 = vld [vmem:[%s4107_s23 + $0x80] sm:$0xff]  ;;  %v3845_v36 = vld [vmem:[%s4107_s23 + $0x178] sm:$0xff]  ;;  %v226_v41 = vpack.c.bf16 %v194_v34, %v194_v34 }
  0x20   : > { %2332 = vmatpush.bf16.msra.mxu2 %v3819_v11  ;;  %v3823_v28 = vld [vmem:[%s4107_s23 + $0xc8] sm:$0xff]  ;;  %v3822_v32 = vld [vmem:[%s4107_s23 + $0xc0] sm:$0xff]  ;;  %v195_v37 = vld [vmem:[%s4102_s19 + $0x18] sm:$0xff] }
  0x21   : > { %2345 = vmatpush.bf16.msra.mxu3 %v3827_v12  ;;  %v192_v35 = vld [vmem:[%s4102_s19] sm:$0xff]  ;;  %v193_v38 = vld [vmem:[%s4102_s19 + $0x8] sm:$0xff]  ;;  %v3853_v39 = vld [vmem:[%s4107_s23 + $0x1b8] sm:$0xff]  ;;  %v227_v43 = vpack.c.bf16 %v195_v37, %v195_v37 }
  0x22   : > { %2307 = vmatpush.bf16.msra.mxu0 %v3802_v13  ;;  %v3861_v40 = vld [vmem:[%s4107_s23 + $0x1f8] sm:$0xff]  ;;  %v224_v42 = vpack.c.bf16 %v192_v35, %v192_v35  ;;  %v225_v44 = vpack.c.bf16 %v193_v38, %v193_v38  ;;  %v3836_v45 = vld [vmem:[%s4107_s23 + $0x130] sm:$0xff]  ;;  %v3835_v49 = vld [vmem:[%s4107_s23 + $0x128] sm:$0xff] }
  0x23   : > { %2320 = vmatpush.bf16.msra.mxu1 %v3810_v14  ;;  %v3844_v46 = vld [vmem:[%s4107_s23 + $0x170] sm:$0xff]  ;;  %v3843_v50 = vld [vmem:[%s4107_s23 + $0x168] sm:$0xff]  ;;  %v3834_v53 = vld [vmem:[%s4107_s23 + $0x120] sm:$0xff] }
  0x24   : > { %2333 = vmatpush.bf16.msra.mxu2 %v3818_v15  ;;  %v3852_v47 = vld [vmem:[%s4107_s23 + $0x1b0] sm:$0xff]  ;;  %v3851_v51 = vld [vmem:[%s4107_s23 + $0x1a8] sm:$0xff]  ;;  %v3842_v54 = vld [vmem:[%s4107_s23 + $0x160] sm:$0xff] }
  0x25   : > { %2346 = vmatpush.bf16.msra.mxu3 %v3826_v16  ;;  %v3860_v48 = vld [vmem:[%s4107_s23 + $0x1f0] sm:$0xff]  ;;  %v3859_v52 = vld [vmem:[%s4107_s23 + $0x1e8] sm:$0xff]  ;;  %v3850_v55 = vld [vmem:[%s4107_s23 + $0x1a0] sm:$0xff] }
  0x26   : > { %2308 = vmatpush.bf16.msra.mxu0 %v3801_v17  ;;  %v3858_v56 = vld [vmem:[%s4107_s23 + $0x1e0] sm:$0xff]  ;;  %v3833_v57 = vld [vmem:[%s4107_s23 + $0x118] sm:$0xff]  ;;  %v3832_v61 = vld [vmem:[%s4107_s23 + $0x110] sm:$0xff] }
  0x27   : > { %2321 = vmatpush.bf16.msra.mxu1 %v3809_v18  ;;  %v3841_v58 = vld [vmem:[%s4107_s23 + $0x158] sm:$0xff]  ;;  %v3840_v62 = vld [vmem:[%s4107_s23 + $0x150] sm:$0xff]  ;;  %v3831_v1 = vld [vmem:[%s4107_s23 + $0x108] sm:$0xff] }
  0x28   : > { %2334 = vmatpush.bf16.msra.mxu2 %v3817_v19  ;;  %v3849_v59 = vld [vmem:[%s4107_s23 + $0x198] sm:$0xff]  ;;  %v3848_v63 = vld [vmem:[%s4107_s23 + $0x190] sm:$0xff]  ;;  %v3839_v2 = vld [vmem:[%s4107_s23 + $0x148] sm:$0xff] }
  0x29   : > { %2347 = vmatpush.bf16.msra.mxu3 %v3825_v20  ;;  %v3857_v60 = vld [vmem:[%s4107_s23 + $0x1d8] sm:$0xff]  ;;  %v3856_v0 = vld [vmem:[%s4107_s23 + $0x1d0] sm:$0xff]  ;;  %v3847_v3 = vld [vmem:[%s4107_s23 + $0x188] sm:$0xff] }
  0x2a   : > { %2309 = vmatpush.bf16.msra.mxu0 %v3800_v21  ;;  %v3855_v4 = vld [vmem:[%s4107_s23 + $0x1c8] sm:$0xff]  ;;  %v3830_v5 = vld [vmem:[%s4107_s23 + $0x100] sm:$0xff]  ;;  %v3869_v9 = vld [vmem:[%s4107_s23 + $0x238] sm:$0xff] }
  0x2b   : > { %2322 = vmatpush.bf16.msra.mxu1 %v3808_v22  ;;  %v3838_v6 = vld [vmem:[%s4107_s23 + $0x140] sm:$0xff]  ;;  %v198_v10 = vld [vmem:[%s4102_s19 + $0x30] sm:$0xff]  ;;  %v3877_v12 = vld [vmem:[%s4107_s23 + $0x278] sm:$0xff] }
  0x2c   : > { %2335 = vmatpush.bf16.msra.mxu2 %v3816_v23  ;;  %v3846_v7 = vld [vmem:[%s4107_s23 + $0x180] sm:$0xff]  ;;  %v199_v13 = vld [vmem:[%s4102_s19 + $0x38] sm:$0xff]  ;;  %v197_v14 = vld [vmem:[%s4102_s19 + $0x28] sm:$0xff]  ;;  %v230_v17 = vpack.c.bf16 %v198_v10, %v198_v10 }
  0x2d   : > { %2348 = vmatpush.bf16.msra.mxu3 %v3824_v24  ;;  %v3854_v8 = vld [vmem:[%s4107_s23 + $0x1c0] sm:$0xff]  ;;  %v3885_v15 = vld [vmem:[%s4107_s23 + $0x2b8] sm:$0xff]  ;;  %v231_v19 = vpack.c.bf16 %v199_v13, %v199_v13  ;;  %v229_v20 = vpack.c.bf16 %v197_v14, %v197_v14  ;;  %v3868_v21 = vld [vmem:[%s4107_s23 + $0x230] sm:$0xff] }
  0x2e   : > { %2310 = vmatpush.bf16.msra.mxu0 %v3799_v25  ;;  %v196_v11 = vld [vmem:[%s4102_s19 + $0x20] sm:$0xff]  ;;  %v3893_v16 = vld [vmem:[%s4107_s23 + $0x2f8] sm:$0xff]  ;;  %v3876_v22 = vld [vmem:[%s4107_s23 + $0x270] sm:$0xff] }
  0x2f   : > { %2323 = vmatpush.bf16.msra.mxu1 %v3807_v26  ;;  %v228_v18 = vpack.c.bf16 %v196_v11, %v196_v11  ;;  %v3884_v23 = vld [vmem:[%s4107_s23 + $0x2b0] sm:$0xff]  ;;  %v3867_v25 = vld [vmem:[%s4107_s23 + $0x228] sm:$0xff]  ;;  %v3873_v34 = vld [vmem:[%s4107_s23 + $0x258] sm:$0xff] }
  0x30   : > { %2336 = vmatpush.bf16.msra.mxu2 %v3815_v27  ;;  %v3892_v24 = vld [vmem:[%s4107_s23 + $0x2f0] sm:$0xff]  ;;  %v3875_v26 = vld [vmem:[%s4107_s23 + $0x268] sm:$0xff]  ;;  %v3881_v35 = vld [vmem:[%s4107_s23 + $0x298] sm:$0xff] }
  0x31   : > { %2349 = vmatpush.bf16.msra.mxu3 %v3823_v28  ;;  %v3883_v27 = vld [vmem:[%s4107_s23 + $0x2a8] sm:$0xff]  ;;  %v3864_v37 = vld [vmem:[%s4107_s23 + $0x210] sm:$0xff]  ;;  %v3905_v10 = vld [vmem:[%s4107_s23 + $0x358] sm:$0xff] }
  0x32   : > { %2311 = vmatpush.bf16.msra.mxu0 %v3798_v29  ;;  %v3891_v28 = vld [vmem:[%s4107_s23 + $0x2e8] sm:$0xff]  ;;  %v3866_v29 = vld [vmem:[%s4107_s23 + $0x220] sm:$0xff]  ;;  %v3872_v38 = vld [vmem:[%s4107_s23 + $0x250] sm:$0xff] }
  0x33   : > { %2324 = vmatpush.bf16.msra.mxu1 %v3806_v30  ;;  %v3874_v30 = vld [vmem:[%s4107_s23 + $0x260] sm:$0xff]  ;;  %v3913_v11 = vld [vmem:[%s4107_s23 + $0x398] sm:$0xff]  ;;  %v3896_v13 = vld [vmem:[%s4107_s23 + $0x310] sm:$0xff] }
  0x34   : > { %2337 = vmatpush.bf16.msra.mxu2 %v3814_v31  ;;  %v3882_v31 = vld [vmem:[%s4107_s23 + $0x2a0] sm:$0xff]  ;;  %v3904_v14 = vld [vmem:[%s4107_s23 + $0x350] sm:$0xff] }
  0x35   : > { %2350 = vmatpush.bf16.msra.mxu3 %v3822_v32  ;;  %2312 = vmatmul.bf16.vlgmr.msra.gmra.mxu0 %v224_v42  ;;  %v3890_v32 = vld [vmem:[%s4107_s23 + $0x2e0] sm:$0xff]  ;;  %v3871_v42 = vld [vmem:[%s4107_s23 + $0x248] sm:$0xff] }
  0x36   : > { %2356 = vmatpush.bf16.msrb.mxu0 %v3837_v33  ;;  %2325 = vmatmul.bf16.vlgmr.msra.gmra.mxu1 %v225_v44  ;;  %v3865_v33 = vld [vmem:[%s4107_s23 + $0x218] sm:$0xff]  ;;  %v3887_v44 = vld [vmem:[%s4107_s23 + $0x2c8] sm:$0xff] }
  0x37   : > { %2369 = vmatpush.bf16.msrb.mxu1 %v3845_v36  ;;  %2338 = vmatmul.bf16.vlgmr.msra.gmra.mxu2 %v226_v41  ;;  %v3889_v36 = vld [vmem:[%s4107_s23 + $0x2d8] sm:$0xff]  ;;  %v3863_v41 = vld [vmem:[%s4107_s23 + $0x208] sm:$0xff] }
  0x38   : > { %2382 = vmatpush.bf16.msrb.mxu2 %v3853_v39  ;;  %2351 = vmatmul.bf16.vlgmr.msra.gmra.mxu3 %v227_v43  ;;  %v3880_v39 = vld [vmem:[%s4107_s23 + $0x290] sm:$0xff]  ;;  %v3879_v43 = vld [vmem:[%s4107_s23 + $0x288] sm:$0xff] }
  0x39   : > { %2395 = vmatpush.bf16.msrb.mxu3 %v3861_v40  ;;  %v3888_v40 = vld [vmem:[%s4107_s23 + $0x2d0] sm:$0xff] }
  0x3a   : > { %2357 = vmatpush.bf16.msrb.mxu0 %v3836_v45  ;;  %v3862_v45 = vld [vmem:[%s4107_s23 + $0x200] sm:$0xff] }
  0x3b   : > { %2370 = vmatpush.bf16.msrb.mxu1 %v3844_v46  ;;  %v3870_v46 = vld [vmem:[%s4107_s23 + $0x240] sm:$0xff] }
  0x3c   : > { %2383 = vmatpush.bf16.msrb.mxu2 %v3852_v47  ;;  %v3878_v47 = vld [vmem:[%s4107_s23 + $0x280] sm:$0xff] }
  0x3d   : > { %2396 = vmatpush.bf16.msrb.mxu3 %v3860_v48  ;;  %v3886_v48 = vld [vmem:[%s4107_s23 + $0x2c0] sm:$0xff] }
  0x3e   : > { %2358 = vmatpush.bf16.msrb.mxu0 %v3835_v49  ;;  %v3901_v49 = vld [vmem:[%s4107_s23 + $0x338] sm:$0xff] }
  0x3f   : > { %2371 = vmatpush.bf16.msrb.mxu1 %v3843_v50  ;;  %v200_v50 = vld [vmem:[%s4102_s19 + $0x40] sm:$0xff] }
  0x40   : > { %2384 = vmatpush.bf16.msrb.mxu2 %v3851_v51  ;;  %v202_v51 = vld [vmem:[%s4102_s19 + $0x50] sm:$0xff] }
  0x41   : > { %2397 = vmatpush.bf16.msrb.mxu3 %v3859_v52  ;;  %v3909_v52 = vld [vmem:[%s4107_s23 + $0x378] sm:$0xff] }
  0x42   : > { %2359 = vmatpush.bf16.msrb.mxu0 %v3834_v53  ;;  %v201_v53 = vld [vmem:[%s4102_s19 + $0x48] sm:$0xff] }
  0x43   : > { %2372 = vmatpush.bf16.msrb.mxu1 %v3842_v54  ;;  %v203_v54 = vld [vmem:[%s4102_s19 + $0x58] sm:$0xff] }
  0x44   : > { %2385 = vmatpush.bf16.msrb.mxu2 %v3850_v55  ;;  %v3917_v55 = vld [vmem:[%s4107_s23 + $0x3b8] sm:$0xff] }
  0x45   : > { %2398 = vmatpush.bf16.msrb.mxu3 %v3858_v56  ;;  %v3925_v56 = vld [vmem:[%s4107_s23 + $0x3f8] sm:$0xff] }
  0x46   : > { %2360 = vmatpush.bf16.msrb.mxu0 %v3833_v57  ;;  %v232_v57 = vpack.c.bf16 %v200_v50, %v200_v50  ;;  %v3937_v50 = vld [vmem:[%s4107_s23 + $0x458] sm:$0xff] }
  0x47   : > { %2373 = vmatpush.bf16.msrb.mxu1 %v3841_v58  ;;  %v234_v58 = vpack.c.bf16 %v202_v51, %v202_v51  ;;  %v3945_v51 = vld [vmem:[%s4107_s23 + $0x498] sm:$0xff] }
  0x48   : > { %2386 = vmatpush.bf16.msrb.mxu2 %v3849_v59  ;;  %v233_v59 = vpack.c.bf16 %v201_v53, %v201_v53  ;;  %v3928_v53 = vld [vmem:[%s4107_s23 + $0x410] sm:$0xff] }
  0x49   : > { %2399 = vmatpush.bf16.msrb.mxu3 %v3857_v60  ;;  %v235_v60 = vpack.c.bf16 %v203_v54, %v203_v54  ;;  %v3936_v54 = vld [vmem:[%s4107_s23 + $0x450] sm:$0xff] }
  0x4a   : > { %2361 = vmatpush.bf16.msrb.mxu0 %v3832_v61  ;;  %v3900_v61 = vld [vmem:[%s4107_s23 + $0x330] sm:$0xff] }
  0x4b   : > { %2374 = vmatpush.bf16.msrb.mxu1 %v3840_v62  ;;  %v3908_v62 = vld [vmem:[%s4107_s23 + $0x370] sm:$0xff] }
  0x4c   : > { %2387 = vmatpush.bf16.msrb.mxu2 %v3848_v63  ;;  %v3916_v63 = vld [vmem:[%s4107_s23 + $0x3b0] sm:$0xff] }
  0x4d   : > { %2400 = vmatpush.bf16.msrb.mxu3 %v3856_v0  ;;  %v3924_v0 = vld [vmem:[%s4107_s23 + $0x3f0] sm:$0xff] }
  0x4e   : > { %2362 = vmatpush.bf16.msrb.mxu0 %v3831_v1  ;;  %v3899_v1 = vld [vmem:[%s4107_s23 + $0x328] sm:$0xff] }
  0x4f   : > { %2375 = vmatpush.bf16.msrb.mxu1 %v3839_v2  ;;  %v3907_v2 = vld [vmem:[%s4107_s23 + $0x368] sm:$0xff] }
  0x50   : > { %2388 = vmatpush.bf16.msrb.mxu2 %v3847_v3  ;;  %v3915_v3 = vld [vmem:[%s4107_s23 + $0x3a8] sm:$0xff] }
  0x51   : > { %2401 = vmatpush.bf16.msrb.mxu3 %v3855_v4  ;;  %v3923_v4 = vld [vmem:[%s4107_s23 + $0x3e8] sm:$0xff] }
  0x52   : > { %2363 = vmatpush.bf16.msrb.mxu0 %v3830_v5  ;;  %v3898_v5 = vld [vmem:[%s4107_s23 + $0x320] sm:$0xff] }
  0x53   : > { %2376 = vmatpush.bf16.msrb.mxu1 %v3838_v6  ;;  %v3906_v6 = vld [vmem:[%s4107_s23 + $0x360] sm:$0xff] }
  0x54   : > { %2389 = vmatpush.bf16.msrb.mxu2 %v3846_v7  ;;  %v3914_v7 = vld [vmem:[%s4107_s23 + $0x3a0] sm:$0xff] }
  0x55   : > { %2402 = vmatpush.bf16.msrb.mxu3 %v3854_v8  ;;  %2364 = vmatmul.bf16.vlgmr.msrb.gmra.mxu0 %v228_v18  ;;  %v3922_v8 = vld [vmem:[%s4107_s23 + $0x3e0] sm:$0xff]  ;;  %v3903_v18 = vld [vmem:[%s4107_s23 + $0x348] sm:$0xff] }
  0x56   : > { %2408 = vmatpush.bf16.msra.mxu0 %v3869_v9  ;;  %2377 = vmatmul.bf16.vlgmr.msrb.gmra.mxu1 %v229_v20  ;;  %v3897_v9 = vld [vmem:[%s4107_s23 + $0x318] sm:$0xff]  ;;  %v3919_v20 = vld [vmem:[%s4107_s23 + $0x3c8] sm:$0xff] }
  0x57   : > { %2421 = vmatpush.bf16.msra.mxu1 %v3877_v12  ;;  %2390 = vmatmul.bf16.vlgmr.msrb.gmra.mxu2 %v230_v17  ;;  %v3921_v12 = vld [vmem:[%s4107_s23 + $0x3d8] sm:$0xff]  ;;  %v3895_v17 = vld [vmem:[%s4107_s23 + $0x308] sm:$0xff] }
  0x58   : > { %2434 = vmatpush.bf16.msra.mxu2 %v3885_v15  ;;  %2403 = vmatmul.bf16.vlgmr.msrb.gmra.mxu3 %v231_v19  ;;  %v3912_v15 = vld [vmem:[%s4107_s23 + $0x390] sm:$0xff]  ;;  %v3911_v19 = vld [vmem:[%s4107_s23 + $0x388] sm:$0xff] }
  0x59   : > { %2447 = vmatpush.bf16.msra.mxu3 %v3893_v16  ;;  %v3920_v16 = vld [vmem:[%s4107_s23 + $0x3d0] sm:$0xff] }
  0x5a   : > { %2409 = vmatpush.bf16.msra.mxu0 %v3868_v21  ;;  %v3894_v21 = vld [vmem:[%s4107_s23 + $0x300] sm:$0xff] }
  0x5b   : > { %2422 = vmatpush.bf16.msra.mxu1 %v3876_v22  ;;  %v3902_v22 = vld [vmem:[%s4107_s23 + $0x340] sm:$0xff] }
  0x5c   : > { %2435 = vmatpush.bf16.msra.mxu2 %v3884_v23  ;;  %v3910_v23 = vld [vmem:[%s4107_s23 + $0x380] sm:$0xff] }
  0x5d   : > { %2448 = vmatpush.bf16.msra.mxu3 %v3892_v24  ;;  %v3918_v24 = vld [vmem:[%s4107_s23 + $0x3c0] sm:$0xff] }
  0x5e   : > { %2410 = vmatpush.bf16.msra.mxu0 %v3867_v25  ;;  %v3933_v25 = vld [vmem:[%s4107_s23 + $0x438] sm:$0xff] }
  0x5f   : > { %2423 = vmatpush.bf16.msra.mxu1 %v3875_v26  ;;  %v204_v26 = vld [vmem:[%s4102_s19 + $0x60] sm:$0xff] }
  0x60   : > { %2436 = vmatpush.bf16.msra.mxu2 %v3883_v27  ;;  %v206_v27 = vld [vmem:[%s4102_s19 + $0x70] sm:$0xff] }
  0x61   : > { %2449 = vmatpush.bf16.msra.mxu3 %v3891_v28  ;;  %v3941_v28 = vld [vmem:[%s4107_s23 + $0x478] sm:$0xff] }
  0x62   : > { %2411 = vmatpush.bf16.msra.mxu0 %v3866_v29  ;;  %v205_v29 = vld [vmem:[%s4102_s19 + $0x68] sm:$0xff] }
  0x63   : > { %2424 = vmatpush.bf16.msra.mxu1 %v3874_v30  ;;  %v207_v30 = vld [vmem:[%s4102_s19 + $0x78] sm:$0xff] }
  0x64   : > { %2437 = vmatpush.bf16.msra.mxu2 %v3882_v31  ;;  %v3949_v31 = vld [vmem:[%s4107_s23 + $0x4b8] sm:$0xff] }
  0x65   : > { %2450 = vmatpush.bf16.msra.mxu3 %v3890_v32  ;;  %v3957_v32 = vld [vmem:[%s4107_s23 + $0x4f8] sm:$0xff] }
  0x66   : > { %2412 = vmatpush.bf16.msra.mxu0 %v3865_v33  ;;  %v236_v33 = vpack.c.bf16 %v204_v26, %v204_v26  ;;  %v3986_v26 = vld [vmem:[%s4107_s23 + $0x5e0] sm:$0xff] }
  0x67   : > { %2425 = vmatpush.bf16.msra.mxu1 %v3873_v34  ;;  %v238_v34 = vpack.c.bf16 %v206_v27, %v206_v27 }
  0x68   : > { %2438 = vmatpush.bf16.msra.mxu2 %v3881_v35  ;;  %v237_v35 = vpack.c.bf16 %v205_v29, %v205_v29  ;;  %v3969_v29 = vld [vmem:[%s4107_s23 + $0x558] sm:$0xff] }
  0x69   : > { %2451 = vmatpush.bf16.msra.mxu3 %v3889_v36  ;;  %v239_v36 = vpack.c.bf16 %v207_v30, %v207_v30  ;;  %v3977_v30 = vld [vmem:[%s4107_s23 + $0x598] sm:$0xff] }
  0x6a   : > { %2413 = vmatpush.bf16.msra.mxu0 %v3864_v37  ;;  %v3932_v37 = vld [vmem:[%s4107_s23 + $0x430] sm:$0xff] }
  0x6b   : > { %2426 = vmatpush.bf16.msra.mxu1 %v3872_v38  ;;  %v3940_v38 = vld [vmem:[%s4107_s23 + $0x470] sm:$0xff] }
  0x6c   : > { %2439 = vmatpush.bf16.msra.mxu2 %v3880_v39  ;;  %v3948_v39 = vld [vmem:[%s4107_s23 + $0x4b0] sm:$0xff] }
  0x6d   : > { %2452 = vmatpush.bf16.msra.mxu3 %v3888_v40  ;;  %v3956_v40 = vld [vmem:[%s4107_s23 + $0x4f0] sm:$0xff] }
  0x6e   : > { %2414 = vmatpush.bf16.msra.mxu0 %v3863_v41  ;;  %v3931_v41 = vld [vmem:[%s4107_s23 + $0x428] sm:$0xff] }
  0x6f   : > { %2427 = vmatpush.bf16.msra.mxu1 %v3871_v42  ;;  %v3939_v42 = vld [vmem:[%s4107_s23 + $0x468] sm:$0xff] }
  0x70   : > { %2440 = vmatpush.bf16.msra.mxu2 %v3879_v43  ;;  %v3947_v43 = vld [vmem:[%s4107_s23 + $0x4a8] sm:$0xff] }
  0x71   : > { %2453 = vmatpush.bf16.msra.mxu3 %v3887_v44  ;;  %v3955_v44 = vld [vmem:[%s4107_s23 + $0x4e8] sm:$0xff] }
  0x72   : > { %2415 = vmatpush.bf16.msra.mxu0 %v3862_v45  ;;  %v3930_v45 = vld [vmem:[%s4107_s23 + $0x420] sm:$0xff] }
  0x73   : > { %2428 = vmatpush.bf16.msra.mxu1 %v3870_v46  ;;  %v3938_v46 = vld [vmem:[%s4107_s23 + $0x460] sm:$0xff] }
  0x74   : > { %2441 = vmatpush.bf16.msra.mxu2 %v3878_v47  ;;  %v3946_v47 = vld [vmem:[%s4107_s23 + $0x4a0] sm:$0xff] }
  0x75   : > { %2454 = vmatpush.bf16.msra.mxu3 %v3886_v48  ;;  %2416 = vmatmul.bf16.vlgmr.msra.gmra.mxu0 %v232_v57  ;;  %v3954_v48 = vld [vmem:[%s4107_s23 + $0x4e0] sm:$0xff]  ;;  %v3927_v57 = vld [vmem:[%s4107_s23 + $0x408] sm:$0xff] }
  0x76   : > { %2460 = vmatpush.bf16.msrb.mxu0 %v3901_v49  ;;  %2429 = vmatmul.bf16.vlgmr.msra.gmra.mxu1 %v233_v59  ;;  %v3929_v49 = vld [vmem:[%s4107_s23 + $0x418] sm:$0xff]  ;;  %v3943_v59 = vld [vmem:[%s4107_s23 + $0x488] sm:$0xff] }
  0x77   : > { %2473 = vmatpush.bf16.msrb.mxu1 %v3909_v52  ;;  %2442 = vmatmul.bf16.vlgmr.msra.gmra.mxu2 %v234_v58  ;;  %v3953_v52 = vld [vmem:[%s4107_s23 + $0x4d8] sm:$0xff]  ;;  %v3935_v58 = vld [vmem:[%s4107_s23 + $0x448] sm:$0xff] }
  0x78   : > { %2486 = vmatpush.bf16.msrb.mxu2 %v3917_v55  ;;  %2455 = vmatmul.bf16.vlgmr.msra.gmra.mxu3 %v235_v60  ;;  %v3944_v55 = vld [vmem:[%s4107_s23 + $0x490] sm:$0xff]  ;;  %v3951_v60 = vld [vmem:[%s4107_s23 + $0x4c8] sm:$0xff] }
  0x79   : > { %2499 = vmatpush.bf16.msrb.mxu3 %v3925_v56  ;;  %v3952_v56 = vld [vmem:[%s4107_s23 + $0x4d0] sm:$0xff] }
  0x7a   : > { %2461 = vmatpush.bf16.msrb.mxu0 %v3900_v61  ;;  %v3926_v61 = vld [vmem:[%s4107_s23 + $0x400] sm:$0xff] }
  0x7b   : > { %2474 = vmatpush.bf16.msrb.mxu1 %v3908_v62  ;;  %v3934_v62 = vld [vmem:[%s4107_s23 + $0x440] sm:$0xff] }
  0x7c   : > { %2487 = vmatpush.bf16.msrb.mxu2 %v3916_v63  ;;  %v3942_v63 = vld [vmem:[%s4107_s23 + $0x480] sm:$0xff] }
  0x7d   : > { %2500 = vmatpush.bf16.msrb.mxu3 %v3924_v0  ;;  %v3950_v0 = vld [vmem:[%s4107_s23 + $0x4c0] sm:$0xff] }
  0x7e   : > { %2462 = vmatpush.bf16.msrb.mxu0 %v3899_v1  ;;  %v3965_v1 = vld [vmem:[%s4107_s23 + $0x538] sm:$0xff] }
  0x7f   : > { %2475 = vmatpush.bf16.msrb.mxu1 %v3907_v2  ;;  %v208_v2 = vld [vmem:[%s4102_s19 + $0x80] sm:$0xff] }
  0x80   : > { %2488 = vmatpush.bf16.msrb.mxu2 %v3915_v3  ;;  %v210_v3 = vld [vmem:[%s4102_s19 + $0x90] sm:$0xff] }
  0x81   : > { %2501 = vmatpush.bf16.msrb.mxu3 %v3923_v4  ;;  %v3973_v4 = vld [vmem:[%s4107_s23 + $0x578] sm:$0xff] }
  0x82   : > { %2463 = vmatpush.bf16.msrb.mxu0 %v3898_v5  ;;  %v209_v5 = vld [vmem:[%s4102_s19 + $0x88] sm:$0xff] }
  0x83   : > { %2476 = vmatpush.bf16.msrb.mxu1 %v3906_v6  ;;  %v211_v6 = vld [vmem:[%s4102_s19 + $0x98] sm:$0xff] }
  0x84   : > { %2489 = vmatpush.bf16.msrb.mxu2 %v3914_v7  ;;  %v3981_v7 = vld [vmem:[%s4107_s23 + $0x5b8] sm:$0xff] }
  0x85   : > { %2502 = vmatpush.bf16.msrb.mxu3 %v3922_v8  ;;  %v3989_v8 = vld [vmem:[%s4107_s23 + $0x5f8] sm:$0xff] }
  0x86   : > { %2464 = vmatpush.bf16.msrb.mxu0 %v3897_v9  ;;  %v240_v9 = vpack.c.bf16 %v208_v2, %v208_v2  ;;  %v4012_v2 = vld [vmem:[%s4107_s23 + $0x6b0] sm:$0xff] }
  0x87   : > { %2477 = vmatpush.bf16.msrb.mxu1 %v3905_v10  ;;  %v242_v10 = vpack.c.bf16 %v210_v3, %v210_v3  ;;  %v4020_v3 = vld [vmem:[%s4107_s23 + $0x6f0] sm:$0xff] }
  0x88   : > { %2490 = vmatpush.bf16.msrb.mxu2 %v3913_v11  ;;  %v241_v11 = vpack.c.bf16 %v209_v5, %v209_v5  ;;  %v4003_v5 = vld [vmem:[%s4107_s23 + $0x668] sm:$0xff] }
  0x89   : > { %2503 = vmatpush.bf16.msrb.mxu3 %v3921_v12  ;;  %v243_v12 = vpack.c.bf16 %v211_v6, %v211_v6  ;;  %v4011_v6 = vld [vmem:[%s4107_s23 + $0x6a8] sm:$0xff] }
  0x8a   : > { %2465 = vmatpush.bf16.msrb.mxu0 %v3896_v13  ;;  %v3964_v13 = vld [vmem:[%s4107_s23 + $0x530] sm:$0xff] }
  0x8b   : > { %2478 = vmatpush.bf16.msrb.mxu1 %v3904_v14  ;;  %v3972_v14 = vld [vmem:[%s4107_s23 + $0x570] sm:$0xff] }
  0x8c   : > { %2491 = vmatpush.bf16.msrb.mxu2 %v3912_v15  ;;  %v3980_v15 = vld [vmem:[%s4107_s23 + $0x5b0] sm:$0xff] }
  0x8d   : > { %2504 = vmatpush.bf16.msrb.mxu3 %v3920_v16  ;;  %v3988_v16 = vld [vmem:[%s4107_s23 + $0x5f0] sm:$0xff] }
  0x8e   : > { %2466 = vmatpush.bf16.msrb.mxu0 %v3895_v17  ;;  %v3963_v17 = vld [vmem:[%s4107_s23 + $0x528] sm:$0xff] }
  0x8f   : > { %2479 = vmatpush.bf16.msrb.mxu1 %v3903_v18  ;;  %v3971_v18 = vld [vmem:[%s4107_s23 + $0x568] sm:$0xff] }
  0x90   : > { %2492 = vmatpush.bf16.msrb.mxu2 %v3911_v19  ;;  %v3979_v19 = vld [vmem:[%s4107_s23 + $0x5a8] sm:$0xff] }
  0x91   : > { %2505 = vmatpush.bf16.msrb.mxu3 %v3919_v20  ;;  %v3987_v20 = vld [vmem:[%s4107_s23 + $0x5e8] sm:$0xff] }
  0x92   : > { %2467 = vmatpush.bf16.msrb.mxu0 %v3894_v21 }
  0x93   : > { %2480 = vmatpush.bf16.msrb.mxu1 %v3902_v22  ;;  %v3962_v22 = vld [vmem:[%s4107_s23 + $0x520] sm:$0xff] }
  0x94   : > { %2493 = vmatpush.bf16.msrb.mxu2 %v3910_v23  ;;  %v3970_v23 = vld [vmem:[%s4107_s23 + $0x560] sm:$0xff] }
  0x95   : > { %2506 = vmatpush.bf16.msrb.mxu3 %v3918_v24  ;;  %2468 = vmatmul.bf16.vlgmr.msrb.gmra.mxu0 %v236_v33 }
  0x96   : > { %2512 = vmatpush.bf16.msra.mxu0 %v3933_v25  ;;  %2481 = vmatmul.bf16.vlgmr.msrb.gmra.mxu1 %v237_v35  ;;  %v3978_v25 = vld [vmem:[%s4107_s23 + $0x5a0] sm:$0xff] }
  0x97   : > { %2525 = vmatpush.bf16.msra.mxu1 %v3941_v28  ;;  %2494 = vmatmul.bf16.vlgmr.msrb.gmra.mxu2 %v238_v34  ;;  %v3961_v28 = vld [vmem:[%s4107_s23 + $0x518] sm:$0xff] }
  0x98   : > { %2538 = vmatpush.bf16.msra.mxu2 %v3949_v31  ;;  %2507 = vmatmul.bf16.vlgmr.msrb.gmra.mxu3 %v239_v36  ;;  %v3985_v31 = vld [vmem:[%s4107_s23 + $0x5d8] sm:$0xff]  ;;  %v3960_v36 = vld [vmem:[%s4107_s23 + $0x510] sm:$0xff] }
  0x99   : > { %2551 = vmatpush.bf16.msra.mxu3 %v3957_v32 }
  0x9a   : > { %2513 = vmatpush.bf16.msra.mxu0 %v3932_v37  ;;  %v3968_v37 = vld [vmem:[%s4107_s23 + $0x550] sm:$0xff] }
  0x9b   : > { %2526 = vmatpush.bf16.msra.mxu1 %v3940_v38 }
  0x9c   : > { %2539 = vmatpush.bf16.msra.mxu2 %v3948_v39 }
  0x9d   : > { %2552 = vmatpush.bf16.msra.mxu3 %v3956_v40  ;;  %v3976_v40 = vld [vmem:[%s4107_s23 + $0x590] sm:$0xff] }
  0x9e   : > { %2514 = vmatpush.bf16.msra.mxu0 %v3931_v41  ;;  %v3984_v41 = vld [vmem:[%s4107_s23 + $0x5d0] sm:$0xff] }
  0x9f   : > { %2527 = vmatpush.bf16.msra.mxu1 %v3939_v42  ;;  %v3959_v42 = vld [vmem:[%s4107_s23 + $0x508] sm:$0xff] }
  0xa0   : > { %2540 = vmatpush.bf16.msra.mxu2 %v3947_v43  ;;  %v3967_v43 = vld [vmem:[%s4107_s23 + $0x548] sm:$0xff] }
  0xa1   : > { %2553 = vmatpush.bf16.msra.mxu3 %v3955_v44  ;;  %v3975_v44 = vld [vmem:[%s4107_s23 + $0x588] sm:$0xff] }
  0xa2   : > { %2515 = vmatpush.bf16.msra.mxu0 %v3930_v45  ;;  %v3983_v45 = vld [vmem:[%s4107_s23 + $0x5c8] sm:$0xff] }
  0xa3   : > { %2528 = vmatpush.bf16.msra.mxu1 %v3938_v46 }
  0xa4   : > { %2541 = vmatpush.bf16.msra.mxu2 %v3946_v47 }
  0xa5   : > { %2554 = vmatpush.bf16.msra.mxu3 %v3954_v48  ;;  %v3958_v48 = vld [vmem:[%s4107_s23 + $0x500] sm:$0xff] }
  0xa6   : > { %2516 = vmatpush.bf16.msra.mxu0 %v3929_v49  ;;  %v3966_v49 = vld [vmem:[%s4107_s23 + $0x540] sm:$0xff] }
  0xa7   : > { %2529 = vmatpush.bf16.msra.mxu1 %v3937_v50  ;;  %v3974_v50 = vld [vmem:[%s4107_s23 + $0x580] sm:$0xff] }
  0xa8   : > { %2542 = vmatpush.bf16.msra.mxu2 %v3945_v51  ;;  %v3982_v51 = vld [vmem:[%s4107_s23 + $0x5c0] sm:$0xff] }
  0xa9   : > { %2555 = vmatpush.bf16.msra.mxu3 %v3953_v52  ;;  %v3997_v52 = vld [vmem:[%s4107_s23 + $0x638] sm:$0xff] }
  0xaa   : > { %2517 = vmatpush.bf16.msra.mxu0 %v3928_v53  ;;  %v212_v53 = vld [vmem:[%s4102_s19 + $0xa0] sm:$0xff] }
  0xab   : > { %2530 = vmatpush.bf16.msra.mxu1 %v3936_v54  ;;  %v214_v54 = vld [vmem:[%s4102_s19 + $0xb0] sm:$0xff] }
  0xac   : > { %2543 = vmatpush.bf16.msra.mxu2 %v3944_v55  ;;  %v4005_v55 = vld [vmem:[%s4107_s23 + $0x678] sm:$0xff] }
  0xad   : > { %2556 = vmatpush.bf16.msra.mxu3 %v3952_v56  ;;  %v213_v56 = vld [vmem:[%s4102_s19 + $0xa8] sm:$0xff] }
  0xae   : > { %2518 = vmatpush.bf16.msra.mxu0 %v3927_v57  ;;  %v215_v57 = vld [vmem:[%s4102_s19 + $0xb8] sm:$0xff] }
  0xaf   : > { %2531 = vmatpush.bf16.msra.mxu1 %v3935_v58  ;;  %v4013_v58 = vld [vmem:[%s4107_s23 + $0x6b8] sm:$0xff] }
  0xb0   : > { %2544 = vmatpush.bf16.msra.mxu2 %v3943_v59  ;;  %v4021_v59 = vld [vmem:[%s4107_s23 + $0x6f8] sm:$0xff] }
  0xb1   : > { %2557 = vmatpush.bf16.msra.mxu3 %v3951_v60  ;;  %v244_v60 = vpack.c.bf16 %v212_v53, %v212_v53  ;;  %v4036_v53 = vld [vmem:[%s4107_s23 + $0x770] sm:$0xff] }
  0xb2   : > { %2519 = vmatpush.bf16.msra.mxu0 %v3926_v61  ;;  %v2313_v21 = vpop.f32.mrf.mxu0  ;;  %v246_v61 = vpack.c.bf16 %v214_v54, %v214_v54  ;;  %v4044_v54 = vld [vmem:[%s4107_s23 + $0x7b0] sm:$0xff] }
  0xb3   : > { %2532 = vmatpush.bf16.msra.mxu1 %v3934_v62  ;;  %v2326_v24 = vpop.f32.mrf.mxu1  ;;  %v245_v62 = vpack.c.bf16 %v213_v56, %v213_v56  ;;  %v4027_v56 = vld [vmem:[%s4107_s23 + $0x728] sm:$0xff] }
  0xb4   : > { %2545 = vmatpush.bf16.msra.mxu2 %v3942_v63  ;;  %v2327_v27 = vadd.f32 %v2326_v24, %v2313_v21  ;;  %v247_v63 = vpack.c.bf16 %v215_v57, %v215_v57  ;;  %v3992_v24 = vld [vmem:[%s4107_s23 + $0x610] sm:$0xff]  ;;  %v4035_v57 = vld [vmem:[%s4107_s23 + $0x768] sm:$0xff] }
  0xb5   : > { %2558 = vmatpush.bf16.msra.mxu3 %v3950_v0  ;;  %2520 = vmatmul.bf16.vlgmr.msra.gmra.mxu0 %v240_v9  ;;  %v3996_v0 = vld [vmem:[%s4107_s23 + $0x630] sm:$0xff]  ;;  %v3994_v9 = vld [vmem:[%s4107_s23 + $0x620] sm:$0xff] }
  0xb6   : > { %2564 = vmatpush.bf16.msrb.mxu0 %v3965_v1  ;;  %2533 = vmatmul.bf16.vlgmr.msra.gmra.mxu1 %v241_v11  ;;  %v4004_v1 = vld [vmem:[%s4107_s23 + $0x670] sm:$0xff] }
  0xb7   : > { %2577 = vmatpush.bf16.msrb.mxu1 %v3973_v4  ;;  %2546 = vmatmul.bf16.vlgmr.msra.gmra.mxu2 %v242_v10  ;;  %v3995_v4 = vld [vmem:[%s4107_s23 + $0x628] sm:$0xff]  ;;  %v4002_v10 = vld [vmem:[%s4107_s23 + $0x660] sm:$0xff] }
  0xb8   : > { %2590 = vmatpush.bf16.msrb.mxu2 %v3981_v7  ;;  %2559 = vmatmul.bf16.vlgmr.msra.gmra.mxu3 %v243_v12  ;;  %v4019_v7 = vld [vmem:[%s4107_s23 + $0x6e8] sm:$0xff] }
  0xb9   : > { %2603 = vmatpush.bf16.msrb.mxu3 %v3989_v8 }
  0xba   : > { %2565 = vmatpush.bf16.msrb.mxu0 %v3964_v13  ;;  %v2339_v32 = vpop.f32.mrf.mxu2  ;;  %v2315_v35 = vpop.f32.mrf.mxu0  ;;  %v4010_v13 = vld [vmem:[%s4107_s23 + $0x6a0] sm:$0xff] }
  0xbb   : > { %2578 = vmatpush.bf16.msrb.mxu1 %v3972_v14  ;;  %v2340_v33 = vadd.f32 %v2339_v32, %v2327_v27  ;;  %v2352_v34 = vpop.f32.mrf.mxu3  ;;  %v2328_v39 = vpop.f32.mrf.mxu1  ;;  %v4018_v14 = vld [vmem:[%s4107_s23 + $0x6e0] sm:$0xff]  ;;  %v4007_v32 = vld [vmem:[%s4107_s23 + $0x688] sm:$0xff] }
  0xbc   : > { %2591 = vmatpush.bf16.msrb.mxu2 %v3980_v15  ;;  %v4014_v39 = vld [vmem:[%s4107_s23 + $0x6c0] sm:$0xff] }
  0xbd   : > { %2604 = vmatpush.bf16.msrb.mxu3 %v3988_v16  ;;  %v4317_v38 = vadd.f32 %v2352_v34, %v2340_v33  ;;  %v3993_v16 = vld [vmem:[%s4107_s23 + $0x618] sm:$0xff]  ;;  %v4015_v33 = vld [vmem:[%s4107_s23 + $0x6c8] sm:$0xff] }
  0xbe   : > { %2566 = vmatpush.bf16.msrb.mxu0 %v3963_v17  ;;  %v4001_v17 = vld [vmem:[%s4107_s23 + $0x658] sm:$0xff] }
  0xbf   : > { %2579 = vmatpush.bf16.msrb.mxu1 %v3971_v18  ;;  %v4009_v18 = vld [vmem:[%s4107_s23 + $0x698] sm:$0xff] }
  0xc0   : > { %2592 = vmatpush.bf16.msrb.mxu2 %v3979_v19  ;;  %v4017_v19 = vld [vmem:[%s4107_s23 + $0x6d8] sm:$0xff] }
  0xc1   : > { %2605 = vmatpush.bf16.msrb.mxu3 %v3987_v20 }
  0xc2   : > { %2567 = vmatpush.bf16.msrb.mxu0 %v3962_v22  ;;  %v2341_v46 = vpop.f32.mrf.mxu2 }
  0xc3   : > { %2580 = vmatpush.bf16.msrb.mxu1 %v3970_v23  ;;  %v2354_v47 = vpop.f32.mrf.mxu3  ;;  %v4045_v46 = vld [vmem:[%s4107_s23 + $0x7b8] sm:$0xff] }
  0xc4   : > { %2593 = vmatpush.bf16.msrb.mxu2 %v3978_v25  ;;  %v4000_v25 = vld [vmem:[%s4107_s23 + $0x650] sm:$0xff]  ;;  %v4053_v47 = vld [vmem:[%s4107_s23 + $0x7f8] sm:$0xff] }
  0xc5   : > { %2606 = vmatpush.bf16.msrb.mxu3 %v3986_v26 }
  0xc6   : > { %2568 = vmatpush.bf16.msrb.mxu0 %v3961_v28  ;;  %v4008_v28 = vld [vmem:[%s4107_s23 + $0x690] sm:$0xff] }
  0xc7   : > { %2581 = vmatpush.bf16.msrb.mxu1 %v3969_v29  ;;  %v4016_v29 = vld [vmem:[%s4107_s23 + $0x6d0] sm:$0xff] }
  0xc8   : > { %2594 = vmatpush.bf16.msrb.mxu2 %v3977_v30  ;;  %v3991_v30 = vld [vmem:[%s4107_s23 + $0x608] sm:$0xff] }
  0xc9   : > { %2607 = vmatpush.bf16.msrb.mxu3 %v3985_v31  ;;  %v3999_v31 = vld [vmem:[%s4107_s23 + $0x648] sm:$0xff] }
  0xca   : > { %2569 = vmatpush.bf16.msrb.mxu0 %v3960_v36  ;;  %v3990_v36 = vld [vmem:[%s4107_s23 + $0x600] sm:$0xff] }
  0xcb   : > { %2582 = vmatpush.bf16.msrb.mxu1 %v3968_v37  ;;  %v3998_v37 = vld [vmem:[%s4107_s23 + $0x640] sm:$0xff] }
  0xcc   : > { %2595 = vmatpush.bf16.msrb.mxu2 %v3976_v40  ;;  %v4029_v40 = vld [vmem:[%s4107_s23 + $0x738] sm:$0xff] }
  0xcd   : > { %2608 = vmatpush.bf16.msrb.mxu3 %v3984_v41  ;;  %v216_v41 = vld [vmem:[%s4102_s19 + $0xc0] sm:$0xff] }
  0xce   : > { %2570 = vmatpush.bf16.msrb.mxu0 %v3959_v42  ;;  %v218_v42 = vld [vmem:[%s4102_s19 + $0xd0] sm:$0xff] }
  0xcf   : > { %2583 = vmatpush.bf16.msrb.mxu1 %v3967_v43  ;;  %v4037_v43 = vld [vmem:[%s4107_s23 + $0x778] sm:$0xff] }
  0xd0   : > { %2596 = vmatpush.bf16.msrb.mxu2 %v3975_v44  ;;  %v217_v44 = vld [vmem:[%s4102_s19 + $0xc8] sm:$0xff] }
  0xd1   : > { %2609 = vmatpush.bf16.msrb.mxu3 %v3983_v45  ;;  %v219_v45 = vld [vmem:[%s4102_s19 + $0xd8] sm:$0xff] }
  0xd2   : > { %2571 = vmatpush.bf16.msrb.mxu0 %v3958_v48  ;;  %v2365_v8 = vpop.f32.mrf.mxu0  ;;  %v248_v48 = vpack.c.bf16 %v216_v41, %v216_v41 }
  0xd3   : > { %2584 = vmatpush.bf16.msrb.mxu1 %v3966_v49  ;;  %v2366_v11 = vadd.f32 %v2365_v8, %v4317_v38  ;;  %v2378_v12 = vpop.f32.mrf.mxu1  ;;  %v4006_v38 = vld [vmem:[%s4107_s23 + $0x680] sm:$0xff]  ;;  %v250_v49 = vpack.c.bf16 %v218_v42, %v218_v42 }
  0xd4   : > { %2597 = vmatpush.bf16.msrb.mxu2 %v3974_v50  ;;  %v249_v50 = vpack.c.bf16 %v217_v44, %v217_v44 }
  0xd5   : > { %2610 = vmatpush.bf16.msrb.mxu3 %v3982_v51  ;;  %2572 = vmatmul.bf16.vlgmr.msrb.gmra.mxu0 %v244_v60  ;;  %v2379_v15 = vadd.f32 %v2378_v12, %v2366_v11  ;;  %v251_v51 = vpack.c.bf16 %v219_v45, %v219_v45 }
  0xd6   : > { %2616 = vmatpush.bf16.msra.mxu0 %v3997_v52  ;;  %2585 = vmatmul.bf16.vlgmr.msrb.gmra.mxu1 %v245_v62  ;;  %v4028_v52 = vld [vmem:[%s4107_s23 + $0x730] sm:$0xff]  ;;  %v4026_v62 = vld [vmem:[%s4107_s23 + $0x720] sm:$0xff] }
  0xd7   : > { %2629 = vmatpush.bf16.msra.mxu1 %v4005_v55  ;;  %2598 = vmatmul.bf16.vlgmr.msrb.gmra.mxu2 %v246_v61  ;;  %v4052_v55 = vld [vmem:[%s4107_s23 + $0x7f0] sm:$0xff] }
  0xd8   : > { %2642 = vmatpush.bf16.msra.mxu2 %v4013_v58  ;;  %2611 = vmatmul.bf16.vlgmr.msrb.gmra.mxu3 %v247_v63  ;;  %v4043_v58 = vld [vmem:[%s4107_s23 + $0x7a8] sm:$0xff]  ;;  %v4034_v63 = vld [vmem:[%s4107_s23 + $0x760] sm:$0xff] }
  0xd9   : > { %2655 = vmatpush.bf16.msra.mxu3 %v4021_v59  ;;  %v4051_v59 = vld [vmem:[%s4107_s23 + $0x7e8] sm:$0xff] }
  0xda   : > { %2617 = vmatpush.bf16.msra.mxu0 %v3996_v0  ;;  %v2391_v20 = vpop.f32.mrf.mxu2  ;;  %v2367_v23 = vpop.f32.mrf.mxu0 }
  0xdb   : > { %2630 = vmatpush.bf16.msra.mxu1 %v4004_v1  ;;  %v2392_v21 = vadd.f32 %v2391_v20, %v2379_v15  ;;  %v2404_v22 = vpop.f32.mrf.mxu3  ;;  %v2380_v27 = vpop.f32.mrf.mxu1  ;;  %v4042_v1 = vld [vmem:[%s4107_s23 + $0x7a0] sm:$0xff]  ;;  %v4039_v20 = vld [vmem:[%s4107_s23 + $0x788] sm:$0xff] }
  0xdc   : > { %2643 = vmatpush.bf16.msra.mxu2 %v4012_v2  ;;  %v4050_v2 = vld [vmem:[%s4107_s23 + $0x7e0] sm:$0xff] }
  0xdd   : > { %2656 = vmatpush.bf16.msra.mxu3 %v4020_v3  ;;  %v4356_v26 = vadd.f32 %v2404_v22, %v2392_v21  ;;  %v4047_v21 = vld [vmem:[%s4107_s23 + $0x7c8] sm:$0xff]  ;;  %v220_v27 = vld [vmem:[%s4102_s19 + $0xe0] sm:$0xff] }
  0xde   : > { %2618 = vmatpush.bf16.msra.mxu0 %v3995_v4  ;;  %v4025_v4 = vld [vmem:[%s4107_s23 + $0x718] sm:$0xff] }
  0xdf   : > { %2631 = vmatpush.bf16.msra.mxu1 %v4003_v5  ;;  %v4033_v5 = vld [vmem:[%s4107_s23 + $0x758] sm:$0xff] }
  0xe0   : > { %2644 = vmatpush.bf16.msra.mxu2 %v4011_v6  ;;  %v4041_v6 = vld [vmem:[%s4107_s23 + $0x798] sm:$0xff] }
  0xe1   : > { %2657 = vmatpush.bf16.msra.mxu3 %v4019_v7  ;;  %v4049_v7 = vld [vmem:[%s4107_s23 + $0x7d8] sm:$0xff] }
  0xe2   : > { %2619 = vmatpush.bf16.msra.mxu0 %v3994_v9  ;;  %v2393_v34 = vpop.f32.mrf.mxu2 }
  0xe3   : > { %2632 = vmatpush.bf16.msra.mxu1 %v4002_v10  ;;  %v2406_v35 = vpop.f32.mrf.mxu3 }
  0xe4   : > { %2645 = vmatpush.bf16.msra.mxu2 %v4010_v13  ;;  %v4024_v13 = vld [vmem:[%s4107_s23 + $0x710] sm:$0xff] }
  0xe5   : > { %2658 = vmatpush.bf16.msra.mxu3 %v4018_v14  ;;  %v4032_v14 = vld [vmem:[%s4107_s23 + $0x750] sm:$0xff] }
  0xe6   : > { %2620 = vmatpush.bf16.msra.mxu0 %v3993_v16  ;;  %v4040_v16 = vld [vmem:[%s4107_s23 + $0x790] sm:$0xff] }
  0xe7   : > { %2633 = vmatpush.bf16.msra.mxu1 %v4001_v17  ;;  %v4048_v17 = vld [vmem:[%s4107_s23 + $0x7d0] sm:$0xff] }
  0xe8   : > { %2646 = vmatpush.bf16.msra.mxu2 %v4009_v18  ;;  %v4023_v18 = vld [vmem:[%s4107_s23 + $0x708] sm:$0xff] }
  0xe9   : > { %2659 = vmatpush.bf16.msra.mxu3 %v4017_v19  ;;  %v4031_v19 = vld [vmem:[%s4107_s23 + $0x748] sm:$0xff] }
  0xea   : > { %2621 = vmatpush.bf16.msra.mxu0 %v3992_v24  ;;  %v4022_v24 = vld [vmem:[%s4107_s23 + $0x700] sm:$0xff] }
  0xeb   : > { %2634 = vmatpush.bf16.msra.mxu1 %v4000_v25  ;;  %v4030_v25 = vld [vmem:[%s4107_s23 + $0x740] sm:$0xff] }
  0xec   : > { %2647 = vmatpush.bf16.msra.mxu2 %v4008_v28  ;;  %v221_v28 = vld [vmem:[%s4102_s19 + $0xe8] sm:$0xff] }
  0xed   : > { %2660 = vmatpush.bf16.msra.mxu3 %v4016_v29  ;;  %v4046_v29 = vld [vmem:[%s4107_s23 + $0x7c0] sm:$0xff] }
  0xee   : > { %2622 = vmatpush.bf16.msra.mxu0 %v3991_v30  ;;  %v222_v30 = vld [vmem:[%s4102_s19 + $0xf0] sm:$0xff] }
  0xef   : > { %2635 = vmatpush.bf16.msra.mxu1 %v3999_v31  ;;  %v223_v31 = vld [vmem:[%s4102_s19 + $0xf8] sm:$0xff]  ;;  %v254_v34 = vpack.c.bf16 %v222_v30, %v222_v30 }
  0xf0   : > { %2648 = vmatpush.bf16.msra.mxu2 %v4007_v32  ;;  %v252_v32 = vpack.c.bf16 %v220_v27, %v220_v27  ;;  %v255_v35 = vpack.c.bf16 %v223_v31, %v223_v31 }
  0xf1   : > { %2661 = vmatpush.bf16.msra.mxu3 %v4015_v33  ;;  %v253_v33 = vpack.c.bf16 %v221_v28, %v221_v28 }
  0xf2   : > { %2623 = vmatpush.bf16.msra.mxu0 %v3990_v36  ;;  %v2417_v60 = vpop.f32.mrf.mxu0 }
  0xf3   : > { %2636 = vmatpush.bf16.msra.mxu1 %v3998_v37  ;;  %v2418_v61 = vadd.f32 %v2417_v60, %v4356_v26  ;;  %v2430_v0 = vpop.f32.mrf.mxu1  ;;  %v4038_v26 = vld [vmem:[%s4107_s23 + $0x780] sm:$0xff] }
  0xf4   : > { %2649 = vmatpush.bf16.msra.mxu2 %v4006_v38 }
  0xf5   : > { %2662 = vmatpush.bf16.msra.mxu3 %v4014_v39  ;;  %2624 = vmatmul.bf16.vlgmr.msra.gmra.mxu0 %v248_v48  ;;  %v2431_v3 = vadd.f32 %v2430_v0, %v2418_v61 }
  0xf6   : > { %2668 = vmatpush.bf16.msrb.mxu0 %v4029_v40  ;;  %2637 = vmatmul.bf16.vlgmr.msra.gmra.mxu1 %v249_v50 }
  0xf7   : > { %2681 = vmatpush.bf16.msrb.mxu1 %v4037_v43  ;;  %2650 = vmatmul.bf16.vlgmr.msra.gmra.mxu2 %v250_v49 }
  0xf8   : > { %2694 = vmatpush.bf16.msrb.mxu2 %v4045_v46  ;;  %2663 = vmatmul.bf16.vlgmr.msra.gmra.mxu3 %v251_v51 }
  0xf9   : > { %2707 = vmatpush.bf16.msrb.mxu3 %v4053_v47 }
  0xfa   : > { %2669 = vmatpush.bf16.msrb.mxu0 %v4028_v52  ;;  %v2443_v8 = vpop.f32.mrf.mxu2  ;;  %v2419_v11 = vpop.f32.mrf.mxu0 }
  0xfb   : > { %2682 = vmatpush.bf16.msrb.mxu1 %v4036_v53  ;;  %v2444_v9 = vadd.f32 %v2443_v8, %v2431_v3  ;;  %v2456_v10 = vpop.f32.mrf.mxu3  ;;  %v2432_v15 = vpop.f32.mrf.mxu1 }
  0xfc   : > { %2695 = vmatpush.bf16.msrb.mxu2 %v4044_v54 }
  0xfd   : > { %2708 = vmatpush.bf16.msrb.mxu3 %v4052_v55  ;;  %v2457_v12 = vadd.f32 %v2456_v10, %v2444_v9 }
  0xfe   : > { %2670 = vmatpush.bf16.msrb.mxu0 %v4027_v56 }
  0xff   : > { %2683 = vmatpush.bf16.msrb.mxu1 %v4035_v57 }
 0x100   : > { %2696 = vmatpush.bf16.msrb.mxu2 %v4043_v58 }
 0x101   : > { %2709 = vmatpush.bf16.msrb.mxu3 %v4051_v59 }
 0x102   : > { %2671 = vmatpush.bf16.msrb.mxu0 %v4026_v62  ;;  %v2445_v22 = vpop.f32.mrf.mxu2 }
 0x103   : > { %2684 = vmatpush.bf16.msrb.mxu1 %v4034_v63  ;;  %v2458_v23 = vpop.f32.mrf.mxu3 }
 0x104   : > { %2697 = vmatpush.bf16.msrb.mxu2 %v4042_v1 }
 0x105   : > { %2710 = vmatpush.bf16.msrb.mxu3 %v4050_v2 }
 0x106   : > { %2672 = vmatpush.bf16.msrb.mxu0 %v4025_v4 }
 0x107   : > { %2685 = vmatpush.bf16.msrb.mxu1 %v4033_v5 }
 0x108   : > { %2698 = vmatpush.bf16.msrb.mxu2 %v4041_v6 }
 0x109   : > { %2711 = vmatpush.bf16.msrb.mxu3 %v4049_v7 }
 0x10a   : > { %2673 = vmatpush.bf16.msrb.mxu0 %v4024_v13 }
 0x10b   : > { %2686 = vmatpush.bf16.msrb.mxu1 %v4032_v14 }
 0x10c   : > { %2699 = vmatpush.bf16.msrb.mxu2 %v4040_v16 }
 0x10d   : > { %2712 = vmatpush.bf16.msrb.mxu3 %v4048_v17 }
 0x10e   : > { %2674 = vmatpush.bf16.msrb.mxu0 %v4023_v18 }
 0x10f   : > { %2687 = vmatpush.bf16.msrb.mxu1 %v4031_v19 }
 0x110   : > { %2700 = vmatpush.bf16.msrb.mxu2 %v4039_v20 }
 0x111   : > { %2713 = vmatpush.bf16.msrb.mxu3 %v4047_v21 }
 0x112   : > { %2675 = vmatpush.bf16.msrb.mxu0 %v4022_v24  ;;  %v2469_v36 = vpop.f32.mrf.mxu0 }
 0x113   : > { %2688 = vmatpush.bf16.msrb.mxu1 %v4030_v25  ;;  %v2470_v37 = vadd.f32 %v2469_v36, %v2457_v12  ;;  %v2482_v38 = vpop.f32.mrf.mxu1 }
 0x114   : > { %2701 = vmatpush.bf16.msrb.mxu2 %v4038_v26 }
 0x115   : > { %2714 = vmatpush.bf16.msrb.mxu3 %v4046_v29  ;;  %2676 = vmatmul.bf16.vlgmr.msrb.gmra.mxu0 %v252_v32  ;;  %v2483_v39 = vadd.f32 %v2482_v38, %v2470_v37  ;;  %v191_v29 = vld [vmem:[%s4421_s3] sm:$0xff] }
 0x116   : > { %2689 = vmatmul.bf16.vlgmr.msrb.gmra.mxu1 %v253_v33 }
 0x117   : > { %2702 = vmatmul.bf16.vlgmr.msrb.gmra.mxu2 %v254_v34 }
 0x118   : > { %2715 = vmatmul.bf16.vlgmr.msrb.gmra.mxu3 %v255_v35 }
 0x11a   : > { %v2495_v40 = vpop.f32.mrf.mxu2  ;;  %v2471_v43 = vpop.f32.mrf.mxu0 }
 0x11b   : > { %v2496_v41 = vadd.f32 %v2495_v40, %v2483_v39  ;;  %v2508_v42 = vpop.f32.mrf.mxu3  ;;  %v2484_v45 = vpop.f32.mrf.mxu1 }
 0x11d   : > { %v2509_v44 = vadd.f32 %v2508_v42, %v2496_v41 }
 0x122   : > { %v2497_v46 = vpop.f32.mrf.mxu2 }
 0x123   : > { %v2510_v47 = vpop.f32.mrf.mxu3 }
 0x132   : > { %v2521_v48 = vpop.f32.mrf.mxu0 }
 0x133   : > { %v2522_v49 = vadd.f32 %v2521_v48, %v2509_v44  ;;  %v2534_v50 = vpop.f32.mrf.mxu1 }
 0x135   : > { %v2535_v51 = vadd.f32 %v2534_v50, %v2522_v49 }
 0x13a   : > { %v2547_v52 = vpop.f32.mrf.mxu2  ;;  %v2523_v55 = vpop.f32.mrf.mxu0 }
 0x13b   : > { %v2548_v53 = vadd.f32 %v2547_v52, %v2535_v51  ;;  %v2560_v54 = vpop.f32.mrf.mxu3  ;;  %v2536_v57 = vpop.f32.mrf.mxu1 }
 0x13d   : > { %v2561_v56 = vadd.f32 %v2560_v54, %v2548_v53 }
 0x142   : > { %v2549_v58 = vpop.f32.mrf.mxu2 }
 0x143   : > { %v2562_v59 = vpop.f32.mrf.mxu3 }
 0x152   : > { %v2573_v60 = vpop.f32.mrf.mxu0 }
 0x153   : > { %v2586_v61 = vpop.f32.mrf.mxu1  ;;  %v2574_v7 = vadd.f32 %v2573_v60, %v2561_v56 }
 0x155   : > { %v2587_v11 = vadd.f32 %v2586_v61, %v2574_v7 }
 0x15a   : > { %v2599_v62 = vpop.f32.mrf.mxu2  ;;  %v2575_v0 = vpop.f32.mrf.mxu0 }
 0x15b   : > { %v2612_v63 = vpop.f32.mrf.mxu3  ;;  %v2588_v1 = vpop.f32.mrf.mxu1  ;;  %v2600_v12 = vadd.f32 %v2599_v62, %v2587_v11 }
 0x15d   : > { %v2613_v15 = vadd.f32 %v2612_v63, %v2600_v12 }
 0x162   : > { %v2601_v2 = vpop.f32.mrf.mxu2 }
 0x163   : > { %v2614_v3 = vpop.f32.mrf.mxu3 }
 0x172   : > { %v2625_v4 = vpop.f32.mrf.mxu0 }
 0x173   : > { %v2638_v5 = vpop.f32.mrf.mxu1  ;;  %v2626_v16 = vadd.f32 %v2625_v4, %v2613_v15 }
 0x175   : > { %v2639_v17 = vadd.f32 %v2638_v5, %v2626_v16 }
 0x17a   : > { %v2651_v6 = vpop.f32.mrf.mxu2  ;;  %v2627_v9 = vpop.f32.mrf.mxu0 }
 0x17b   : > { %v2664_v8 = vpop.f32.mrf.mxu3  ;;  %v2640_v10 = vpop.f32.mrf.mxu1  ;;  %v2652_v18 = vadd.f32 %v2651_v6, %v2639_v17 }
 0x17d   : > { %v2665_v19 = vadd.f32 %v2664_v8, %v2652_v18 }
 0x182   : > { %v2653_v13 = vpop.f32.mrf.mxu2 }
 0x183   : > { %v2666_v14 = vpop.f32.mrf.mxu3 }
 0x192   : > { %v2677_v20 = vpop.f32.mrf.mxu0 }
 0x193   : > { %v2690_v21 = vpop.f32.mrf.mxu1  ;;  %v2678_v22 = vadd.f32 %v2677_v20, %v2665_v19 }
 0x195   : > { %v2691_v23 = vadd.f32 %v2690_v21, %v2678_v22 }
 0x19a   : > { %v2703_v24 = vpop.f32.mrf.mxu2  ;;  %v2679_v27 = vpop.f32.mrf.mxu0 }
 0x19b   : > { %v2716_v25 = vpop.f32.mrf.mxu3  ;;  %v2704_v26 = vadd.f32 %v2703_v24, %v2691_v23  ;;  %v2692_v28 = vpop.f32.mrf.mxu1 }
 0x19d   : > { %v2717_v30 = vadd.f32 %v2716_v25, %v2704_v26 }
 0x19f   : > { %v2720_v31 = vadd.f32 %v2717_v30, %v191_v29 }
 0x1a1   : > { %2722 = vst.msk [vmem:[%s4421_s3] sm:$0xff] %vm2721_vm1, %v2720_v31 }
 0x1a2   : > { %v2705_v32 = vpop.f32.mrf.mxu2 }
 0x1a3   : > { %v2718_v33 = vpop.f32.mrf.mxu3 }
 0x1a4 PF: > { %s13_s12 = sadd.s32 1, %s4069_s12  }
 0x1a5   : > { %p10_p6 = scmp.ge.s32.totalorder %s13_s12, 5  }
 0x1a7   :  { %12 = sbr.rel (!%p10_p6) target bundleno = 1 (0x1), region = 65 }

</bundles_post_ra>
